<compile_context>
chip_gen: v6e
topology: v6e:2x2x1
jax: 0.10.0
libtpu: 0.0.40
codegen_flags: <defaults>
</compile_context>

<pallas_src>
import math
import functools

import jax
import jax.numpy as jnp
from jax.experimental import pallas as pl

# Small, module-consistent config: n_embd divisible by n_head.
B = 2         # batch
T = 64        # sequence length
C = 32        # n_embd
NH = 4        # n_head
HD = C // NH  # head dim = 8


def _causal_attn_kernel(x_ref, wqkv_ref, bqkv_ref, wprojg_ref, bproj_ref,
                        o_ref, *, batch, n_head):
    bt, c = x_ref.shape          # (B*T, C)
    b = batch
    t = bt // b
    nh = n_head
    hd = c // nh
    g = b * nh                   # fused (batch, head) dim for batched matmuls
    scale = 1.0 / math.sqrt(hd)

    # ---- fused QKV projection over all B*T rows (single M=128 MXU pass) ----
    x = x_ref[...]                                                   # (B*T, C) bf16
    qkv = jnp.dot(x, wqkv_ref[...], preferred_element_type=jnp.float32)
    qkv = qkv + bqkv_ref[...]                                        # (B*T, 3C) f32
    qkv = qkv.reshape(b, t, 3 * c)                                   # leading split (free)

    # ---- one explicit head-leading relayout per tensor: (B*NH, T, HD) ----
    # Static lane slices + stack along a major axis; the attention einsums
    # below then have their batch dim leading (no implicit relayouts).
    def to_heads(col0, mul=None):
        parts = [qkv[:, :, col0 + h * hd: col0 + (h + 1) * hd]
                 for h in range(nh)]                                 # NH x (B, T, HD)
        th = jnp.stack(parts, axis=1).reshape(g, t, hd)              # (G, T, HD) f32
        if mul is not None:
            th = th * mul
        return th.astype(jnp.bfloat16)

    q = to_heads(0 * c, mul=scale)   # softmax scale folded into q (tiny tensor)
    k = to_heads(1 * c)
    v = to_heads(2 * c)

    # ---- scores for all (batch, head) pairs + in-kernel causal mask ----
    s = jnp.einsum("gqd,gkd->gqk", q, k,
                   preferred_element_type=jnp.float32)               # (G, T, T) f32
    row = jax.lax.broadcasted_iota(jnp.int32, (t, t), 0)
    col = jax.lax.broadcasted_iota(jnp.int32, (t, t), 1)
    s = s + jnp.where(col <= row, 0.0, -1e30).astype(jnp.float32)    # bcast over G

    # ---- softmax along keys, all elementwise math in f32 ----
    m = jnp.max(s, axis=-1, keepdims=True)                           # (G, T, 1)
    e = jnp.exp(s - m)                                               # consumes s
    denom = jnp.sum(e, axis=-1, keepdims=True)                       # (G, T, 1)

    # Unnormalized attention output; single approx reciprocal on the small
    # (G, T, HD) result instead of scaling the (G, T, T) probabilities.
    o = jnp.einsum("gqk,gkd->gqd", e.astype(jnp.bfloat16), v,
                   preferred_element_type=jnp.float32)               # (G, T, HD)
    o = o * pl.reciprocal(denom, approx=True)

    # ---- output projection fused with head recombination (no transpose) ----
    # wprojg[b*NH + h] == W_proj[h*HD:(h+1)*HD, :], so summing the per-head
    # partial products over h is exactly concat-heads @ W_proj.
    yh = jnp.einsum("gqd,gdc->gqc", o.astype(jnp.bfloat16), wprojg_ref[...],
                    preferred_element_type=jnp.float32)              # (G, T, C)
    y = jnp.sum(yh.reshape(b, nh, t, c), axis=1)                     # (B, T, C)
    y = y + bproj_ref[...]
    o_ref[...] = y.astype(o_ref.dtype)


@jax.jit
def causal_self_attention(x, w_qkv, b_qkv, w_proj, b_proj):
    Bx, Tx, Cx = x.shape
    NHx = NH
    HDx = Cx // NHx
    Gx = Bx * NHx

    # bf16 MXU operands (halves DMA bytes); accumulation stays f32 in-kernel.
    x2d = x.reshape(Bx * Tx, Cx).astype(jnp.bfloat16)                # fold batch into M
    wqkv_bf = w_qkv.astype(jnp.bfloat16)
    # (C, C) -> per-head (NH, HD, C), tiled over batch so g = b*NH + h maps to
    # the head-h slice of W_proj (tiny: G*HD*C bf16 = 4 KB).
    wprojg_bf = jnp.tile(w_proj.reshape(NHx, HDx, Cx), (Bx, 1, 1)).astype(jnp.bfloat16)
    bqkv2 = b_qkv.reshape(1, 3 * Cx).astype(jnp.float32)
    bproj2 = b_proj.reshape(1, Cx).astype(jnp.float32)

    kernel = functools.partial(_causal_attn_kernel, batch=Bx, n_head=NHx)

    return pl.pallas_call(
        kernel,
        out_shape=jax.ShapeDtypeStruct((Bx, Tx, Cx), x.dtype),
        grid=(1,),                                                   # single step
        in_specs=[
            pl.BlockSpec((Bx * Tx, Cx), lambda i: (0, 0)),           # x2d (B*T, C)
            pl.BlockSpec((Cx, 3 * Cx), lambda i: (0, 0)),            # W_qkv
            pl.BlockSpec((1, 3 * Cx), lambda i: (0, 0)),             # b_qkv
            pl.BlockSpec((Gx, HDx, Cx), lambda i: (0, 0, 0)),        # W_proj per-(b,h)
            pl.BlockSpec((1, Cx), lambda i: (0, 0)),                 # b_proj
        ],
        out_specs=pl.BlockSpec((Bx, Tx, Cx), lambda i: (0, 0, 0)),
    )(x2d, wqkv_bf, bqkv2, wprojg_bf, bproj2)


def reference(x, w_qkv, b_qkv, w_proj, b_proj):
    """Plain-JAX f32 reference mirroring F.scaled_dot_product_attention(is_causal=True)."""
    Bx, Tx, Cx = x.shape
    qkv = x @ w_qkv + b_qkv
    q, k, v = jnp.split(qkv, 3, axis=-1)

    def heads(tns):  # (B, T, C) -> (B, NH, T, HD)
        return tns.reshape(Bx, Tx, NH, HD).transpose(0, 2, 1, 3)

    q, k, v = heads(q), heads(k), heads(v)
    s = jnp.einsum("bhqd,bhkd->bhqk", q, k) / math.sqrt(HD)
    mask = jnp.tril(jnp.ones((Tx, Tx), dtype=bool))
    s = jnp.where(mask, s, -jnp.inf)
    p = jax.nn.softmax(s, axis=-1)
    y = jnp.einsum("bhqk,bhkd->bhqd", p, v)
    y = y.transpose(0, 2, 1, 3).reshape(Bx, Tx, Cx)
    return y @ w_proj + b_proj


if __name__ == "__main__":
    key = jax.random.PRNGKey(0)
    k_x, k_wq, k_bq, k_wp, k_bp = jax.random.split(key, 5)

    x = jax.random.normal(k_x, (B, T, C), dtype=jnp.float32)

    # Deterministic synthetic parameters (shapes per nn.Linear in __init__).
    w_qkv = jax.random.normal(k_wq, (C, 3 * C), dtype=jnp.float32) * 0.02
    b_qkv = jax.random.normal(k_bq, (3 * C,), dtype=jnp.float32) * 0.02
    w_proj = jax.random.normal(k_wp, (C, C), dtype=jnp.float32) * 0.02
    b_proj = jax.random.normal(k_bp, (C,), dtype=jnp.float32) * 0.02

    out = causal_self_attention(x, w_qkv, b_qkv, w_proj, b_proj)
    out = jax.block_until_ready(out)

    ref = reference(x, w_qkv, b_qkv, w_proj, b_proj)
    assert out.shape == (B, T, C)
    # bf16 MXU inputs (f32 accumulation / softmax, approx reciprocal) vs. an
    # all-f32 reference: tolerance set for bf16 operand rounding.
    assert jnp.allclose(out, ref, atol=2e-3, rtol=2e-2), "mismatch vs reference"

    print("KERNEL_OK")
</pallas_src>

<mosaic_0001>
module attributes {stable_mosaic.version = 11 : i64} {
  func.func @_causal_attn_kernel(%arg0: i32, %arg1: memref<128x32xbf16, #tpu.memory_space<vmem>>, %arg2: memref<32x96xbf16, #tpu.memory_space<vmem>>, %arg3: memref<1x96xf32, #tpu.memory_space<vmem>>, %arg4: memref<8x8x32xbf16, #tpu.memory_space<vmem>>, %arg5: memref<1x32xf32, #tpu.memory_space<vmem>>, %arg6: memref<2x64x32xf32, #tpu.memory_space<vmem>>) attributes {dimension_semantics = [#tpu.dimension_semantics<arbitrary>], iteration_bounds = array<i64: 1>, scalar_prefetch = 0 : i64, scratch_operands = 0 : i64, tpu.core_type = #tpu.core_type<tc>, window_params = [{pipeline_mode = #tpu.pipeline_mode<synchronous>, transform_indices = @transform_0, window_bounds = array<i64: 128, 32>}, {pipeline_mode = #tpu.pipeline_mode<synchronous>, transform_indices = @transform_1, window_bounds = array<i64: 32, 96>}, {pipeline_mode = #tpu.pipeline_mode<synchronous>, transform_indices = @transform_2, window_bounds = array<i64: 1, 96>}, {pipeline_mode = #tpu.pipeline_mode<synchronous>, transform_indices = @transform_3, window_bounds = array<i64: 8, 8, 32>}, {pipeline_mode = #tpu.pipeline_mode<synchronous>, transform_indices = @transform_4, window_bounds = array<i64: 1, 32>}, {pipeline_mode = #tpu.pipeline_mode<synchronous>, transform_indices = @transform_5, window_bounds = array<i64: 2, 64, 32>}]} {
    %c0 = arith.constant 0 : index
    %c0_0 = arith.constant 0 : index
    %0 = vector.load %arg1[%c0, %c0_0] : memref<128x32xbf16, #tpu.memory_space<vmem>>, vector<128x32xbf16>
    %c0_1 = arith.constant 0 : index
    %c0_2 = arith.constant 0 : index
    %1 = vector.load %arg2[%c0_1, %c0_2] : memref<32x96xbf16, #tpu.memory_space<vmem>>, vector<32x96xbf16>
    %cst = arith.constant dense<0.000000e+00> : vector<128x96xf32>
    %2 = tpu.matmul %0, %1, %cst {dimension_numbers = #tpu.dot_dimension_numbers<[1], [0], [0], [1], [0, 0, 1, 1], [], []>} : vector<128x32xbf16>, vector<32x96xbf16>, vector<128x96xf32> -> vector<128x96xf32>
    %c0_3 = arith.constant 0 : index
    %c0_4 = arith.constant 0 : index
    %3 = vector.load %arg3[%c0_3, %c0_4] : memref<1x96xf32, #tpu.memory_space<vmem>>, vector<1x96xf32>
    %4 = vector.broadcast %3 : vector<1x96xf32> to vector<128x96xf32>
    %5 = arith.addf %2, %4 : vector<128x96xf32>
    %6 = vector.shape_cast %5 : vector<128x96xf32> to vector<2x64x96xf32>
    %7 = vector.extract_strided_slice %6 {offsets = [0, 0, 0], sizes = [2, 64, 8], strides = [1, 1, 1]} : vector<2x64x96xf32> to vector<2x64x8xf32>
    %8 = vector.extract_strided_slice %6 {offsets = [0, 0, 8], sizes = [2, 64, 8], strides = [1, 1, 1]} : vector<2x64x96xf32> to vector<2x64x8xf32>
    %9 = vector.extract_strided_slice %6 {offsets = [0, 0, 16], sizes = [2, 64, 8], strides = [1, 1, 1]} : vector<2x64x96xf32> to vector<2x64x8xf32>
    %10 = vector.extract_strided_slice %6 {offsets = [0, 0, 24], sizes = [2, 64, 8], strides = [1, 1, 1]} : vector<2x64x96xf32> to vector<2x64x8xf32>
    %11 = vector.shape_cast %7 : vector<2x64x8xf32> to vector<2x1x64x8xf32>
    %12 = vector.shape_cast %8 : vector<2x64x8xf32> to vector<2x1x64x8xf32>
    %13 = vector.shape_cast %9 : vector<2x64x8xf32> to vector<2x1x64x8xf32>
    %14 = vector.shape_cast %10 : vector<2x64x8xf32> to vector<2x1x64x8xf32>
    %15 = tpu.concatenate %11, %12, %13, %14 in 1 : vector<2x1x64x8xf32>, vector<2x1x64x8xf32>, vector<2x1x64x8xf32>, vector<2x1x64x8xf32> -> vector<2x4x64x8xf32>
    %16 = vector.shape_cast %15 : vector<2x4x64x8xf32> to vector<8x64x8xf32>
    %cst_5 = arith.constant 0.353553385 : f32
    %17 = vector.broadcast %cst_5 : f32 to vector<8x64x8xf32>
    %18 = arith.mulf %16, %17 : vector<8x64x8xf32>
    %19 = arith.truncf %18 : vector<8x64x8xf32> to vector<8x64x8xbf16>
    %20 = vector.extract_strided_slice %6 {offsets = [0, 0, 32], sizes = [2, 64, 8], strides = [1, 1, 1]} : vector<2x64x96xf32> to vector<2x64x8xf32>
    %21 = vector.extract_strided_slice %6 {offsets = [0, 0, 40], sizes = [2, 64, 8], strides = [1, 1, 1]} : vector<2x64x96xf32> to vector<2x64x8xf32>
    %22 = vector.extract_strided_slice %6 {offsets = [0, 0, 48], sizes = [2, 64, 8], strides = [1, 1, 1]} : vector<2x64x96xf32> to vector<2x64x8xf32>
    %23 = vector.extract_strided_slice %6 {offsets = [0, 0, 56], sizes = [2, 64, 8], strides = [1, 1, 1]} : vector<2x64x96xf32> to vector<2x64x8xf32>
    %24 = vector.shape_cast %20 : vector<2x64x8xf32> to vector<2x1x64x8xf32>
    %25 = vector.shape_cast %21 : vector<2x64x8xf32> to vector<2x1x64x8xf32>
    %26 = vector.shape_cast %22 : vector<2x64x8xf32> to vector<2x1x64x8xf32>
    %27 = vector.shape_cast %23 : vector<2x64x8xf32> to vector<2x1x64x8xf32>
    %28 = tpu.concatenate %24, %25, %26, %27 in 1 : vector<2x1x64x8xf32>, vector<2x1x64x8xf32>, vector<2x1x64x8xf32>, vector<2x1x64x8xf32> -> vector<2x4x64x8xf32>
    %29 = vector.shape_cast %28 : vector<2x4x64x8xf32> to vector<8x64x8xf32>
    %30 = arith.truncf %29 : vector<8x64x8xf32> to vector<8x64x8xbf16>
    %31 = vector.extract_strided_slice %6 {offsets = [0, 0, 64], sizes = [2, 64, 8], strides = [1, 1, 1]} : vector<2x64x96xf32> to vector<2x64x8xf32>
    %32 = vector.extract_strided_slice %6 {offsets = [0, 0, 72], sizes = [2, 64, 8], strides = [1, 1, 1]} : vector<2x64x96xf32> to vector<2x64x8xf32>
    %33 = vector.extract_strided_slice %6 {offsets = [0, 0, 80], sizes = [2, 64, 8], strides = [1, 1, 1]} : vector<2x64x96xf32> to vector<2x64x8xf32>
    %34 = vector.extract_strided_slice %6 {offsets = [0, 0, 88], sizes = [2, 64, 8], strides = [1, 1, 1]} : vector<2x64x96xf32> to vector<2x64x8xf32>
    %35 = vector.shape_cast %31 : vector<2x64x8xf32> to vector<2x1x64x8xf32>
    %36 = vector.shape_cast %32 : vector<2x64x8xf32> to vector<2x1x64x8xf32>
    %37 = vector.shape_cast %33 : vector<2x64x8xf32> to vector<2x1x64x8xf32>
    %38 = vector.shape_cast %34 : vector<2x64x8xf32> to vector<2x1x64x8xf32>
    %39 = tpu.concatenate %35, %36, %37, %38 in 1 : vector<2x1x64x8xf32>, vector<2x1x64x8xf32>, vector<2x1x64x8xf32>, vector<2x1x64x8xf32> -> vector<2x4x64x8xf32>
    %40 = vector.shape_cast %39 : vector<2x4x64x8xf32> to vector<8x64x8xf32>
    %41 = arith.truncf %40 : vector<8x64x8xf32> to vector<8x64x8xbf16>
    "tpu.trace_start"() <{level = 10 : i32, message = "gqd,gkd->gqk"}> : () -> ()
    %cst_6 = arith.constant dense<0.000000e+00> : vector<8x64x64xf32>
    %42 = tpu.matmul %19, %30, %cst_6 {dimension_numbers = #tpu.dot_dimension_numbers<[2], [2], [1], [1], [0, 0, 0, 1, 1, 1], [0], [0]>} : vector<8x64x8xbf16>, vector<8x64x8xbf16>, vector<8x64x64xf32> -> vector<8x64x64xf32>
    "tpu.trace_stop"() : () -> ()
    %43 = tpu.iota {dimensions = array<i32: 0>} : vector<64x64xi32>
    %44 = tpu.iota {dimensions = array<i32: 1>} : vector<64x64xi32>
    %45 = arith.cmpi sle, %44, %43 : vector<64x64xi32>
    %cst_7 = arith.constant 0.000000e+00 : f32
    %cst_8 = arith.constant -1.000000e+30 : f32
    %46 = vector.broadcast %cst_7 : f32 to vector<64x64xf32>
    %47 = vector.broadcast %cst_8 : f32 to vector<64x64xf32>
    %48 = arith.select %45, %46, %47 : vector<64x64xi1>, vector<64x64xf32>
    %49 = vector.shape_cast %48 : vector<64x64xf32> to vector<1x64x64xf32>
    %50 = vector.broadcast %49 : vector<1x64x64xf32> to vector<8x64x64xf32>
    %51 = arith.addf %42, %50 : vector<8x64x64xf32>
    %cst_9 = arith.constant dense<0xFF800000> : vector<8x64xf32>
    %52 = vector.multi_reduction <maximumf>, %51, %cst_9 [2] : vector<8x64x64xf32> to vector<8x64xf32>
    %53 = vector.shape_cast %52 : vector<8x64xf32> to vector<8x64x1xf32>
    %54 = vector.broadcast %53 : vector<8x64x1xf32> to vector<8x64x64xf32>
    %55 = arith.subf %51, %54 : vector<8x64x64xf32>
    %56 = math.exp %55 : vector<8x64x64xf32>
    %cst_10 = arith.constant dense<0.000000e+00> : vector<8x64xf32>
    %57 = vector.multi_reduction <add>, %56, %cst_10 [2] : vector<8x64x64xf32> to vector<8x64xf32>
    %58 = vector.shape_cast %57 : vector<8x64xf32> to vector<8x64x1xf32>
    %59 = arith.truncf %56 : vector<8x64x64xf32> to vector<8x64x64xbf16>
    "tpu.trace_start"() <{level = 10 : i32, message = "gqk,gkd->gqd"}> : () -> ()
    %cst_11 = arith.constant dense<0.000000e+00> : vector<8x64x8xf32>
    %60 = tpu.matmul %59, %41, %cst_11 {dimension_numbers = #tpu.dot_dimension_numbers<[2], [1], [1], [2], [0, 0, 0, 1, 1, 2], [0], [0]>} : vector<8x64x64xbf16>, vector<8x64x8xbf16>, vector<8x64x8xf32> -> vector<8x64x8xf32>
    "tpu.trace_stop"() : () -> ()
    %61 = tpu.reciprocal %58 {approx = true} : vector<8x64x1xf32> -> vector<8x64x1xf32>
    %62 = vector.broadcast %61 : vector<8x64x1xf32> to vector<8x64x8xf32>
    %63 = arith.mulf %60, %62 : vector<8x64x8xf32>
    %64 = arith.truncf %63 : vector<8x64x8xf32> to vector<8x64x8xbf16>
    %c0_12 = arith.constant 0 : index
    %c0_13 = arith.constant 0 : index
    %c0_14 = arith.constant 0 : index
    %65 = vector.load %arg4[%c0_12, %c0_13, %c0_14] : memref<8x8x32xbf16, #tpu.memory_space<vmem>>, vector<8x8x32xbf16>
    "tpu.trace_start"() <{level = 10 : i32, message = "gqd,gdc->gqc"}> : () -> ()
    %cst_15 = arith.constant dense<0.000000e+00> : vector<8x64x32xf32>
    %66 = tpu.matmul %64, %65, %cst_15 {dimension_numbers = #tpu.dot_dimension_numbers<[2], [1], [1], [2], [0, 0, 0, 1, 1, 2], [0], [0]>} : vector<8x64x8xbf16>, vector<8x8x32xbf16>, vector<8x64x32xf32> -> vector<8x64x32xf32>
    "tpu.trace_stop"() : () -> ()
    %67 = vector.shape_cast %66 : vector<8x64x32xf32> to vector<2x4x64x32xf32>
    %cst_16 = arith.constant dense<0.000000e+00> : vector<2x64x32xf32>
    %68 = vector.multi_reduction <add>, %67, %cst_16 [1] : vector<2x4x64x32xf32> to vector<2x64x32xf32>
    %c0_17 = arith.constant 0 : index
    %c0_18 = arith.constant 0 : index
    %69 = vector.load %arg5[%c0_17, %c0_18] : memref<1x32xf32, #tpu.memory_space<vmem>>, vector<1x32xf32>
    %70 = vector.shape_cast %69 : vector<1x32xf32> to vector<1x1x32xf32>
    %71 = vector.broadcast %70 : vector<1x1x32xf32> to vector<2x64x32xf32>
    %72 = arith.addf %68, %71 : vector<2x64x32xf32>
    %c0_19 = arith.constant 0 : index
    %c0_20 = arith.constant 0 : index
    %c0_21 = arith.constant 0 : index
    %73 = vector.load %arg6[%c0_19, %c0_20, %c0_21] : memref<2x64x32xf32, #tpu.memory_space<vmem>>, vector<2x64x32xf32>
    tpu.vector_store %arg6[%c0_19, %c0_20, %c0_21], %72 {strides = array<i32>} : memref<2x64x32xf32, #tpu.memory_space<vmem>>, vector<2x64x32xf32>,
    return
  }
  func.func @transform_0(%arg0: i32) -> (i32, i32) {
    %c0_i32 = arith.constant 0 : i32
    %c0_i32_0 = arith.constant 0 : i32
    %c0_i32_1 = arith.constant 0 : i32
    return %c0_i32, %c0_i32_0 : i32, i32
  }
  func.func @transform_1(%arg0: i32) -> (i32, i32) {
    %c0_i32 = arith.constant 0 : i32
    %c0_i32_0 = arith.constant 0 : i32
    %c0_i32_1 = arith.constant 0 : i32
    return %c0_i32, %c0_i32_0 : i32, i32
  }
  func.func @transform_2(%arg0: i32) -> (i32, i32) {
    %c0_i32 = arith.constant 0 : i32
    %c0_i32_0 = arith.constant 0 : i32
    %c0_i32_1 = arith.constant 0 : i32
    return %c0_i32, %c0_i32_0 : i32, i32
  }
  func.func @transform_3(%arg0: i32) -> (i32, i32, i32) {
    %c0_i32 = arith.constant 0 : i32
    %c0_i32_0 = arith.constant 0 : i32
    %c0_i32_1 = arith.constant 0 : i32
    %c0_i32_2 = arith.constant 0 : i32
    return %c0_i32, %c0_i32_0, %c0_i32_1 : i32, i32, i32
  }
  func.func @transform_4(%arg0: i32) -> (i32, i32) {
    %c0_i32 = arith.constant 0 : i32
    %c0_i32_0 = arith.constant 0 : i32
    %c0_i32_1 = arith.constant 0 : i32
    return %c0_i32, %c0_i32_0 : i32, i32
  }
  func.func @transform_5(%arg0: i32) -> (i32, i32, i32) {
    %c0_i32 = arith.constant 0 : i32
    %c0_i32_0 = arith.constant 0 : i32
    %c0_i32_1 = arith.constant 0 : i32
    %c0_i32_2 = arith.constant 0 : i32
    return %c0_i32, %c0_i32_0, %c0_i32_1 : i32, i32, i32
  }
}

</mosaic_0001>

<bundles_post_ra>
// kernel: causal_self_attention.1
= control target key start
LH: loop header
LB: loop body
LE: loop exit
PB: predicated region body
PF: predicated region fallthrough
CT: control target
= control target key end

     0   :  { %vm100_vm0 = vcmask 261120   ;;  %vm549_vm1 = vcmask 64512   ;;  %s4595_s14 = smov 104   ;;  %s4596_s15 = smov 96   ;;  %vm1346_vm4 = vcmask 523264   ;;  %vm2847_vm11 = vcmask 1043456   ;;  %s6422_s1 = inlined_call_operand.vmem [shape: bf16[32,96], index: 1, kind: input, shape index: {}]   ;;  %s6423_s0 = inlined_call_operand.vmem [shape: bf16[128,32], index: 0, kind: input, shape index: {}]   ;;  %s6424_s2 = inlined_call_operand.vmem [shape: f32[1,96], index: 2, kind: input, shape index: {}]   ;;  %s6425_s3 = inlined_call_operand.vmem [shape: bf16[8,8,32], index: 3, kind: input, shape index: {}]   ;;  %s6426_s4 = inlined_call_operand.vmem [shape: f32[1,32], index: 4, kind: input, shape index: {}]   ;;  %s6427_s5 = inlined_call_operand.vmem [shape: f32[2,64,32], index: 5, kind: output, shape index: {}]  }
   0x1   :  { %v4327_v0 = vld [vmem:[%s6422_s1 + $0x8] sm:$0xff]   ;;  %v4328_v1 = vld [vmem:[%s6422_s1] sm:$0xff]   ;;  %v4331_v4 = vld [vmem:[%s6423_s0 + $0x10] sm:$0xff]   ;;  %s4597_s16 = smov 64  }
   0x2   :  { %3925 = vmatprep.subr.bf16.mxu0 %v4327_v0  ;;  %v4329_v2 = vld [vmem:[%s6423_s0] sm:$0xff]   ;;  %v4330_v3 = vld [vmem:[%s6423_s0 + $0x8] sm:$0xff]   ;;  %v4332_v5 = vld [vmem:[%s6423_s0 + $0x18] sm:$0xff]  }
   0x3   :  { %3926 = vmatpush3.bf16.msra.mxu0 %v4327_v0  ;;  %3929 = vmatprep.mubr.msk.bf16.mxu0 %vm100_vm0, %v4329_v2  ;;  %v4333_v6 = vld [vmem:[%s6423_s0 + $0x20] sm:$0xff]   ;;  %v4334_v7 = vld [vmem:[%s6423_s0 + $0x28] sm:$0xff]   ;;  %v4335_v8 = vld [vmem:[%s6423_s0 + $0x30] sm:$0xff]  }
   0x4   :  { %3927 = vmatprep.subr.bf16.mxu0 %v4328_v1  ;;  %v4336_v9 = vld [vmem:[%s6423_s0 + $0x38] sm:$0xff]   ;;  %v4670_v11 = vld [vmem:[%s6424_s2] ss:$0 sm:$0xff]  ;;  %s4593_s0 = smov 120   ;;  %s4594_s2 = smov 112  }
   0x7   :  { %3928 = vmatpush3.bf16.msra.mxu0 %v4328_v1 }
   0xa   :  { %3930 = vmatmul.mubr.msk.bf16.vlgmr.msra.gmra.mxu0 %vm100_vm0, %v4330_v3 }
   0xb   :  { %3933 = vmatprep.mubr.msk.bf16.mxu0 %vm100_vm0, %v4331_v4 }
  0x12   :  { %3934 = vmatmul.mubr.msk.bf16.gmra.mxu0 %vm100_vm0, %v4332_v5 }
  0x13   :  { %3937 = vmatprep.mubr.msk.bf16.mxu0 %vm100_vm0, %v4333_v6 }
  0x1a   :  { %3938 = vmatmul.mubr.msk.bf16.gmra.mxu0 %vm100_vm0, %v4334_v7 }
  0x1b   :  { %3941 = vmatprep.mubr.msk.bf16.mxu0 %vm100_vm0, %v4335_v8 }
  0x22   :  { %3942 = vmatmul.mubr.msk.bf16.gmra.mxu0 %vm100_vm0, %v4336_v9 }
  0xca   :  { %v3931_v10 = vpop.f32.mrf.mxu0 }
  0xcb   :  { %v168_v13 = vadd.f32 %v3931_v10, %v4670_v11 }
  0xcc   :  { %v159_v12 = vpop.f32.mrf.mxu0 }
  0xcd   :  { %v4674_v15 = vadd.f32 %v4670_v11, %v159_v12  ;;  %v4678_v19 = vmul.f32 0.35355338, %v168_v13 }
  0xce   :  { %v3932_v14 = vpop.f32.mrf.mxu0 }
  0xcf   :  { %v171_v16 = vadd.f32 %v3932_v14, %v4670_v11  ;;  %v382_v23 = vmul.f32 0.35355338, %v4674_v15 }
  0xd0   :  { %v162_v17 = vpop.f32.mrf.mxu0 }
  0xd1   :  { %v163_v18 = vadd.f32 %v4670_v11, %v162_v17  ;;  %v4680_v20 = vmul.f32 0.35355338, %v171_v16  ;;  %v4738_v46 = vpack.c.bf16 %v171_v16, %v168_v13 }
  0xd2   :  { %v3935_v21 = vpop.f32.mrf.mxu0 }
  0xd3   :  { %v4683_v22 = vadd.f32 %v3935_v21, %v4670_v11  ;;  %v383_v24 = vmul.f32 0.35355338, %v163_v18  ;;  %v4746_v49 = vpack.c.bf16 %v163_v18, %v4674_v15 }
  0xd4   :  { %v175_v26 = vpop.f32.mrf.mxu0 }
  0xd5   :  { %v176_v27 = vadd.f32 %v4670_v11, %v175_v26  ;;  %250 = vrot.lane.b32.xlu0 %v4683_v22, %s4593_s0  ;;  %v446_v28 = vpack.c.bf16 %v383_v24, %v382_v23  ;;  %v4697_v33 = vmul.f32 0.35355338, %v4683_v22 }
  0xd6   :  { %v3936_v29 = vpop.f32.mrf.mxu0 }
  0xd7   :  { %v187_v30 = vadd.f32 %v3936_v29, %v4670_v11  ;;  %246 = vrot.lane.b32.xlu1 %v176_v27, %s4593_s0  ;;  %3953 = vmatprep.mubr.msk.bf16.mxu1 %vm549_vm1, %v446_v28  ;;  %v4702_v36 = vmul.f32 0.35355338, %v176_v27 }
  0xd8   :  { %v178_v31 = vpop.f32.mrf.mxu0 }
  0xd9   :  { %v179_v32 = vadd.f32 %v4670_v11, %v178_v31  ;;  %252 = vrot.lane.b32.xlu0 %v187_v30, %s4593_s0  ;;  %v4699_v34 = vmul.f32 0.35355338, %v187_v30  ;;  %v4756_v52 = vpack.c.bf16 %v187_v30, %v4683_v22 }
  0xda   :  { %v3939_v35 = vpop.f32.mrf.mxu0 }
  0xdb   :  { %244 = vrot.lane.b32.xlu1 %v171_v16, %s4593_s0  ;;  %v4704_v37 = vmul.f32 0.35355338, %v179_v32  ;;  %v4765_v54 = vpack.c.bf16 %v179_v32, %v176_v27  ;;  %v4772_v55 = vadd.f32 %v3939_v35, %v4670_v11 }
  0xdc   :  { %v191_v39 = vpop.f32.mrf.mxu0 }
  0xdd   :  { %242 = vrot.lane.b32.xlu0 %v168_v13, %s4593_s0  ;;  %v4785_v58 = vadd.f32 %v4670_v11, %v191_v39 }
  0xde   :  { %v3940_v41 = vpop.f32.mrf.mxu0 }
  0xdf   :  { %240 = vrot.lane.b32.xlu1 %v163_v18, %s4593_s0  ;;  %v4741_v47 = vadd.f32 %v3940_v41, %v4670_v11 }
  0xe0   :  { %v194_v42 = vpop.f32.mrf.mxu0 }
  0xe1   :  { %238 = vrot.lane.b32.xlu0 %v4674_v15, %s4593_s0  ;;  %v4715_v43 = vadd.f32 %v4670_v11, %v194_v42  ;;  %v4969_v38 = vpack.c.bf16 %v4741_v47, %v4772_v55 }
  0xe2   :  { %v3943_v44 = vpop.f32.mrf.mxu0 }
  0xe3   :  { %248 = vrot.lane.b32.xlu1 %v179_v32, %s4593_s0  ;;  %v4775_v56 = vadd.f32 %v3943_v44, %v4670_v11 }
  0xe4   :  { %v207_v45 = vpop.f32.mrf.mxu0 }
  0xe5   :  { %298 = vrot.lane.b32.xlu0 %v4683_v22, %s4594_s2  ;;  %v4780_v57 = vadd.f32 %v4670_v11, %v207_v45 }
  0xe6   :  { %v3944_v48 = vpop.f32.mrf.mxu0 }
  0xe7   :  { %300 = vrot.lane.b32.xlu1 %v187_v30, %s4594_s2  ;;  %v4751_v50 = vadd.f32 %v3944_v48, %v4670_v11 }
  0xe8   :  { %v210_v51 = vpop.f32.mrf.mxu0 }
  0xe9   :  { %346 = vrot.lane.b32.xlu0 %v4683_v22, %s4595_s14  ;;  %v4761_v53 = vadd.f32 %v4670_v11, %v210_v51 }
  0xeb   :  { %348 = vrot.lane.b32.xlu1 %v187_v30, %s4595_s14 }
  0xed   :  { %294 = vrot.lane.b32.xlu0 %v176_v27, %s4594_s2 }
  0xef   :  { %292 = vrot.lane.b32.xlu1 %v171_v16, %s4594_s2 }
  0xf1   :  { %342 = vrot.lane.b32.xlu0 %v176_v27, %s4595_s14 }
  0xf3   :  { %340 = vrot.lane.b32.xlu1 %v171_v16, %s4595_s14 }
  0xf5   :  { %290 = vrot.lane.b32.xlu0 %v168_v13, %s4594_s2 }
  0xf7   :  { %288 = vrot.lane.b32.xlu1 %v163_v18, %s4594_s2 }
  0xf9   :  { %338 = vrot.lane.b32.xlu0 %v168_v13, %s4595_s14 }
  0xfb   :  { %336 = vrot.lane.b32.xlu1 %v163_v18, %s4595_s14 }
  0xfd   :  { %286 = vrot.lane.b32.xlu0 %v4674_v15, %s4594_s2 }
  0xff   :  { %296 = vrot.lane.b32.xlu1 %v179_v32, %s4594_s2 }
 0x101   :  { %334 = vrot.lane.b32.xlu0 %v4674_v15, %s4595_s14 }
 0x103   :  { %344 = vrot.lane.b32.xlu1 %v179_v32, %s4595_s14 }
 0x105   :  { %543 = vrot.lane.b32.xlu0 %v4738_v46, %s4596_s15 }
 0x107   :  { %260 = vrot.lane.b32.xlu1 %v4741_v47, %s4593_s0 }
 0x109   :  { %541 = vrot.lane.b32.xlu0 %v4746_v49, %s4596_s15 }
 0x10b   :  { %268 = vrot.lane.b32.xlu1 %v4751_v50, %s4593_s0 }
 0x10d   :  { %547 = vrot.lane.b32.xlu0 %v4756_v52, %s4596_s15 }
 0x10f   :  { %264 = vrot.lane.b32.xlu1 %v4761_v53, %s4593_s0 }
 0x111   :  { %545 = vrot.lane.b32.xlu0 %v4765_v54, %s4596_s15 }
 0x115   :  { %258 = vrot.lane.b32.xlu0 %v4772_v55, %s4593_s0 }
 0x119   :  { %266 = vrot.lane.b32.xlu0 %v4775_v56, %s4593_s0 }
 0x11d   :  { %262 = vrot.lane.b32.xlu0 %v4780_v57, %s4593_s0 }
 0x121   :  { %254 = vrot.lane.b32.xlu0 %v4785_v58, %s4593_s0 }
 0x147   :  { %v4791_v59 = vpop.permute.xlu0 %250 }
 0x149   :  { %v4793_v60 = vpop.permute.xlu1 %246 }
 0x14b   :  { %v4795_v61 = vpop.permute.xlu0 %252 }
 0x14c   :  { %v4809_v3 = vpack.c.bf16 %v4795_v61, %v4791_v59 }
 0x14d   :  { %v4797_v62 = vpop.permute.xlu1 %244 }
 0x14f   :  { %v4799_v63 = vpop.permute.xlu0 %242 }
 0x150   :  { %v4803_v0 = vpack.c.bf16 %v4797_v62, %v4799_v63 }
 0x151   :  { %v241_v1 = vpop.permute.xlu1 %240 }
 0x152   :  { %645 = vrot.lane.b32.xlu1 %v4803_v0, %s4596_s15  ;;  %v391_v4 = vmul.f32 0.35355338, %v241_v1 }
 0x153   :  { %v239_v2 = vpop.permute.xlu0 %238 }
 0x154   :  { %v390_v5 = vmul.f32 0.35355338, %v239_v2  ;;  %v4817_v9 = vpack.c.bf16 %v241_v1, %v239_v2 }
 0x155   :  { %v4811_v6 = vpop.permute.xlu1 %248 }
 0x156   :  { %v450_v7 = vpack.c.bf16 %v391_v4, %v390_v5  ;;  %649 = vrot.lane.b32.xlu1 %v4809_v3, %s4596_s15  ;;  %v4832_v13 = vpack.c.bf16 %v4811_v6, %v4793_v60 }
 0x157   :  { %v4815_v8 = vpop.permute.xlu0 %298 }
 0x158   :  { %3969 = vmatprep.mubr.msk.bf16.mxu0 %vm549_vm1, %v450_v7  ;;  %v4947_v7 = vpack.c.bf16 %v4751_v50, %v4775_v56 }
 0x159   :  { %v4820_v10 = vpop.permute.xlu1 %300 }
 0x15a   :  { %v4824_v11 = vpack.c.bf16 %v4820_v10, %v4815_v8  ;;  %643 = vrot.lane.b32.xlu1 %v4817_v9, %s4596_s15  ;;  %6484 = vst [vmem:[#allocation4_spill] sm:$0xff] %v4947_v7 }
 0x15b   :  { %v4828_v12 = vpop.permute.xlu0 %346 }
 0x15c   :  { %750 = vrot.lane.b32.xlu0 %v4824_v11, %s4596_s15 }
 0x15d   :  { %v4836_v14 = vpop.permute.xlu1 %348 }
 0x15e   :  { %647 = vrot.lane.b32.xlu1 %v4832_v13, %s4596_s15  ;;  %v4852_v18 = vpack.c.bf16 %v4836_v14, %v4828_v12 }
 0x15f   :  { %v4840_v15 = vpop.permute.xlu0 %294 }
 0x160   :  { %314 = vrot.lane.b32.xlu0 %v4775_v56, %s4594_s2 }
 0x161   :  { %v4844_v16 = vpop.permute.xlu1 %292 }
 0x162   :  { %256 = vrot.lane.b32.xlu1 %v4715_v43, %s4593_s0 }
 0x163   :  { %v4848_v17 = vpop.permute.xlu0 %342 }
 0x164   :  { %362 = vrot.lane.b32.xlu0 %v4775_v56, %s4595_s14 }
 0x165   :  { %v4856_v21 = vpop.permute.xlu1 %340 }
 0x166   :  { %851 = vrot.lane.b32.xlu1 %v4852_v18, %s4596_s15 }
 0x167   :  { %v4860_v22 = vpop.permute.xlu0 %290 }
 0x168   :  { %310 = vrot.lane.b32.xlu0 %v4780_v57, %s4594_s2  ;;  %v4876_v27 = vpack.c.bf16 %v4844_v16, %v4860_v22 }
 0x169   :  { %v4864_v23 = vpop.permute.xlu1 %288 }
 0x16a   :  { %316 = vrot.lane.b32.xlu1 %v4751_v50, %s4594_s2 }
 0x16b   :  { %v4868_v24 = vpop.permute.xlu0 %338 }
 0x16c   :  { %358 = vrot.lane.b32.xlu0 %v4780_v57, %s4595_s14  ;;  %v4900_v35 = vpack.c.bf16 %v4856_v21, %v4868_v24 }
 0x16d   :  { %v4872_v26 = vpop.permute.xlu1 %336 }
 0x16e   :  { %364 = vrot.lane.b32.xlu1 %v4751_v50, %s4595_s14 }
 0x16f   :  { %v4880_v28 = vpop.permute.xlu0 %286 }
 0x170   :  { %746 = vrot.lane.b32.xlu0 %v4876_v27, %s4596_s15  ;;  %v4916_v44 = vpack.c.bf16 %v4864_v23, %v4880_v28 }
 0x171   :  { %v4884_v29 = vpop.permute.xlu1 %296 }
 0x172   :  { %v4888_v30 = vpack.c.bf16 %v4884_v29, %v4840_v15  ;;  %312 = vrot.lane.b32.xlu1 %v4761_v53, %s4594_s2 }
 0x173   :  { %v4892_v31 = vpop.permute.xlu0 %334 }
 0x174   :  { %748 = vrot.lane.b32.xlu0 %v4888_v30, %s4596_s15  ;;  %v4933_v1 = vpack.c.bf16 %v4872_v26, %v4892_v31 }
 0x175   :  { %v4904_v39 = vpop.permute.xlu1 %344 }
 0x176   :  { %360 = vrot.lane.b32.xlu1 %v4761_v53, %s4595_s14  ;;  %v4910_v42 = vpack.c.bf16 %v4904_v39, %v4848_v17 }
 0x177   :  { %v544_v32 = vpop.permute.xlu0 %543 }
 0x178   :  { %306 = vrot.lane.b32.xlu0 %v4772_v55, %s4594_s2 }
 0x179   :  { %v4938_v4 = vpop.permute.xlu1 %260 }
 0x17a   :  { %847 = vrot.lane.b32.xlu1 %v4900_v35, %s4596_s15  ;;  %6482 = vst [vmem:[#allocation2_spill] sm:$0xff] %v4938_v4 }
 0x17b   :  { %v542_v41 = vpop.permute.xlu0 %541 }
 0x17c   :  { %354 = vrot.lane.b32.xlu0 %v4772_v55, %s4595_s14 }
 0x17e   :  { %849 = vrot.lane.b32.xlu1 %v4910_v42, %s4596_s15 }
 0x17f   :  { %v548_v45 = vpop.permute.xlu0 %547 }
 0x180   :  { %744 = vrot.lane.b32.xlu0 %v4916_v44, %s4596_s15  ;;  %4281 = vmatprep.subr.msk.bf16.mxu1 %vm549_vm1, %v548_v45  ;;  %v572_v48 = vsel %vm549_vm1, %v548_v45, 0  ;;  %v4955_v45 = vpack.c.bf16 %v4761_v53, %v4780_v57 }
 0x181   :  { %3946 = vmatpush3.bf16.xpose.msra.mxu1 %v572_v48  ;;  %v4957_v48 = vpop.permute.xlu1 %268 }
 0x182   :  { %308 = vrot.lane.b32.xlu1 %v4741_v47, %s4594_s2  ;;  %6485 = vst [vmem:[#allocation5_spill] sm:$0xff] %v4957_v48 }
 0x183   :  { %v546_v51 = vpop.permute.xlu0 %545 }
 0x184   :  { %302 = vrot.lane.b32.xlu0 %v4785_v58, %s4594_s2  ;;  %4282 = vmatprep.subr.msk.bf16.mxu1 %vm549_vm1, %v546_v51  ;;  %v569_v2 = vsel %vm549_vm1, %v546_v51, 0 }
 0x185   :  { %v4975_v25 = vpop.permute.xlu1 %264 }
 0x186   :  { %356 = vrot.lane.b32.xlu1 %v4741_v47, %s4595_s14  ;;  %6487 = vst [vmem:[#allocation7_spill] sm:$0xff] %v4975_v25 }
 0x187   :  { %v4940_v5 = vpop.permute.xlu0 %258 }
 0x188   :  { %350 = vrot.lane.b32.xlu0 %v4785_v58, %s4595_s14  ;;  %6483 = vst [vmem:[#allocation3_spill] sm:$0xff] %v4940_v5 }
 0x189   :  { %3948 = vmatpush3.bf16.xpose.msra.mxu1 %v569_v2  ;;  %v566_v2 = vsel %vm549_vm1, %v544_v32, 0 }
 0x18a   :  { %845 = vrot.lane.b32.xlu1 %v4933_v1, %s4596_s15  ;;  %4283 = vmatprep.subr.msk.bf16.mxu1 %vm549_vm1, %v544_v32  ;;  %v4983_v32 = vpack.c.bf16 %v4715_v43, %v4785_v58 }
 0x18b   :  { %v4959_v51 = vpop.permute.xlu0 %266 }
 0x18c   :  { %952 = vrot.lane.b32.xlu0 %v4947_v7, %s4596_s15  ;;  %6486 = vst [vmem:[#allocation6_spill] sm:$0xff] %v4959_v51  ;;  %v4973_v40 = vpack.c.bf16 %v4957_v48, %v4959_v51  ;;  %v563_v51 = vsel %vm549_vm1, %v542_v41, 0  ;;  %v4996_v48 = vpack.c.bf16 %v4938_v4, %v4940_v5  ;;  %v392_v4 = vmul.f32 0.35355338, %v4799_v63 }
 0x18e   :  { %304 = vrot.lane.b32.xlu1 %v4715_v43, %s4594_s2 }
 0x18f   :  { %v4977_v7 = vpop.permute.xlu0 %262 }
 0x190   :  { %950 = vrot.lane.b32.xlu0 %v4955_v45, %s4596_s15  ;;  %6488 = vst [vmem:[#allocation8_spill] sm:$0xff] %v4977_v7 }
 0x191   :  { %3950 = vmatpush3.bf16.xpose.msra.mxu1 %v566_v2  ;;  %v4989_v2 = vpack.c.bf16 %v4975_v25, %v4977_v7  ;;  %v6490_v7 = vpack.c.bf16 %v4680_v20, %v4678_v19  ;;  %v6491_v25 = vpack.c.bf16 %v4704_v37, %v4702_v36 }
 0x192   :  { %352 = vrot.lane.b32.xlu1 %v4715_v43, %s4595_s14  ;;  %4284 = vmatprep.subr.msk.bf16.mxu1 %vm549_vm1, %v542_v41  ;;  %v398_v41 = vmul.f32 0.35355338, %v4880_v28 }
 0x193   :  { %6489 = vst [vmem:[#allocation9_spill] sm:$0xff] %v4989_v2  ;;  %v5019_v37 = vpop.permute.xlu0 %254 }
 0x194   :  { %948 = vrot.lane.b32.xlu0 %v4969_v38, %s4596_s15 }
 0x196   :  { %1053 = vrot.lane.b32.xlu1 %v4973_v40, %s4596_s15 }
 0x198   :  { %946 = vrot.lane.b32.xlu0 %v4983_v32, %s4596_s15 }
 0x199   :  { %3952 = vmatpush3.bf16.xpose.msra.mxu1 %v563_v51  ;;  %v399_v51 = vmul.f32 0.35355338, %v4864_v23 }
 0x19a   :  { %1051 = vrot.lane.b32.xlu1 %v4989_v2, %s4596_s15  ;;  %v6492_v2 = vpack.c.bf16 %v4699_v34, %v4697_v33 }
 0x19b   :  { %v454_v5 = vpack.c.bf16 %v399_v51, %v398_v41 }
 0x19e   :  { %1049 = vrot.lane.b32.xlu1 %v4996_v48, %s4596_s15 }
 0x1a0   :  { %3954 = vmatmul.mubr.msk.bf16.vlgmr.msra.gmra.mxu1 %vm549_vm1, %v6490_v7 }
 0x1a1   :  { %3957 = vmatprep.mubr.msk.bf16.mxu1 %vm549_vm1, %v6491_v25 }
 0x1a8   :  { %3958 = vmatmul.mubr.msk.bf16.gmra.mxu1 %vm549_vm1, %v6492_v2 }
 0x1a9   :  { %3985 = vmatprep.mubr.msk.bf16.mxu1 %vm549_vm1, %v454_v5 }
 0x1c4   :  { %v646_v19 = vpop.permute.xlu1 %645 }
 0x1c8   :  { %v650_v20 = vpop.permute.xlu1 %649 }
 0x1c9   :  { %4285 = vmatprep.subr.msk.bf16.mxu0 %vm549_vm1, %v650_v20  ;;  %v673_v36 = vsel %vm549_vm1, %v650_v20, 0  ;;  %v667_v20 = vsel %vm549_vm1, %v646_v19, 0 }
 0x1ca   :  { %3962 = vmatpush3.bf16.xpose.msra.mxu0 %v673_v36 }
 0x1cc   :  { %v644_v25 = vpop.permute.xlu1 %643 }
 0x1ce   :  { %v751_v28 = vpop.permute.xlu0 %750 }
 0x1cf   :  { %4289 = vmatprep.subr.msk.bf16.mxu1 %vm549_vm1, %v751_v28  ;;  %v774_v23 = vsel %vm549_vm1, %v751_v28, 0 }
 0x1d0   :  { %v648_v33 = vpop.permute.xlu1 %647  ;;  %3978 = vmatpush3.bf16.xpose.msra.mxu1 %v774_v23 }
 0x1d1   :  { %4286 = vmatprep.subr.msk.bf16.mxu0 %vm549_vm1, %v648_v33  ;;  %v670_v34 = vsel %vm549_vm1, %v648_v33, 0 }
 0x1d2   :  { %3964 = vmatpush3.bf16.xpose.msra.mxu0 %v670_v34  ;;  %v5025_v5 = vpop.permute.xlu0 %314 }
 0x1d3   :  { %6493 = vst [vmem:[#allocation10_spill] sm:$0xff] %v5025_v5  ;;  %4287 = vmatprep.subr.msk.bf16.mxu0 %vm549_vm1, %v646_v19 }
 0x1d4   :  { %v5028_v7 = vpop.permute.xlu1 %256 }
 0x1d5   :  { %v5032_v2 = vpack.c.bf16 %v5028_v7, %v5019_v37 }
 0x1d6   :  { %v5034_v41 = vpop.permute.xlu0 %362 }
 0x1d7   :  { %6494 = vst [vmem:[#allocation11_spill] sm:$0xff] %v5032_v2  ;;  %6495 = vst [vmem:[#allocation12_spill] sm:$0xff] %v5034_v41  ;;  %1047 = vrot.lane.b32.xlu1 %v5032_v2, %s4596_s15 }
 0x1d8   :  { %v852_v51 = vpop.permute.xlu1 %851 }
 0x1da   :  { %3966 = vmatpush3.bf16.xpose.msra.mxu0 %v667_v20  ;;  %v5039_v36 = vpop.permute.xlu0 %310  ;;  %v664_v20 = vsel %vm549_vm1, %v644_v25, 0 }
 0x1db   :  { %4288 = vmatprep.subr.msk.bf16.mxu0 %vm549_vm1, %v644_v25  ;;  %v394_v25 = vmul.f32 0.35355338, %v4793_v60  ;;  %v875_v60 = vsel %vm549_vm1, %v852_v51, 0 }
 0x1dc   :  { %v5042_v28 = vpop.permute.xlu1 %316 }
 0x1dd   :  { %6496 = vst [vmem:[#allocation13_spill] sm:$0xff] %v5042_v28  ;;  %v5046_v23 = vpack.c.bf16 %v5042_v28, %v5025_v5  ;;  %v395_v5 = vmul.f32 0.35355338, %v4811_v6 }
 0x1de   :  { %v5048_v33 = vpop.permute.xlu0 %358 }
 0x1df   :  { %6497 = vst [vmem:[#allocation14_spill] sm:$0xff] %v5046_v23  ;;  %6498 = vst [vmem:[#allocation15_spill] sm:$0xff] %v5048_v33  ;;  %1154 = vrot.lane.b32.xlu0 %v5046_v23, %s4596_s15  ;;  %v393_v23 = vmul.f32 0.35355338, %v4797_v62  ;;  %v452_v6 = vpack.c.bf16 %v395_v5, %v394_v25  ;;  %v397_v5 = vmul.f32 0.35355338, %v4795_v61 }
 0x1e0   :  { %v5052_v34 = vpop.permute.xlu1 %364 }
 0x1e1   :  { %6499 = vst [vmem:[#allocation16_spill] sm:$0xff] %v5052_v34  ;;  %v5056_v19 = vpack.c.bf16 %v5052_v34, %v5034_v41  ;;  %v451_v34 = vpack.c.bf16 %v393_v23, %v392_v4  ;;  %v406_v23 = vmul.f32 0.35355338, %v4892_v31 }
 0x1e2   :  { %3968 = vmatpush3.bf16.xpose.msra.mxu0 %v664_v20  ;;  %v747_v2 = vpop.permute.xlu0 %746 }
 0x1e3   :  { %6500 = vst [vmem:[#allocation17_spill] sm:$0xff] %v5056_v19  ;;  %4293 = vmatprep.subr.msk.bf16.mxu0 %vm549_vm1, %v852_v51  ;;  %1255 = vrot.lane.b32.xlu1 %v5056_v19, %s4596_s15 }
 0x1e4   :  { %v5064_v28 = vpop.permute.xlu1 %312 }
 0x1e5   :  { %v5069_v41 = vpack.c.bf16 %v5064_v28, %v5039_v36 }
 0x1e6   :  { %v749_v20 = vpop.permute.xlu0 %748 }
 0x1e7   :  { %1152 = vrot.lane.b32.xlu0 %v5069_v41, %s4596_s15  ;;  %4290 = vmatprep.subr.msk.bf16.mxu1 %vm549_vm1, %v749_v20  ;;  %v771_v63 = vsel %vm549_vm1, %v749_v20, 0  ;;  %v396_v20 = vmul.f32 0.35355338, %v4791_v59 }
 0x1e8   :  { %v5076_v19 = vpop.permute.xlu1 %360  ;;  %3980 = vmatpush3.bf16.xpose.msra.mxu1 %v771_v63 }
 0x1e9   :  { %v5080_v62 = vpack.c.bf16 %v5076_v19, %v5048_v33  ;;  %3970 = vmatmul.mubr.msk.bf16.vlgmr.msra.gmra.mxu0 %vm549_vm1, %v451_v34  ;;  %4291 = vmatprep.subr.msk.bf16.mxu1 %vm549_vm1, %v747_v2  ;;  %v407_v34 = vmul.f32 0.35355338, %v4872_v26  ;;  %v453_v51 = vpack.c.bf16 %v397_v5, %v396_v20 }
 0x1ea   :  { %3973 = vmatprep.mubr.msk.bf16.mxu0 %vm549_vm1, %v452_v6  ;;  %3994 = vmatpush3.bf16.xpose.msra.mxu0 %v875_v60  ;;  %v5086_v4 = vpop.permute.xlu0 %306  ;;  %v768_v6 = vsel %vm549_vm1, %v747_v2, 0 }
 0x1eb   :  { %1253 = vrot.lane.b32.xlu1 %v5080_v62, %s4596_s15  ;;  %v458_v60 = vpack.c.bf16 %v407_v34, %v406_v23  ;;  %v400_v23 = vmul.f32 0.35355338, %v4860_v22 }
 0x1ec   :  { %v848_v25 = vpop.permute.xlu1 %847 }
 0x1ed   :  { %v869_v34 = vsel %vm549_vm1, %v848_v25, 0 }
 0x1ee   :  { %v5094_v63 = vpop.permute.xlu0 %354 }
 0x1ef   :  { %6501 = vst [vmem:[#allocation18_spill] sm:$0xff] %v5094_v63 }
 0x1f0   :  { %v850_v33 = vpop.permute.xlu1 %849  ;;  %3982 = vmatpush3.bf16.xpose.msra.mxu1 %v768_v6 }
 0x1f1   :  { %3974 = vmatmul.mubr.msk.bf16.gmra.mxu0 %vm549_vm1, %v453_v51  ;;  %4294 = vmatprep.subr.msk.bf16.mxu0 %vm549_vm1, %v850_v33  ;;  %v872_v61 = vsel %vm549_vm1, %v850_v33, 0  ;;  %v403_v51 = vmul.f32 0.35355338, %v4884_v29 }
 0x1f2   :  { %3996 = vmatpush3.bf16.xpose.msra.mxu0 %v872_v61  ;;  %4001 = vmatprep.mubr.msk.bf16.mxu0 %vm549_vm1, %v458_v60  ;;  %v745_v59 = vpop.permute.xlu0 %744  ;;  %v401_v60 = vmul.f32 0.35355338, %v4844_v16  ;;  %v402_v61 = vmul.f32 0.35355338, %v4840_v15 }
 0x1f3   :  { %4292 = vmatprep.subr.msk.bf16.mxu1 %vm549_vm1, %v745_v59  ;;  %4295 = vmatprep.subr.msk.bf16.mxu0 %vm549_vm1, %v848_v25  ;;  %v765_v33 = vsel %vm549_vm1, %v745_v59, 0 }
 0x1f4   :  { %v5103_v26 = vpop.permute.xlu1 %308  ;;  %v455_v22 = vpack.c.bf16 %v401_v60, %v400_v23  ;;  %v405_v23 = vmul.f32 0.35355338, %v4820_v10  ;;  %v404_v60 = vmul.f32 0.35355338, %v4815_v8 }
 0x1f5   :  { %v5107_v31 = vpack.c.bf16 %v5103_v26, %v5086_v4 }
 0x1f6   :  { %v5109_v2 = vpop.permute.xlu0 %302 }
 0x1f7   :  { %1150 = vrot.lane.b32.xlu0 %v5107_v31, %s4596_s15 }
 0x1f8   :  { %v5114_v5 = vpop.permute.xlu1 %356  ;;  %3984 = vmatpush3.bf16.xpose.msra.mxu1 %v765_v33  ;;  %v456_v33 = vpack.c.bf16 %v403_v51, %v402_v61  ;;  %v415_v51 = vmul.f32 0.35355338, %v4715_v43  ;;  %v408_v61 = vmul.f32 0.35355338, %v4868_v24 }
 0x1f9   :  { %v5119_v20 = vpack.c.bf16 %v5114_v5, %v5094_v63 }
 0x1fa   :  { %3998 = vmatpush3.bf16.xpose.msra.mxu0 %v869_v34  ;;  %v5123_v6 = vpop.permute.xlu0 %350 }
 0x1fb   :  { %1251 = vrot.lane.b32.xlu1 %v5119_v20, %s4596_s15 }
 0x1fc   :  { %v846_v59 = vpop.permute.xlu1 %845 }
 0x1fd   :  { %4296 = vmatprep.subr.msk.bf16.mxu0 %vm549_vm1, %v846_v59  ;;  %v866_v16 = vsel %vm549_vm1, %v846_v59, 0  ;;  %v411_v59 = vmul.f32 0.35355338, %v4904_v39 }
 0x1fe   :  { %v953_v63 = vpop.permute.xlu0 %952 }
 0x1ff   :  { %3986 = vmatmul.mubr.msk.bf16.vlgmr.msra.gmra.mxu1 %vm549_vm1, %v455_v22  ;;  %4297 = vmatprep.subr.msk.bf16.mxu1 %vm549_vm1, %v953_v63  ;;  %v976_v29 = vsel %vm549_vm1, %v953_v63, 0  ;;  %v414_v63 = vmul.f32 0.35355338, %v4785_v58 }
 0x200   :  { %v5133_v25 = vpop.permute.xlu1 %304  ;;  %3989 = vmatprep.mubr.msk.bf16.mxu1 %vm549_vm1, %v456_v33  ;;  %4010 = vmatpush3.bf16.xpose.msra.mxu1 %v976_v29  ;;  %v457_v33 = vpack.c.bf16 %v405_v23, %v404_v60  ;;  %v409_v29 = vmul.f32 0.35355338, %v4856_v21 }
 0x201   :  { %v5138_v15 = vpack.c.bf16 %v5133_v25, %v5109_v2  ;;  %v462_v43 = vpack.c.bf16 %v415_v51, %v414_v63  ;;  %v412_v63 = vmul.f32 0.35355338, %v4828_v12  ;;  %v422_v51 = vmul.f32 0.35355338, %v5019_v37 }
 0x202   :  { %4000 = vmatpush3.bf16.xpose.msra.mxu0 %v866_v16  ;;  %v951_v34 = vpop.permute.xlu0 %950  ;;  %v410_v16 = vmul.f32 0.35355338, %v4848_v17  ;;  %v459_v58 = vpack.c.bf16 %v409_v29, %v408_v61  ;;  %v413_v17 = vmul.f32 0.35355338, %v4836_v14  ;;  %v416_v37 = vmul.f32 0.35355338, %v4772_v55 }
 0x203   :  { %6502 = vst [vmem:[#allocation19_spill] sm:$0xff] %v5138_v15  ;;  %1148 = vrot.lane.b32.xlu0 %v5138_v15, %s4596_s15  ;;  %4298 = vmatprep.subr.msk.bf16.mxu1 %vm549_vm1, %v951_v34  ;;  %v973_v8 = vsel %vm549_vm1, %v951_v34, 0  ;;  %v423_v34 = vmul.f32 0.35355338, %v5028_v7  ;;  %v419_v61 = vmul.f32 0.35355338, %v4761_v53 }
 0x204   :  { %v5149_v22 = vpop.permute.xlu1 %352  ;;  %v460_v39 = vpack.c.bf16 %v411_v59, %v410_v16  ;;  %v421_v53 = vmul.f32 0.35355338, %v4751_v50  ;;  %v6503_v50 = vld [vmem:[#allocation4_spill] sm:$0xff] }
 0x205   :  { %v5154_v10 = vpack.c.bf16 %v5149_v22, %v5123_v6  ;;  %v466_v14 = vpack.c.bf16 %v423_v34, %v422_v51 }
 0x206   :  { %v949_v23 = vpop.permute.xlu0 %948 }
 0x207   :  { %1959 = vrot.lane.b32.xlu0 %v4765_v54, %s4597_s16  ;;  %1249 = vrot.lane.b32.xlu1 %v5154_v10, %s4596_s15 }
 0x208   :  { %3990 = vmatmul.mubr.msk.bf16.gmra.mxu1 %vm549_vm1, %v457_v33  ;;  %v1054_v24 = vpop.permute.xlu1 %1053 }
 0x209   :  { %4012 = vmatpush3.bf16.xpose.msra.mxu1 %v973_v8  ;;  %4017 = vmatprep.mubr.msk.bf16.mxu1 %vm549_vm1, %v462_v43  ;;  %v1077_v54 = vsel %vm549_vm1, %v1054_v24, 0  ;;  %v6510_v43 = vld [vmem:[#allocation5_spill] sm:$0xff]  ;;  %v6511_v8 = vld [vmem:[#allocation6_spill] sm:$0xff] }
 0x20a   :  { %4002 = vmatmul.mubr.msk.bf16.vlgmr.msra.gmra.mxu0 %vm549_vm1, %v459_v58  ;;  %4299 = vmatprep.subr.msk.bf16.mxu1 %vm549_vm1, %v949_v23  ;;  %v947_v60 = vpop.permute.xlu0 %946  ;;  %v429_v58 = vmul.f32 0.35355338, %v6510_v43  ;;  %v432_v43 = vmul.f32 0.35355338, %v5086_v4 }
 0x20b   :  { %4005 = vmatprep.mubr.msk.bf16.mxu0 %vm549_vm1, %v460_v39  ;;  %1955 = vrot.lane.b32.xlu0 %v4746_v49, %s4597_s16  ;;  %v461_v49 = vpack.c.bf16 %v413_v17, %v412_v63  ;;  %v6512_v39 = vld [vmem:[#allocation17_spill] sm:$0xff] }
 0x20c   :  { %1961 = vrot.lane.b32.xlu1 %v4756_v52, %s4597_s16  ;;  %4301 = vmatprep.subr.msk.bf16.mxu0 %vm549_vm1, %v1054_v24  ;;  %v1052_v21 = vpop.permute.xlu1 %1051  ;;  %v970_v52 = vsel %vm549_vm1, %v949_v23, 0  ;;  %v428_v24 = vmul.f32 0.35355338, %v6511_v8  ;;  %v439_v23 = vmul.f32 0.35355338, %v5149_v22 }
 0x20d   :  { %4026 = vmatpush3.bf16.xpose.msra.mxu0 %v1077_v54  ;;  %v1074_v12 = vsel %vm549_vm1, %v1052_v21, 0  ;;  %v434_v8 = vmul.f32 0.35355338, %v5039_v36  ;;  %v6516_v36 = vld [vmem:[#allocation13_spill] sm:$0xff] }
 0x20e   :  { %4302 = vmatprep.subr.msk.bf16.mxu0 %vm549_vm1, %v1052_v21  ;;  %v438_v21 = vmul.f32 0.35355338, %v5123_v6  ;;  %v469_v51 = vpack.c.bf16 %v429_v58, %v428_v24  ;;  %v6513_v6 = vld [vmem:[#allocation9_spill] sm:$0xff] }
 0x20f   :  { %2137 = vrot.lane.b32.xlu0 %v4888_v30, %s4597_s16 }
 0x210   :  { %2050 = vrot.lane.b32.xlu1 %v4809_v3, %s4597_s16  ;;  %v1050_v30 = vpop.permute.xlu1 %1049  ;;  %v967_v3 = vsel %vm549_vm1, %v947_v60, 0 }
 0x211   :  { %4014 = vmatpush3.bf16.xpose.msra.mxu1 %v970_v52  ;;  %v1071_v7 = vsel %vm549_vm1, %v1050_v30, 0 }
 0x212   :  { %4006 = vmatmul.mubr.msk.bf16.gmra.mxu0 %vm549_vm1, %v461_v49  ;;  %4300 = vmatprep.subr.msk.bf16.mxu1 %vm549_vm1, %v947_v60  ;;  %v474_v49 = vpack.c.bf16 %v439_v23, %v438_v21  ;;  %v6515_v21 = vld [vmem:[#allocation15_spill] sm:$0xff] }
 0x213   :  { %4033 = vmatprep.mubr.msk.bf16.mxu0 %vm549_vm1, %v466_v14  ;;  %2133 = vrot.lane.b32.xlu0 %v4916_v44, %s4597_s16  ;;  %v417_v44 = vmul.f32 0.35355338, %v4741_v47  ;;  %v420_v47 = vmul.f32 0.35355338, %v4775_v56 }
 0x214   :  { %2048 = vrot.lane.b32.xlu1 %v4832_v13, %s4597_s16  ;;  %v418_v13 = vmul.f32 0.35355338, %v4780_v57  ;;  %v431_v57 = vmul.f32 0.35355338, %v5133_v25 }
 0x215   :  { %4028 = vmatpush3.bf16.xpose.msra.mxu0 %v1074_v12  ;;  %v4598_v12 = vmov -1e+30  }
 0x216   :  { %4303 = vmatprep.subr.msk.bf16.mxu0 %vm549_vm1, %v1050_v30  ;;  %v464_v55 = vpack.c.bf16 %v419_v61, %v418_v13 }
 0x217   :  { %2315 = vrot.lane.b32.xlu0 %v4955_v45, %s4597_s16  ;;  %v465_v45 = vpack.c.bf16 %v421_v53, %v420_v47 }
 0x218   :  { %1957 = vrot.lane.b32.xlu1 %v4738_v46, %s4597_s16  ;;  %v463_v46 = vpack.c.bf16 %v417_v44, %v416_v37 }
 0x219   :  { %4016 = vmatpush3.bf16.xpose.msra.mxu1 %v967_v3 }
 0x21b   :  { %2311 = vrot.lane.b32.xlu0 %v4983_v32, %s4597_s16 }
 0x21c   :  { %2046 = vrot.lane.b32.xlu1 %v4803_v0, %s4597_s16  ;;  %v430_v0 = vmul.f32 0.35355338, %v5109_v2  ;;  %v510_v2 = vlaneseq }
 0x21d   :  { %4030 = vmatpush3.bf16.xpose.msra.mxu0 %v1071_v7 }
 0x21e   :  { %v470_v32 = vpack.c.bf16 %v431_v57, %v430_v0  ;;  %v5253_v16 = vshrl.u32 %v510_v2, 7  ;;  %v5264_v63 = vand.u32 127, %v510_v2 }
 0x21f   :  { %2491 = vrot.lane.b32.xlu0 %v5107_v31, %s4597_s16  ;;  %v6508_v31 = vld [vmem:[#allocation8_spill] sm:$0xff] }
 0x220   :  { %2044 = vrot.lane.b32.xlu1 %v4817_v9, %s4597_s16  ;;  %4018 = vmatmul.mubr.msk.bf16.vlgmr.msra.gmra.mxu1 %vm549_vm1, %v463_v46  ;;  %v513_v34 = vadd.s32 16, %v5253_v16  ;;  %vm521_vm3 = vcmp.le.s32.totalorder %v5264_v63, %v5253_v16  ;;  %v518_v46 = vadd.s32 56, %v5253_v16  ;;  %v516_v47 = vadd.s32 40, %v5253_v16 }
 0x221   :  { %4021 = vmatprep.mubr.msk.bf16.mxu1 %vm549_vm1, %v464_v55  ;;  %v5286_v37 = vsel %vm521_vm3, 0.0, %v4598_v12 }
 0x222   :  { %vm523_vm2 = vcmp.le.s32.totalorder %v5264_v63, %v513_v34  ;;  %vm528_vm6 = vcmp.le.s32.totalorder %v5264_v63, %v518_v46  ;;  %vm526_vm7 = vcmp.le.s32.totalorder %v5264_v63, %v516_v47  ;;  %v442_v34 = vmul.f32 0.35355338, %v6515_v21 }
 0x223   :  { %v5281_v30 = vsel %vm523_vm2, 0.0, %v4598_v12 }
 0x224   :  { %2139 = vrot.lane.b32.xlu1 %v4824_v11, %s4597_s16  ;;  %v6504_v11 = vld [vmem:[#allocation2_spill] sm:$0xff] }
 0x228   :  { %2228 = vrot.lane.b32.xlu1 %v4852_v18, %s4597_s16  ;;  %4022 = vmatmul.mubr.msk.bf16.gmra.mxu1 %vm549_vm1, %v465_v45  ;;  %v425_v18 = vmul.f32 0.35355338, %v6504_v11 }
 0x229   :  { %4049 = vmatprep.mubr.msk.bf16.mxu1 %vm549_vm1, %v470_v32 }
 0x22c   :  { %2226 = vrot.lane.b32.xlu1 %v4910_v42, %s4597_s16  ;;  %v6506_v42 = vld [vmem:[#allocation11_spill] sm:$0xff] }
 0x230   :  { %2135 = vrot.lane.b32.xlu1 %v4876_v27, %s4597_s16  ;;  %v6505_v27 = vld [vmem:[#allocation3_spill] sm:$0xff] }
 0x234   :  { %2224 = vrot.lane.b32.xlu1 %v4900_v35, %s4597_s16  ;;  %v424_v35 = vmul.f32 0.35355338, %v6505_v27 }
 0x236   :  { %v467_v25 = vpack.c.bf16 %v425_v18, %v424_v35  ;;  %v5325_v18 = vsel %vm526_vm7, 0.0, %v4598_v12 }
 0x238   :  { %2222 = vrot.lane.b32.xlu1 %v4933_v1, %s4597_s16 }
 0x23c   :  { %2317 = vrot.lane.b32.xlu1 %v6503_v50, %s4597_s16 }
 0x240   :  { %2406 = vrot.lane.b32.xlu1 %v4973_v40, %s4597_s16  ;;  %v6507_v40 = vld [vmem:[#allocation7_spill] sm:$0xff] }
 0x241   :  { %v427_v1 = vmul.f32 0.35355338, %v6507_v40 }
 0x244   :  { %2313 = vrot.lane.b32.xlu1 %v4969_v38, %s4597_s16  ;;  %v426_v38 = vmul.f32 0.35355338, %v6508_v31 }
 0x246   :  { %v468_v59 = vpack.c.bf16 %v427_v1, %v426_v38 }
 0x248   :  { %2402 = vrot.lane.b32.xlu1 %v4996_v48, %s4597_s16  ;;  %v6509_v48 = vld [vmem:[#allocation14_spill] sm:$0xff] }
 0x249   :  { %v1048_v56 = vpop.permute.xlu1 %1047 }
 0x24a   :  { %4304 = vmatprep.subr.msk.bf16.mxu0 %vm549_vm1, %v1048_v56  ;;  %v1068_v9 = vsel %vm549_vm1, %v1048_v56, 0  ;;  %v5320_v56 = vsel %vm528_vm6, 0.0, %v4598_v12 }
 0x24b   :  { %4032 = vmatpush3.bf16.xpose.msra.mxu0 %v1068_v9 }
 0x24c   :  { %2400 = vrot.lane.b32.xlu1 %v6506_v42, %s4597_s16 }
 0x250   :  { %2495 = vrot.lane.b32.xlu1 %v6509_v48, %s4597_s16  ;;  %v433_v48 = vmul.f32 0.35355338, %v5103_v26  ;;  %v443_v26 = vmul.f32 0.35355338, %v5076_v19 }
 0x251   :  { %v1155_v33 = vpop.permute.xlu0 %1154 }
 0x252   :  { %4034 = vmatmul.mubr.msk.bf16.vlgmr.msra.gmra.mxu0 %vm549_vm1, %v467_v25  ;;  %4305 = vmatprep.subr.msk.bf16.mxu1 %vm549_vm1, %v1155_v33  ;;  %v1178_v29 = vsel %vm549_vm1, %v1155_v33, 0  ;;  %v512_v33 = vadd.s32 8, %v5253_v16  ;;  %v471_v24 = vpack.c.bf16 %v433_v48, %v432_v43 }
 0x253   :  { %4037 = vmatprep.mubr.msk.bf16.mxu0 %vm549_vm1, %v468_v59  ;;  %4042 = vmatpush3.bf16.xpose.msra.mxu1 %v1178_v29  ;;  %v435_v59 = vmul.f32 0.35355338, %v5064_v28  ;;  %v517_v28 = vadd.s32 48, %v5253_v16 }
 0x254   :  { %2584 = vrot.lane.b32.xlu1 %v6512_v39, %s4597_s16  ;;  %v441_v39 = vmul.f32 0.35355338, %v5114_v5  ;;  %vm522_vm8 = vcmp.le.s32.totalorder %v5264_v63, %v512_v33 }
 0x255   :  { %v1256_v54 = vpop.permute.xlu1 %1255  ;;  %v472_v23 = vpack.c.bf16 %v435_v59, %v434_v8  ;;  %vm527_vm9 = vcmp.le.s32.totalorder %v5264_v63, %v517_v28 }
 0x256   :  { %4309 = vmatprep.subr.msk.bf16.mxu0 %vm549_vm1, %v1256_v54  ;;  %v1279_v17 = vsel %vm549_vm1, %v1256_v54, 0  ;;  %v6514_v54 = vld [vmem:[#allocation18_spill] sm:$0xff]  ;;  %v5371_v46 = vsel %vm527_vm9, 0.0, %v4598_v12 }
 0x257   :  { %4058 = vmatpush3.bf16.xpose.msra.mxu0 %v1279_v17  ;;  %v440_v17 = vmul.f32 0.35355338, %v6514_v54 }
 0x258   :  { %2580 = vrot.lane.b32.xlu1 %v5119_v20, %s4597_s16  ;;  %v514_v20 = vadd.s32 24, %v5253_v16 }
 0x259   :  { %v1153_v52 = vpop.permute.xlu0 %1152  ;;  %v475_v5 = vpack.c.bf16 %v441_v39, %v440_v17 }
 0x25a   :  { %4038 = vmatmul.mubr.msk.bf16.gmra.mxu0 %vm549_vm1, %v469_v51  ;;  %4306 = vmatprep.subr.msk.bf16.mxu1 %vm549_vm1, %v1153_v52  ;;  %v1175_v22 = vsel %vm549_vm1, %v1153_v52, 0  ;;  %vm524_vm5 = vcmp.le.s32.totalorder %v5264_v63, %v514_v20  ;;  %v437_v51 = vmul.f32 0.35355338, %v6516_v36  ;;  %v476_v52 = vpack.c.bf16 %v443_v26, %v442_v34 }
 0x25b   :  { %4065 = vmatprep.mubr.msk.bf16.mxu0 %vm549_vm1, %v474_v49  ;;  %4044 = vmatpush3.bf16.xpose.msra.mxu1 %v1175_v22  ;;  %v5358_v49 = vsel %vm522_vm8, 0.0, %v4598_v12  ;;  %v6517_v22 = vld [vmem:[#allocation10_spill] sm:$0xff] }
 0x25c   :  { %2404 = vrot.lane.b32.xlu1 %v6513_v6, %s4597_s16  ;;  %v436_v6 = vmul.f32 0.35355338, %v6517_v22 }
 0x25d   :  { %v1254_v14 = vpop.permute.xlu1 %1253 }
 0x25e   :  { %4310 = vmatprep.subr.msk.bf16.mxu0 %vm549_vm1, %v1254_v14  ;;  %v1276_v60 = vsel %vm549_vm1, %v1254_v14, 0  ;;  %v515_v14 = vadd.s32 32, %v5253_v16 }
 0x25f   :  { %4060 = vmatpush3.bf16.xpose.msra.mxu0 %v1276_v60 }
 0x260   :  { %2493 = vrot.lane.b32.xlu1 %v5069_v41, %s4597_s16  ;;  %v3955_v3 = vpop.f32.mrf.mxu1  ;;  %v5301_v41 = vsel %vm524_vm5, 0.0, %v4598_v12  ;;  %vm525_vm10 = vcmp.le.s32.totalorder %v5264_v63, %v515_v14 }
 0x261   :  { %v5289_v44 = vadd.f32 %v3955_v3, %v5281_v30  ;;  %v473_v3 = vpack.c.bf16 %v437_v51, %v436_v6 }
 0x262   :  { %v608_v7 = vpop.f32.mrf.mxu1 }
 0x263   :  { %v5293_v13 = vadd.f32 %v608_v7, %v5286_v37  ;;  %v1353_v61 = vsel %vm1346_vm4, %v5289_v44, -inf  ;;  %v6518_v7 = vld [vmem:[#allocation16_spill] sm:$0xff] }
 0x264   :  { %2582 = vrot.lane.b32.xlu1 %v5080_v62, %s4597_s16  ;;  %1354 = vmax.xlane.f32.xlu0 %v1353_v61  ;;  %v3956_v55 = vpop.f32.mrf.mxu1  ;;  %v445_v61 = vmul.f32 0.35355338, %v6518_v7 }
 0x265   :  { %v5307_v57 = vadd.f32 %v3956_v55, %v5301_v41  ;;  %v1347_v0 = vsel %vm1346_vm4, %v5293_v13, -inf  ;;  %v6519_v55 = vld [vmem:[#allocation12_spill] sm:$0xff] }
 0x266   :  { %v5304_v53 = vpop.f32.mrf.mxu1  ;;  %v444_v16 = vmul.f32 0.35355338, %v6519_v55 }
 0x267   :  { %v1356_v9 = vsel %vm1346_vm4, %v5307_v57, -inf  ;;  %v5366_v60 = vadd.f32 %v5304_v53, %v5358_v49 }
 0x268   :  { %v5312_v45 = vpop.f32.mrf.mxu1  ;;  %1348 = vmax.xlane.f32.xlu0 %v1347_v0 }
 0x269   :  { %v1151_v62 = vpop.permute.xlu0 %1150  ;;  %v5378_v53 = vadd.f32 %v5312_v45, %v5371_v46  ;;  %v1350_v0 = vsel %vm1346_vm4, %v5366_v60, -inf }
 0x26a   :  { %v5315_v32 = vpop.f32.mrf.mxu1  ;;  %4307 = vmatprep.subr.msk.bf16.mxu1 %vm549_vm1, %v1151_v62  ;;  %v1172_v50 = vsel %vm549_vm1, %v1151_v62, 0  ;;  %v477_v62 = vpack.c.bf16 %v445_v61, %v444_v16 }
 0x26b   :  { %4046 = vmatpush3.bf16.xpose.msra.mxu1 %v1172_v50  ;;  %v5383_v50 = vsel %vm525_vm10, 0.0, %v4598_v12  ;;  %v1365_v63 = vsel %vm1346_vm4, %v5378_v53, -inf }
 0x26c   :  { %v3960_v11 = vpop.f32.mrf.mxu1  ;;  %1357 = vmax.xlane.f32.xlu0 %v1356_v9  ;;  %v5390_v45 = vadd.f32 %v5315_v32, %v5383_v50 }
 0x26d   :  { %v5328_v27 = vadd.f32 %v3960_v11, %v5320_v56  ;;  %v1252_v35 = vpop.permute.xlu1 %1251 }
 0x26e   :  { %v627_v42 = vpop.f32.mrf.mxu1  ;;  %4311 = vmatprep.subr.msk.bf16.mxu0 %vm549_vm1, %v1252_v35  ;;  %v1273_v40 = vsel %vm549_vm1, %v1252_v35, 0  ;;  %v1359_v12 = vsel %vm1346_vm4, %v5390_v45, -inf }
 0x26f   :  { %v5333_v1 = vadd.f32 %v627_v42, %v5325_v18  ;;  %4062 = vmatpush3.bf16.xpose.msra.mxu0 %v1273_v40  ;;  %v1368_v31 = vsel %vm1346_vm4, %v5328_v27, -inf }
 0x270   :  { %1369 = vmax.xlane.f32.xlu0 %v1368_v31 }
 0x271   :  { %v1362_v38 = vsel %vm1346_vm4, %v5333_v1, -inf }
 0x274   :  { %1363 = vmax.xlane.f32.xlu0 %v1362_v38 }
 0x275   :  { %v1149_v2 = vpop.permute.xlu0 %1148 }
 0x276   :  { %4308 = vmatprep.subr.msk.bf16.mxu1 %vm549_vm1, %v1149_v2  ;;  %v1169_v25 = vsel %vm549_vm1, %v1149_v2, 0 }
 0x277   :  { %4048 = vmatpush3.bf16.xpose.msra.mxu1 %v1169_v25 }
 0x279   :  { %v1250_v29 = vpop.permute.xlu1 %1249  ;;  %v1960_v19 = vpop.permute.xlu0 %1959 }
 0x27a   :  { %4312 = vmatprep.subr.msk.bf16.mxu0 %vm549_vm1, %v1250_v29  ;;  %v1270_v58 = vsel %vm549_vm1, %v1250_v29, 0 }
 0x27b   :  { %4064 = vmatpush3.bf16.xpose.msra.mxu0 %v1270_v58 }
 0x27d   :  { %v1956_v11 = vpop.permute.xlu0 %1955 }
 0x27e   :  { %v1962_v4 = vpop.permute.xlu1 %1961  ;;  %4050 = vmatmul.mubr.msk.bf16.vlgmr.msra.gmra.mxu1 %vm549_vm1, %v471_v24 }
 0x27f   :  { %4073 = vmatprep.subr.bf16.mxu1 %v1962_v4  ;;  %4053 = vmatprep.mubr.msk.bf16.mxu1 %vm549_vm1, %v472_v23 }
 0x280   :  { %4074 = vmatpush3.bf16.msra.mxu1 %v1962_v4 }
 0x281   :  { %4075 = vmatprep.subr.bf16.mxu1 %v1960_v19 }
 0x282   :  { %v2051_v20 = vpop.permute.xlu1 %2050  ;;  %4066 = vmatmul.mubr.msk.bf16.vlgmr.msra.gmra.mxu0 %vm549_vm1, %v475_v5 }
 0x283   :  { %4089 = vmatprep.subr.bf16.mxu0 %v2051_v20  ;;  %4069 = vmatprep.mubr.msk.bf16.mxu0 %vm549_vm1, %v476_v52 }
 0x284   :  { %4076 = vmatpush3.bf16.msra.mxu1 %v1960_v19  ;;  %4090 = vmatpush3.bf16.msra.mxu0 %v2051_v20 }
 0x286   :  { %v2049_v47 = vpop.permute.xlu1 %2048  ;;  %4054 = vmatmul.mubr.msk.bf16.gmra.mxu1 %vm549_vm1, %v473_v3 }
 0x287   :  { %4091 = vmatprep.subr.bf16.mxu0 %v2049_v47 }
 0x288   :  { %4092 = vmatpush3.bf16.msra.mxu0 %v2049_v47  ;;  %1351 = vmax.xlane.f32.xlu1 %v1350_v0 }
 0x28a   :  { %v1958_v9 = vpop.permute.xlu1 %1957  ;;  %4070 = vmatmul.mubr.msk.bf16.gmra.mxu0 %vm549_vm1, %v477_v62 }
 0x28b   :  { %4077 = vmatprep.subr.bf16.mxu1 %v1958_v9 }
 0x28c   :  { %4078 = vmatpush3.bf16.msra.mxu1 %v1958_v9  ;;  %1366 = vmax.xlane.f32.xlu1 %v1365_v63 }
 0x28d   :  { %4079 = vmatprep.subr.bf16.mxu1 %v1956_v11 }
 0x28e   :  { %v2047_v35 = vpop.permute.xlu1 %2046 }
 0x28f   :  { %4093 = vmatprep.subr.bf16.mxu0 %v2047_v35 }
 0x290   :  { %4080 = vmatpush3.bf16.msra.mxu1 %v1956_v11  ;;  %4094 = vmatpush3.bf16.msra.mxu0 %v2047_v35 }
 0x291   :  { %1360 = vmax.xlane.f32.xlu1 %v1359_v12 }
 0x292   :  { %v2045_v42 = vpop.permute.xlu1 %2044 }
 0x293   :  { %4095 = vmatprep.subr.bf16.mxu0 %v2045_v42 }
 0x294   :  { %4096 = vmatpush3.bf16.msra.mxu0 %v2045_v42 }
 0x296   :  { %v5394_v40 = vpop.permute.xlu1 %2139 }
 0x297   :  { %4105 = vmatprep.subr.bf16.mxu1 %v5394_v40 }
 0x29a   :  { %v5397_v32 = vpop.permute.xlu1 %2228 }
 0x29b   :  { %4121 = vmatprep.subr.bf16.mxu0 %v5397_v32 }
 0x29e   :  { %v5410_v29 = vpop.permute.xlu1 %2226 }
 0x2a2   :  { %v5412_v43 = vpop.permute.xlu1 %2135 }
 0x2a6   :  { %v5422_v17 = vpop.permute.xlu1 %2224 }
 0x2a9   :  { %v3971_v31 = vpop.f32.mrf.mxu0 }
 0x2aa   :  { %v5401_v38 = vadd.f32 %v3971_v31, %v5281_v30  ;;  %v5437_v22 = vpop.permute.xlu1 %2222 }
 0x2ab   :  { %v709_v2 = vpop.f32.mrf.mxu0 }
 0x2ac   :  { %v1377_v25 = vsel %vm1346_vm4, %v5401_v38, -inf  ;;  %v5418_v23 = vadd.f32 %v709_v2, %v5286_v37 }
 0x2ad   :  { %v3972_v48 = vpop.f32.mrf.mxu0  ;;  %1378 = vmax.xlane.f32.xlu1 %v1377_v25 }
 0x2ae   :  { %v5406_v59 = vadd.f32 %v3972_v48, %v5301_v41  ;;  %v1371_v51 = vsel %vm1346_vm4, %v5418_v23, -inf  ;;  %v5459_v63 = vpop.permute.xlu1 %2317 }
 0x2af   :  { %v712_v58 = vpop.f32.mrf.mxu0 }
 0x2b0   :  { %v1380_v33 = vsel %vm1346_vm4, %v5406_v59, -inf  ;;  %v5428_v34 = vadd.f32 %v712_v58, %v5358_v49 }
 0x2b1   :  { %1381 = vmax.xlane.f32.xlu0 %v1380_v33  ;;  %v3975_v28 = vpop.f32.mrf.mxu0 }
 0x2b2   :  { %v5440_v6 = vadd.f32 %v3975_v28, %v5371_v46  ;;  %v1374_v3 = vsel %vm1346_vm4, %v5428_v34, -inf  ;;  %v5481_v58 = vpop.permute.xlu1 %2406 }
 0x2b3   :  { %v725_v19 = vpop.f32.mrf.mxu0  ;;  %6520 = vst [vmem:[#allocation4_spill] sm:$0xff] %v5481_v58 }
 0x2b4   :  { %v1389_v47 = vsel %vm1346_vm4, %v5440_v6, -inf  ;;  %v5462_v11 = vadd.f32 %v725_v19, %v5383_v50 }
 0x2b5   :  { %v3976_v7 = vpop.f32.mrf.mxu0 }
 0x2b6   :  { %v5450_v55 = vadd.f32 %v3976_v7, %v5320_v56  ;;  %v1383_v48 = vsel %vm1346_vm4, %v5462_v11, -inf }
 0x2b7   :  { %v728_v62 = vpop.f32.mrf.mxu0 }
 0x2b8   :  { %v5465_v35 = vadd.f32 %v728_v62, %v5325_v18  ;;  %v1392_v42 = vsel %vm1346_vm4, %v5450_v55, -inf }
 0x2ba   :  { %v1386_v33 = vsel %vm1346_vm4, %v5465_v35, -inf }
 0x2bf   :  { %v3987_v8 = vpop.f32.mrf.mxu1 }
 0x2c0   :  { %v5415_v24 = vadd.f32 %v3987_v8, %v5281_v30 }
 0x2c1   :  { %v810_v39 = vpop.f32.mrf.mxu1 }
 0x2c2   :  { %v1401_v26 = vsel %vm1346_vm4, %v5415_v24, -inf  ;;  %v5431_v36 = vadd.f32 %v810_v39, %v5286_v37 }
 0x2c3   :  { %v3988_v54 = vpop.f32.mrf.mxu1  ;;  %1402 = vmax.xlane.f32.xlu1 %v1401_v26 }
 0x2c4   :  { %v5425_v4 = vadd.f32 %v3988_v54, %v5301_v41  ;;  %v1395_v20 = vsel %vm1346_vm4, %v5431_v36, -inf }
 0x2c5   :  { %v813_v21 = vpop.f32.mrf.mxu1 }
 0x2c6   :  { %v1404_v5 = vsel %vm1346_vm4, %v5425_v4, -inf  ;;  %v5443_v14 = vadd.f32 %v813_v21, %v5358_v49 }
 0x2c7   :  { %1372 = vmax.xlane.f32.xlu1 %v1371_v51  ;;  %1405 = vmax.xlane.f32.xlu0 %v1404_v5  ;;  %v5493_v51 = vpop.permute.xlu1 %2313  ;;  %v5495_v5 = vpop.permute.xlu0 %2137 }
 0x2c8   :  { %v3991_v52 = vpop.f32.mrf.mxu1  ;;  %v1398_v0 = vsel %vm1346_vm4, %v5443_v14, -inf  ;;  %6521 = vst [vmem:[#allocation2_spill] sm:$0xff] %v5493_v51 }
 0x2c9   :  { %v5453_v16 = vadd.f32 %v3991_v52, %v5371_v46 }
 0x2ca   :  { %v826_v61 = vpop.f32.mrf.mxu1  ;;  %v4003_v8 = vpop.f32.mrf.mxu0 }
 0x2cb   :  { %1396 = vmax.xlane.f32.xlu1 %v1395_v20  ;;  %1375 = vmax.xlane.f32.xlu0 %v1374_v3  ;;  %v1413_v12 = vsel %vm1346_vm4, %v5453_v16, -inf  ;;  %v5472_v2 = vadd.f32 %v826_v61, %v5383_v50  ;;  %v5484_v39 = vadd.f32 %v4003_v8, %v5281_v30 }
 0x2cc   :  { %v3992_v9 = vpop.f32.mrf.mxu1  ;;  %v911_v21 = vpop.f32.mrf.mxu0 }
 0x2cd   :  { %v5487_v26 = vadd.f32 %v3992_v9, %v5320_v56  ;;  %v1407_v28 = vsel %vm1346_vm4, %v5472_v2, -inf  ;;  %v5498_v19 = vadd.f32 %v911_v21, %v5286_v37  ;;  %v1425_v20 = vsel %vm1346_vm4, %v5484_v39, -inf  ;;  %v5512_v9 = vpop.permute.xlu1 %2402 }
 0x2ce   :  { %v829_v31 = vpop.f32.mrf.mxu1  ;;  %v4004_v3 = vpop.f32.mrf.mxu0  ;;  %6523 = vst [vmem:[#allocation11_spill] sm:$0xff] %v5512_v9 }
 0x2cf   :  { %1390 = vmax.xlane.f32.xlu1 %v1389_v47  ;;  %1399 = vmax.xlane.f32.xlu0 %v1398_v0  ;;  %v5475_v25 = vadd.f32 %v829_v31, %v5325_v18  ;;  %v1416_v52 = vsel %vm1346_vm4, %v5487_v26, -inf  ;;  %v5508_v47 = vadd.f32 %v4004_v3, %v5301_v41  ;;  %v1419_v62 = vsel %vm1346_vm4, %v5498_v19, -inf }
 0x2d1   :  { %v1410_v54 = vsel %vm1346_vm4, %v5475_v25, -inf  ;;  %v5531_v3 = vpop.permute.xlu1 %2400 }
 0x2d2   :  { %6526 = vst [vmem:[#allocation14_spill] sm:$0xff] %v5531_v3 }
 0x2d3   :  { %1414 = vmax.xlane.f32.xlu1 %v1413_v12  ;;  %1393 = vmax.xlane.f32.xlu0 %v1392_v42  ;;  %v914_v12 = vpop.f32.mrf.mxu0 }
 0x2d4   :  { %v5522_v8 = vadd.f32 %v914_v12, %v5358_v49 }
 0x2d5   :  { %v4007_v12 = vpop.f32.mrf.mxu0  ;;  %v5550_v3 = vpop.permute.xlu1 %2495 }
 0x2d6   :  { %6524 = vst [vmem:[#allocation7_spill] sm:$0xff] %v5522_v8  ;;  %6530 = vst [vmem:[#allocation9_spill] sm:$0xff] %v5550_v3 }
 0x2d7   :  { %1384 = vmax.xlane.f32.xlu1 %v1383_v48  ;;  %1387 = vmax.xlane.f32.xlu0 %v1386_v33  ;;  %v5519_v48 = vpop.permute.xlu0 %2133  ;;  %v927_v15 = vpop.f32.mrf.mxu0 }
 0x2db   :  { %1408 = vmax.xlane.f32.xlu1 %v1407_v28  ;;  %1411 = vmax.xlane.f32.xlu0 %v1410_v54  ;;  %v1428_v54 = vsel %vm1346_vm4, %v5508_v47, -inf }
 0x2df   :  { %1417 = vmax.xlane.f32.xlu1 %v1416_v52  ;;  %1426 = vmax.xlane.f32.xlu0 %v1425_v20 }
 0x2e0   :  { %v4019_v7 = vpop.f32.mrf.mxu1 }
 0x2e1   :  { %v5505_v61 = vadd.f32 %v4019_v7, %v5281_v30  ;;  %v5533_v7 = vpop.permute.xlu0 %2315 }
 0x2e2   :  { %v1012_v0 = vpop.f32.mrf.mxu1 }
 0x2e3   :  { %6522 = vst [vmem:[#allocation3_spill] sm:$0xff] %v5505_v61  ;;  %v5515_v42 = vadd.f32 %v1012_v0, %v5286_v37  ;;  %v1449_v31 = vsel %vm1346_vm4, %v5505_v61, -inf  ;;  %1420 = vmax.xlane.f32.xlu0 %v1419_v62  ;;  %v1422_v62 = vsel %vm1346_vm4, %v5522_v8, -inf }
 0x2e4   :  { %v4020_v33 = vpop.f32.mrf.mxu1  ;;  %1450 = vmax.xlane.f32.xlu1 %v1449_v31 }
 0x2e5   :  { %v5527_v21 = vadd.f32 %v4020_v33, %v5301_v41  ;;  %v1443_v52 = vsel %vm1346_vm4, %v5515_v42, -inf  ;;  %v5557_v58 = vpop.permute.xlu0 %2311 }
 0x2e6   :  { %v1015_v28 = vpop.f32.mrf.mxu1  ;;  %6532 = vst [vmem:[#allocation15_spill] sm:$0xff] %v5557_v58 }
 0x2e7   :  { %6525 = vst [vmem:[#allocation8_spill] sm:$0xff] %v5527_v21  ;;  %1429 = vmax.xlane.f32.xlu0 %v1428_v54  ;;  %v5536_v0 = vadd.f32 %v1015_v28, %v5358_v49  ;;  %v1452_v33 = vsel %vm1346_vm4, %v5527_v21, -inf }
 0x2e8   :  { %v4023_v20 = vpop.f32.mrf.mxu1  ;;  %1444 = vmax.xlane.f32.xlu1 %v1443_v52  ;;  %v5546_v52 = vadd.f32 %v4007_v12, %v5371_v46  ;;  %v5560_v12 = vadd.f32 %v927_v15, %v5383_v50 }
 0x2e9   :  { %6527 = vst [vmem:[#allocation5_spill] sm:$0xff] %v5536_v0  ;;  %v5541_v31 = vadd.f32 %v4023_v20, %v5371_v46  ;;  %v1446_v28 = vsel %vm1346_vm4, %v5536_v0, -inf  ;;  %v4008_v0 = vpop.f32.mrf.mxu0 }
 0x2ea   :  { %v1028_v54 = vpop.f32.mrf.mxu1  ;;  %6529 = vst [vmem:[#allocation17_spill] sm:$0xff] %v5546_v52  ;;  %6533 = vst [vmem:[#allocation13_spill] sm:$0xff] %v5560_v12  ;;  %v1431_v15 = vsel %vm1346_vm4, %v5560_v12, -inf }
 0x2eb   :  { %6528 = vst [vmem:[#allocation6_spill] sm:$0xff] %v5541_v31  ;;  %1423 = vmax.xlane.f32.xlu0 %v1422_v62  ;;  %v5553_v9 = vadd.f32 %v1028_v54, %v5383_v50  ;;  %v1461_v20 = vsel %vm1346_vm4, %v5541_v31, -inf  ;;  %v5571_v31 = vpop.permute.xlu0 %2491 }
 0x2ec   :  { %1453 = vmax.xlane.f32.xlu1 %v1452_v33  ;;  %v4024_v62 = vpop.f32.mrf.mxu1  ;;  %v1437_v33 = vsel %vm1346_vm4, %v5546_v52, -inf  ;;  %6536 = vst [vmem:[#allocation12_spill] sm:$0xff] %v5571_v31  ;;  %v930_v52 = vpop.f32.mrf.mxu0 }
 0x2ed   :  { %6531 = vst [vmem:[#allocation18_spill] sm:$0xff] %v5553_v9  ;;  %v5565_v3 = vadd.f32 %v4024_v62, %v5320_v56  ;;  %v1455_v54 = vsel %vm1346_vm4, %v5553_v9, -inf  ;;  %v5581_v9 = vadd.f32 %v930_v52, %v5325_v18 }
 0x2ef   :  { %1447 = vmax.xlane.f32.xlu0 %v1446_v28  ;;  %6534 = vst [vmem:[#allocation10_spill] sm:$0xff] %v5565_v3  ;;  %v5569_v28 = vpop.permute.xlu1 %2584  ;;  %v1464_v62 = vsel %vm1346_vm4, %v5565_v3, -inf  ;;  %6538 = vst [vmem:[#allocation21_spill] sm:$0xff] %v5581_v9  ;;  %v1434_v12 = vsel %vm1346_vm4, %v5581_v9, -inf }
 0x2f0   :  { %1462 = vmax.xlane.f32.xlu1 %v1461_v20  ;;  %6535 = vst [vmem:[#allocation16_spill] sm:$0xff] %v5569_v28  ;;  %v5574_v20 = vadd.f32 %v4008_v0, %v5320_v56  ;;  %v1031_v0 = vpop.f32.mrf.mxu1 }
 0x2f1   :  { %v5588_v31 = vadd.f32 %v1031_v0, %v5325_v18 }
 0x2f2   :  { %6537 = vst [vmem:[#allocation20_spill] sm:$0xff] %v5574_v20 }
 0x2f3   :  { %1438 = vmax.xlane.f32.xlu0 %v1437_v33  ;;  %v1355_v33 = vpop.xlane.xlu0 %1354  ;;  %v5585_v28 = vpop.permute.xlu1 %2580  ;;  %6540 = vst [vmem:[#allocation23_spill] sm:$0xff] %v5588_v31  ;;  %v1458_v52 = vsel %vm1346_vm4, %v5588_v31, -inf }
 0x2f4   :  { %1456 = vmax.xlane.f32.xlu1 %v1455_v54  ;;  %v1440_v54 = vsel %vm1346_vm4, %v5574_v20, -inf  ;;  %6539 = vst [vmem:[#allocation22_spill] sm:$0xff] %v5585_v28  ;;  %v1541_v9 = vsub.f32 %v5289_v44, %v1355_v33 }
 0x2f7   :  { %1432 = vmax.xlane.f32.xlu0 %v1431_v15  ;;  %v1349_v15 = vpop.xlane.xlu0 %1348 }
 0x2f8   :  { %1465 = vmax.xlane.f32.xlu1 %v1464_v62  ;;  %v5592_v62 = vpop.permute.xlu1 %2404  ;;  %v1539_v28 = vsub.f32 %v5293_v13, %v1349_v15 }
 0x2f9   :  { %6541 = vst [vmem:[#allocation24_spill] sm:$0xff] %v5592_v62 }
 0x2fb   :  { %1441 = vmax.xlane.f32.xlu0 %v1440_v54  ;;  %v1358_v3 = vpop.xlane.xlu0 %1357 }
 0x2fc   :  { %v5596_v20 = vpop.permute.xlu1 %2493  ;;  %v1542_v0 = vsub.f32 %v5307_v57, %v1358_v3 }
 0x2fe   :  { %v1609_v21 = vmul.f32 1.442695, %v1542_v0 }
 0x2ff   :  { %1435 = vmax.xlane.f32.xlu0 %v1434_v12  ;;  %v1370_v54 = vpop.xlane.xlu0 %1369  ;;  %v1603_v12 = vmul.f32 1.442695, %v1539_v28 }
 0x300   :  { %v5599_v58 = vpop.permute.xlu1 %2582 }
 0x301   :  { %6542 = vst [vmem:[#allocation25_spill] sm:$0xff] %v5599_v58  ;;  %4337 = vpow2.f32 %v1603_v12 }
 0x302   :  { %4339 = vpow2.f32 %v1609_v21 }
 0x303   :  { %1459 = vmax.xlane.f32.xlu0 %v1458_v52  ;;  %v1364_v62 = vpop.xlane.xlu0 %1363  ;;  %v1607_v52 = vmul.f32 1.442695, %v1541_v9  ;;  %v1546_v9 = vsub.f32 %v5328_v27, %v1370_v54 }
 0x304   :  { %v1544_v58 = vsub.f32 %v5333_v1, %v1364_v62 }
 0x305   :  { %v1617_v0 = vmul.f32 1.442695, %v1546_v9 }
 0x311   :  { %v1352_v61 = vpop.xlane.xlu1 %1351 }
 0x312   :  { %v1540_v8 = vsub.f32 %v5366_v60, %v1352_v61  ;;  %v4035_v31 = vpop.f32.mrf.mxu0 }
 0x313   :  { %v5605_v51 = vadd.f32 %v4035_v31, %v5281_v30 }
 0x314   :  { %v1605_v13 = vmul.f32 1.442695, %v1540_v8  ;;  %v1113_v15 = vpop.f32.mrf.mxu0  ;;  %v1613_v8 = vmul.f32 1.442695, %v1544_v58  ;;  %v5626_v58 = vpop.eup %4337 }
 0x315   :  { %v5609_v57 = vadd.f32 %v1113_v15, %v5286_v37  ;;  %v1367_v44 = vpop.xlane.xlu1 %1366  ;;  %v1473_v3 = vsel %vm1346_vm4, %v5605_v51, -inf }
 0x316   :  { %4341 = vpow2.f32 %v1605_v13  ;;  %v1545_v60 = vsub.f32 %v5378_v53, %v1367_v44  ;;  %v4036_v61 = vpop.f32.mrf.mxu0  ;;  %1474 = vmax.xlane.f32.xlu0 %v1473_v3 }
 0x317   :  { %4343 = vpow2.f32 %v1607_v52  ;;  %v5616_v21 = vadd.f32 %v4036_v61, %v5301_v41  ;;  %v1467_v1 = vsel %vm1346_vm4, %v5609_v57, -inf  ;;  %v5630_v52 = vpop.eup %4339 }
 0x318   :  { %v1615_v31 = vmul.f32 1.442695, %v1545_v60  ;;  %v1116_v28 = vpop.f32.mrf.mxu0  ;;  %4345 = vpow2.f32 %v1613_v8  ;;  %6543 = vst [vmem:[#allocation26_spill] sm:$0xff] %v5630_v52 }
 0x319   :  { %v5622_v53 = vadd.f32 %v1116_v28, %v5358_v49  ;;  %v1476_v27 = vsel %vm1346_vm4, %v5616_v21, -inf }
 0x31a   :  { %v1361_v33 = vpop.xlane.xlu1 %1360  ;;  %1468 = vmax.xlane.f32.xlu0 %v1467_v1  ;;  %4347 = vpow2.f32 %v1615_v31 }
 0x31b   :  { %v1543_v62 = vsub.f32 %v5390_v45, %v1361_v33  ;;  %v1470_v54 = vsel %vm1346_vm4, %v5622_v53, -inf }
 0x31d   :  { %v1611_v12 = vmul.f32 1.442695, %v1543_v62 }
 0x31e   :  { %1477 = vmax.xlane.f32.xlu0 %v1476_v27 }
 0x31f   :  { %4349 = vpow2.f32 %v1611_v12 }
 0x320   :  { %4351 = vpow2.f32 %v1617_v0 }
 0x322   :  { %1471 = vmax.xlane.f32.xlu0 %v1470_v54 }
 0x323   :  { %v5632_v45 = vpop.eup %4341 }
 0x324   :  { %v5634_v13 = vpop.eup %4343  ;;  %v1923_v15 = vpack.c.bf16 %v5632_v45, %v5626_v58 }
 0x325   :  { %v1924_v44 = vpack.c.bf16 %v5630_v52, %v5634_v13  ;;  %v5644_v3 = vpop.eup %4345 }
 0x326   :  { %4081 = vmatprep.mubr.msk.bf16.mxu1 %vm1346_vm4, %v1923_v15  ;;  %6544 = vst [vmem:[#allocation27_spill] sm:$0xff] %v5644_v3 }
 0x327   :  { %4082 = vmatmul.mubr.msk.bf16.vlgmr.msra.gmra.mxu1 %vm1346_vm4, %v1924_v44  ;;  %v5646_v60 = vpop.eup %4347 }
 0x328   :  { %4106 = vmatpush3.bf16.msra.mxu1 %v5394_v40 }
 0x329   :  { %4107 = vmatprep.subr.bf16.mxu1 %v5495_v5 }
 0x32c   :  { %v5648_v61 = vpop.eup %4349  ;;  %4108 = vmatpush3.bf16.msra.mxu1 %v5495_v5 }
 0x32d   :  { %v5651_v9 = vpop.eup %4351  ;;  %4109 = vmatprep.subr.bf16.mxu1 %v5412_v43  ;;  %v1925_v8 = vpack.c.bf16 %v5644_v3, %v5648_v61 }
 0x32e   :  { %6545 = vst [vmem:[#allocation28_spill] sm:$0xff] %v5651_v9  ;;  %v1926_v40 = vpack.c.bf16 %v5651_v9, %v5646_v60 }
 0x32f   :  { %4085 = vmatprep.mubr.msk.bf16.mxu1 %vm1346_vm4, %v1925_v8 }
 0x330   :  { %4086 = vmatmul.mubr.msk.bf16.gmra.mxu1 %vm1346_vm4, %v1926_v40 }
 0x331   :  { %4110 = vmatpush3.bf16.msra.mxu1 %v5412_v43  ;;  %v4039_v43 = vpop.f32.mrf.mxu0 }
 0x332   :  { %4111 = vmatprep.subr.bf16.mxu1 %v5519_v48  ;;  %v5681_v15 = vadd.f32 %v4039_v43, %v5371_v46 }
 0x333   :  { %v1129_v44 = vpop.f32.mrf.mxu0 }
 0x334   :  { %6550 = vst [vmem:[#allocation33_spill] sm:$0xff] %v5681_v15  ;;  %v1485_v43 = vsel %vm1346_vm4, %v5681_v15, -inf }
 0x335   :  { %4112 = vmatpush3.bf16.msra.mxu1 %v5519_v48 }
 0x336   :  { %4137 = vmatprep.subr.bf16.mxu1 %v5459_v63  ;;  %v1379_v40 = vpop.xlane.xlu1 %1378 }
 0x33e   :  { %v4051_v5 = vpop.f32.mrf.mxu1 }
 0x33f   :  { %v5665_v1 = vadd.f32 %v4051_v5, %v5281_v30 }
 0x340   :  { %v1214_v31 = vpop.f32.mrf.mxu1 }
 0x341   :  { %6546 = vst [vmem:[#allocation29_spill] sm:$0xff] %v5665_v1  ;;  %v5668_v28 = vadd.f32 %v1214_v31, %v5286_v37  ;;  %v1497_v33 = vsel %vm1346_vm4, %v5665_v1, -inf }
 0x342   :  { %v4052_v62 = vpop.f32.mrf.mxu1  ;;  %1498 = vmax.xlane.f32.xlu1 %v1497_v33 }
 0x343   :  { %6547 = vst [vmem:[#allocation30_spill] sm:$0xff] %v5668_v28  ;;  %v5673_v12 = vadd.f32 %v4052_v62, %v5301_v41  ;;  %v1491_v27 = vsel %vm1346_vm4, %v5668_v28, -inf  ;;  %v5691_v62 = vadd.f32 %v1129_v44, %v5383_v50 }
 0x344   :  { %v1217_v0 = vpop.f32.mrf.mxu1 }
 0x345   :  { %6548 = vst [vmem:[#allocation31_spill] sm:$0xff] %v5673_v12  ;;  %v5676_v48 = vadd.f32 %v1217_v0, %v5358_v49  ;;  %v1500_v31 = vsel %vm1346_vm4, %v5673_v12, -inf  ;;  %6552 = vst [vmem:[#allocation35_spill] sm:$0xff] %v5691_v62  ;;  %v4040_v0 = vpop.f32.mrf.mxu0  ;;  %v1479_v15 = vsel %vm1346_vm4, %v5691_v62, -inf }
 0x346   :  { %v4055_v54 = vpop.f32.mrf.mxu1  ;;  %1492 = vmax.xlane.f32.xlu1 %v1491_v27  ;;  %v1382_v27 = vpop.xlane.xlu0 %1381 }
 0x347   :  { %6549 = vst [vmem:[#allocation32_spill] sm:$0xff] %v5676_v48  ;;  %v1494_v8 = vsel %vm1346_vm4, %v5676_v48, -inf  ;;  %v5686_v5 = vadd.f32 %v4055_v54, %v5371_v46  ;;  %v1132_v44 = vpop.f32.mrf.mxu0  ;;  %v1550_v12 = vsub.f32 %v5406_v59, %v1382_v27 }
 0x348   :  { %1495 = vmax.xlane.f32.xlu0 %v1494_v8  ;;  %v1230_v33 = vpop.f32.mrf.mxu1 }
 0x349   :  { %6551 = vst [vmem:[#allocation34_spill] sm:$0xff] %v5686_v5  ;;  %v5696_v8 = vadd.f32 %v1230_v33, %v5383_v50  ;;  %v1509_v54 = vsel %vm1346_vm4, %v5686_v5, -inf  ;;  %v1625_v59 = vmul.f32 1.442695, %v1550_v12  ;;  %v4067_v12 = vpop.f32.mrf.mxu0 }
 0x34a   :  { %1501 = vmax.xlane.f32.xlu1 %v1500_v31  ;;  %v4056_v28 = vpop.f32.mrf.mxu1  ;;  %v5701_v31 = vadd.f32 %v4040_v0, %v5320_v56  ;;  %v1549_v0 = vsub.f32 %v5401_v38, %v1379_v40 }
 0x34b   :  { %6553 = vst [vmem:[#allocation36_spill] sm:$0xff] %v5696_v8  ;;  %v5707_v33 = vadd.f32 %v4056_v28, %v5320_v56  ;;  %v1503_v5 = vsel %vm1346_vm4, %v5696_v8, -inf  ;;  %4353 = vpow2.f32 %v1625_v59 }
 0x34c   :  { %1486 = vmax.xlane.f32.xlu0 %v1485_v43  ;;  %v1403_v48 = vpop.xlane.xlu1 %1402  ;;  %v1233_v28 = vpop.f32.mrf.mxu1  ;;  %v1623_v38 = vmul.f32 1.442695, %v1549_v0 }
 0x34e   :  { %1510 = vmax.xlane.f32.xlu1 %v1509_v54  ;;  %v5712_v54 = vadd.f32 %v1132_v44, %v5325_v18  ;;  %v1512_v44 = vsel %vm1346_vm4, %v5707_v33, -inf }
 0x350   :  { %1480 = vmax.xlane.f32.xlu0 %v1479_v15  ;;  %v1406_v43 = vpop.xlane.xlu0 %1405  ;;  %v1373_v1 = vpop.xlane.xlu1 %1372  ;;  %v1488_v15 = vsel %vm1346_vm4, %v5701_v31, -inf }
 0x351   :  { %v1547_v9 = vsub.f32 %v5418_v23, %v1373_v1  ;;  %v1558_v27 = vsub.f32 %v5425_v4, %v1406_v43  ;;  %v1557_v23 = vsub.f32 %v5415_v24, %v1403_v48  ;;  %v1482_v4 = vsel %vm1346_vm4, %v5712_v54, -inf  ;;  %v1315_v48 = vpop.f32.mrf.mxu0 }
 0x352   :  { %1504 = vmax.xlane.f32.xlu1 %v1503_v5 }
 0x353   :  { %v1619_v62 = vmul.f32 1.442695, %v1547_v9  ;;  %v5727_v9 = vadd.f32 %v1233_v28, %v5325_v18  ;;  %v1641_v40 = vmul.f32 1.442695, %v1558_v27 }
 0x354   :  { %1489 = vmax.xlane.f32.xlu0 %v1488_v15  ;;  %v1376_v3 = vpop.xlane.xlu0 %1375  ;;  %v1397_v52 = vpop.xlane.xlu1 %1396 }
 0x355   :  { %v1548_v8 = vsub.f32 %v5428_v34, %v1376_v3  ;;  %v1555_v1 = vsub.f32 %v5431_v36, %v1397_v52  ;;  %4355 = vpow2.f32 %v1619_v62  ;;  %v1639_v36 = vmul.f32 1.442695, %v1557_v23  ;;  %v4068_v15 = vpop.f32.mrf.mxu0 }
 0x356   :  { %1513 = vmax.xlane.f32.xlu1 %v1512_v44  ;;  %v5731_v52 = vadd.f32 %v4067_v12, %v5281_v30  ;;  %v1506_v59 = vsel %vm1346_vm4, %v5727_v9, -inf }
 0x357   :  { %v1621_v5 = vmul.f32 1.442695, %v1548_v8  ;;  %v1635_v34 = vmul.f32 1.442695, %v1555_v1  ;;  %v1318_v12 = vpop.f32.mrf.mxu0 }
 0x358   :  { %1483 = vmax.xlane.f32.xlu0 %v1482_v4  ;;  %v1400_v3 = vpop.xlane.xlu0 %1399  ;;  %v1391_v43 = vpop.xlane.xlu1 %1390  ;;  %v1521_v28 = vsel %vm1346_vm4, %v5731_v52, -inf }
 0x359   :  { %4357 = vpow2.f32 %v1621_v5  ;;  %v1556_v24 = vsub.f32 %v5443_v14, %v1400_v3  ;;  %v5737_v14 = vadd.f32 %v1315_v48, %v5286_v37  ;;  %v1553_v30 = vsub.f32 %v5440_v6, %v1391_v43  ;;  %v5749_v5 = vpop.eup %4353 }
 0x35a   :  { %4359 = vpow2.f32 %v1623_v38 }
 0x35b   :  { %4361 = vpow2.f32 %v1641_v40  ;;  %v1637_v0 = vmul.f32 1.442695, %v1556_v24  ;;  %v1631_v37 = vmul.f32 1.442695, %v1553_v30  ;;  %v1515_v6 = vsel %vm1346_vm4, %v5737_v14, -inf }
 0x35c   :  { %4363 = vpow2.f32 %v1635_v34  ;;  %1507 = vmax.xlane.f32.xlu0 %v1506_v59  ;;  %v1394_v62 = vpop.xlane.xlu0 %1393  ;;  %v1415_v8 = vpop.xlane.xlu1 %1414 }
 0x35d   :  { %4365 = vpow2.f32 %v1637_v0  ;;  %v1554_v27 = vsub.f32 %v5450_v55, %v1394_v62  ;;  %v5745_v55 = vadd.f32 %v4068_v15, %v5301_v41 }
 0x35e   :  { %4367 = vpow2.f32 %v1639_v36  ;;  %v5758_v36 = vadd.f32 %v1318_v12, %v5358_v49 }
 0x35f   :  { %v1633_v44 = vmul.f32 1.442695, %v1554_v27 }
 0x360   :  { %1522 = vmax.xlane.f32.xlu0 %v1521_v28  ;;  %v1388_v38 = vpop.xlane.xlu0 %1387  ;;  %v1385_v23 = vpop.xlane.xlu1 %1384 }
 0x361   :  { %v1552_v1 = vsub.f32 %v5465_v35, %v1388_v38  ;;  %v1551_v4 = vsub.f32 %v5462_v11, %v1385_v23  ;;  %4369 = vpow2.f32 %v1633_v44  ;;  %v1561_v35 = vsub.f32 %v5453_v16, %v1415_v8  ;;  %v4071_v8 = vpop.f32.mrf.mxu0 }
 0x362   :  { %v5751_v43 = vpop.eup %4355  ;;  %v1524_v16 = vsel %vm1346_vm4, %v5745_v55, -inf  ;;  %v1518_v23 = vsel %vm1346_vm4, %v5758_v36, -inf }
 0x363   :  { %v1629_v40 = vmul.f32 1.442695, %v1552_v1  ;;  %v1627_v34 = vmul.f32 1.442695, %v1551_v4  ;;  %v1647_v30 = vmul.f32 1.442695, %v1561_v35  ;;  %v5788_v4 = vadd.f32 %v4071_v8, %v5371_v46  ;;  %v1331_v12 = vpop.f32.mrf.mxu0 }
 0x364   :  { %1516 = vmax.xlane.f32.xlu0 %v1515_v6  ;;  %v1412_v3 = vpop.xlane.xlu0 %1411  ;;  %v1409_v11 = vpop.xlane.xlu1 %1408  ;;  %v5801_v6 = vadd.f32 %v1331_v12, %v5383_v50  ;;  %v6555_v8 = vld [vmem:[#allocation2_spill] sm:$0xff] }
 0x365   :  { %4371 = vpow2.f32 %v1629_v40  ;;  %v1560_v41 = vsub.f32 %v5475_v25, %v1412_v3  ;;  %v1559_v48 = vsub.f32 %v5472_v2, %v1409_v11  ;;  %v1533_v3 = vsel %vm1346_vm4, %v5788_v4, -inf }
 0x366   :  { %v5755_v24 = vpop.eup %4357  ;;  %4373 = vpow2.f32 %v1627_v34  ;;  %v4072_v34 = vpop.f32.mrf.mxu0 }
 0x367   :  { %v5761_v0 = vpop.eup %4359  ;;  %4375 = vpow2.f32 %v1631_v37  ;;  %v1645_v59 = vmul.f32 1.442695, %v1560_v41  ;;  %2578 = vrot.lane.b32.xlu1 %v5154_v10, %s4597_s16  ;;  %v1927_v25 = vpack.c.bf16 %v5755_v24, %v5751_v43  ;;  %v1643_v2 = vmul.f32 1.442695, %v1559_v48 }
 0x368   :  { %v5769_v62 = vpop.eup %4361  ;;  %v1928_v49 = vpack.c.bf16 %v5749_v5, %v5761_v0  ;;  %1525 = vmax.xlane.f32.xlu0 %v1524_v16  ;;  %v1427_v27 = vpop.xlane.xlu0 %1426 }
 0x369   :  { %v5773_v15 = vpop.eup %4363  ;;  %4377 = vpow2.f32 %v1645_v59  ;;  %v1418_v10 = vpop.xlane.xlu1 %1417  ;;  %4097 = vmatprep.mubr.msk.bf16.mxu0 %vm1346_vm4, %v1927_v25  ;;  %v1565_v50 = vsub.f32 %v5484_v39, %v1427_v27  ;;  %v5821_v25 = vadd.f32 %v4072_v34, %v5320_v56  ;;  %v1527_v39 = vsel %vm1346_vm4, %v5801_v6, -inf }
 0x36a   :  { %v5776_v28 = vpop.eup %4365  ;;  %4379 = vpow2.f32 %v1643_v2  ;;  %v1562_v44 = vsub.f32 %v5487_v26, %v1418_v10  ;;  %4098 = vmatmul.mubr.msk.bf16.vlgmr.msra.gmra.mxu0 %vm1346_vm4, %v1928_v49  ;;  %v1334_v49 = vpop.f32.mrf.mxu0 }
 0x36b   :  { %v5780_v38 = vpop.eup %4367  ;;  %4122 = vmatpush3.bf16.msra.mxu0 %v5397_v32  ;;  %v1931_v1 = vpack.c.bf16 %v5776_v28, %v5773_v15  ;;  %4381 = vpow2.f32 %v1647_v30  ;;  %6554 = vst [vmem:[#allocation37_spill] sm:$0xff] %v5821_v25  ;;  %v1655_v10 = vmul.f32 1.442695, %v1565_v50  ;;  %v6562_v50 = vld [vmem:[#allocation5_spill] sm:$0xff] }
 0x36c   :  { %v1932_v37 = vpack.c.bf16 %v5769_v62, %v5780_v38  ;;  %v1649_v26 = vmul.f32 1.442695, %v1562_v44  ;;  %4123 = vmatprep.subr.bf16.mxu0 %v5410_v29  ;;  %1519 = vmax.xlane.f32.xlu0 %v1518_v23  ;;  %v1421_v40 = vpop.xlane.xlu0 %1420  ;;  %v6557_v44 = vld [vmem:[#allocation3_spill] sm:$0xff] }
 0x36d   :  { %v5793_v32 = vpop.xlane.xlu1 %1450  ;;  %4113 = vmatprep.mubr.msk.bf16.mxu1 %vm1346_vm4, %v1931_v1  ;;  %v1563_v46 = vsub.f32 %v5498_v19, %v1421_v40  ;;  %v6558_v1 = vld [vmem:[#allocation8_spill] sm:$0xff] }
 0x36e   :  { %4383 = vpow2.f32 %v1649_v26  ;;  %4114 = vmatmul.mubr.msk.bf16.vlgmr.msra.gmra.mxu1 %vm1346_vm4, %v1932_v37  ;;  %v5807_v11 = vpop.eup %4369  ;;  %v1573_v23 = vsub.f32 %v6557_v44, %v5793_v32  ;;  %v5841_v26 = vadd.f32 %v1334_v49, %v5325_v18  ;;  %v6560_v32 = vld [vmem:[#allocation15_spill] sm:$0xff] }
 0x36f   :  { %4124 = vmatpush3.bf16.msra.mxu0 %v5410_v29  ;;  %4138 = vmatpush3.bf16.msra.mxu1 %v5459_v63  ;;  %v1651_v48 = vmul.f32 1.442695, %v1563_v46 }
 0x370   :  { %4125 = vmatprep.subr.bf16.mxu0 %v5422_v17  ;;  %4139 = vmatprep.subr.bf16.mxu1 %v5533_v7  ;;  %v1430_v35 = vpop.xlane.xlu0 %1429  ;;  %6559 = vst [vmem:[#allocation2_spill] sm:$0xff] %v5841_v26 }
 0x371   :  { %v1445_v41 = vpop.xlane.xlu1 %1444  ;;  %1534 = vmax.xlane.f32.xlu0 %v1533_v3  ;;  %v1566_v29 = vsub.f32 %v5508_v47, %v1430_v35  ;;  %4385 = vpow2.f32 %v1651_v48  ;;  %v1536_v3 = vsel %vm1346_vm4, %v5821_v25, -inf }
 0x372   :  { %v5810_v19 = vpop.eup %4371  ;;  %v1571_v59 = vsub.f32 %v5515_v42, %v1445_v41  ;;  %v6561_v41 = vld [vmem:[#allocation4_spill] sm:$0xff] }
 0x373   :  { %v5813_v63 = vpop.eup %4373  ;;  %4126 = vmatpush3.bf16.msra.mxu0 %v5422_v17  ;;  %4140 = vmatpush3.bf16.msra.mxu1 %v5533_v7  ;;  %v1657_v47 = vmul.f32 1.442695, %v1566_v29  ;;  %v6556_v7 = vld [vmem:[#allocation7_spill] sm:$0xff] }
 0x374   :  { %v5818_v16 = vpop.eup %4375  ;;  %4127 = vmatprep.subr.bf16.mxu0 %v5437_v22  ;;  %4141 = vmatprep.subr.bf16.mxu1 %v6555_v8  ;;  %v1424_v2 = vpop.xlane.xlu0 %1423  ;;  %v1929_v17 = vpack.c.bf16 %v5810_v19, %v5813_v63  ;;  %v1667_v40 = vmul.f32 1.442695, %v1571_v59 }
 0x375   :  { %v1454_v42 = vpop.xlane.xlu1 %1453  ;;  %1528 = vmax.xlane.f32.xlu0 %v1527_v39  ;;  %v1564_v27 = vsub.f32 %v6556_v7, %v1424_v2  ;;  %v1930_v56 = vpack.c.bf16 %v5807_v11, %v5818_v16  ;;  %4387 = vpow2.f32 %v1657_v47  ;;  %v1530_v39 = vsel %vm1346_vm4, %v5841_v26, -inf }
 0x376   :  { %v5832_v30 = vpop.eup %4377  ;;  %v1574_v12 = vsub.f32 %v6558_v1, %v1454_v42  ;;  %4101 = vmatprep.mubr.msk.bf16.mxu0 %vm1346_vm4, %v1929_v17  ;;  %v1734_v26 = vsel %vm1346_vm4, %v5632_v45, 0.0  ;;  %v6572_v45 = vld [vmem:[#allocation23_spill] sm:$0xff] }
 0x377   :  { %v5838_v37 = vpop.eup %4379  ;;  %v1653_v46 = vmul.f32 1.442695, %v1564_v27  ;;  %4102 = vmatmul.mubr.msk.bf16.gmra.mxu0 %vm1346_vm4, %v1930_v56  ;;  %4142 = vmatpush3.bf16.msra.mxu1 %v6555_v8  ;;  %v6563_v8 = vld [vmem:[#allocation9_spill] sm:$0xff] }
 0x378   :  { %v1673_v34 = vmul.f32 1.442695, %v1574_v12  ;;  %4128 = vmatpush3.bf16.msra.mxu0 %v5437_v22  ;;  %4143 = vmatprep.subr.bf16.mxu1 %v6560_v32  ;;  %v1448_v35 = vpop.xlane.xlu0 %1447  ;;  %v1933_v18 = vpack.c.bf16 %v5832_v30, %v5838_v37  ;;  %v5853_v59 = vpop.eup %4381  ;;  %v1671_v22 = vmul.f32 1.442695, %v1573_v23  ;;  %v6564_v27 = vld [vmem:[#allocation13_spill] sm:$0xff]  ;;  %v6565_v12 = vld [vmem:[#allocation20_spill] sm:$0xff] }
 0x379   :  { %4389 = vpow2.f32 %v1653_v46  ;;  %4153 = vmatprep.subr.bf16.mxu0 %v6561_v41  ;;  %v1463_v29 = vpop.xlane.xlu1 %1462  ;;  %1537 = vmax.xlane.f32.xlu0 %v1536_v3  ;;  %v1572_v48 = vsub.f32 %v6562_v50, %v1448_v35  ;;  %v6567_v35 = vld [vmem:[#allocation18_spill] sm:$0xff] }
 0x37a   :  { %4391 = vpow2.f32 %v1655_v10  ;;  %4117 = vmatprep.mubr.msk.bf16.mxu1 %vm1346_vm4, %v1933_v18 }
 0x37b   :  { %v5856_v49 = vpop.eup %4383  ;;  %4393 = vpow2.f32 %v1667_v40  ;;  %v1669_v47 = vmul.f32 1.442695, %v1572_v48  ;;  %4144 = vmatpush3.bf16.msra.mxu1 %v6560_v32 }
 0x37c   :  { %4395 = vpow2.f32 %v1673_v34  ;;  %4169 = vmatprep.subr.bf16.mxu1 %v6563_v8  ;;  %v1439_v2 = vpop.xlane.xlu0 %1438  ;;  %v1934_v17 = vpack.c.bf16 %v5856_v49, %v5853_v59  ;;  %v6566_v34 = vld [vmem:[#allocation17_spill] sm:$0xff] }
 0x37d   :  { %4397 = vpow2.f32 %v1669_v47  ;;  %1531 = vmax.xlane.f32.xlu0 %v1530_v39  ;;  %v1457_v42 = vpop.xlane.xlu1 %1456  ;;  %v1569_v32 = vsub.f32 %v6566_v34, %v1439_v2  ;;  %v6568_v39 = vld [vmem:[#allocation10_spill] sm:$0xff]  ;;  %v6569_v2 = vld [vmem:[#allocation21_spill] sm:$0xff] }
 0x37e   :  { %4399 = vpow2.f32 %v1671_v22  ;;  %4118 = vmatmul.mubr.msk.bf16.gmra.mxu1 %vm1346_vm4, %v1934_v17  ;;  %v5866_v10 = vpop.eup %4385  ;;  %v1575_v18 = vsub.f32 %v6567_v35, %v1457_v42 }
 0x37f   :  { %v1663_v35 = vmul.f32 1.442695, %v1569_v32 }
 0x380   :  { %v1433_v7 = vpop.xlane.xlu0 %1432 }
 0x381   :  { %v1567_v56 = vsub.f32 %v6564_v27, %v1433_v7  ;;  %v1466_v1 = vpop.xlane.xlu1 %1465 }
 0x382   :  { %v5868_v23 = vpop.eup %4387  ;;  %v1578_v17 = vsub.f32 %v6568_v39, %v1466_v1  ;;  %v1675_v1 = vmul.f32 1.442695, %v1575_v18 }
 0x383   :  { %v1659_v50 = vmul.f32 1.442695, %v1567_v56  ;;  %v6570_v56 = vld [vmem:[#allocation6_spill] sm:$0xff] }
 0x384   :  { %v1442_v44 = vpop.xlane.xlu0 %1441  ;;  %v1577_v34 = vsub.f32 %v6570_v56, %v1463_v29  ;;  %v1681_v32 = vmul.f32 1.442695, %v1578_v17  ;;  %v6574_v17 = vld [vmem:[#allocation19_spill] sm:$0xff] }
 0x385   :  { %v1570_v40 = vsub.f32 %v6565_v12, %v1442_v44  ;;  %4401 = vpow2.f32 %v1659_v50  ;;  %v6573_v50 = vld [vmem:[#allocation11_spill] sm:$0xff] }
 0x386   :  { %v5871_v46 = vpop.eup %4389  ;;  %v1679_v18 = vmul.f32 1.442695, %v1577_v34 }
 0x387   :  { %v5874_v3 = vpop.eup %4391  ;;  %v1935_v48 = vpack.c.bf16 %v5871_v46, %v5866_v10  ;;  %v1665_v7 = vmul.f32 1.442695, %v1570_v40 }
 0x388   :  { %v5879_v22 = vpop.eup %4393  ;;  %v1936_v47 = vpack.c.bf16 %v5868_v23, %v5874_v3  ;;  %v1436_v27 = vpop.xlane.xlu0 %1435 }
 0x389   :  { %v5884_v44 = vpop.eup %4395  ;;  %v1568_v12 = vsub.f32 %v6569_v2, %v1436_v27  ;;  %4129 = vmatprep.mubr.msk.bf16.mxu0 %vm1346_vm4, %v1935_v48  ;;  %4403 = vpow2.f32 %v1665_v7  ;;  %v1749_v7 = vsel %vm1346_vm4, %v5646_v60, 0.0  ;;  %v1761_v2 = vsel %vm1346_vm4, %v5761_v0, 0.0  ;;  %v6577_v60 = vld [vmem:[#allocation16_spill] sm:$0xff] }
 0x38a   :  { %v5888_v42 = vpop.eup %4397  ;;  %4130 = vmatmul.mubr.msk.bf16.vlgmr.msra.gmra.mxu0 %vm1346_vm4, %v1936_v47  ;;  %v6571_v47 = vld [vmem:[#allocation24_spill] sm:$0xff] }
 0x38b   :  { %v5894_v25 = vpop.eup %4399  ;;  %v1661_v40 = vmul.f32 1.442695, %v1568_v12  ;;  %4154 = vmatpush3.bf16.msra.mxu0 %v6561_v41  ;;  %1735 = vadd.xlane.f32.xlu1 %v1734_v26  ;;  %v1939_v48 = vpack.c.bf16 %v5888_v42, %v5879_v22  ;;  %v1743_v41 = vsel %vm1346_vm4, %v5648_v61, 0.0  ;;  %v6575_v61 = vld [vmem:[#allocation14_spill] sm:$0xff] }
 0x38c   :  { %v1940_v29 = vpack.c.bf16 %v5884_v44, %v5894_v25  ;;  %4155 = vmatprep.subr.bf16.mxu0 %v6571_v47  ;;  %v1460_v39 = vpop.xlane.xlu0 %1459 }
 0x38d   :  { %4405 = vpow2.f32 %v1661_v40  ;;  %v1576_v27 = vsub.f32 %v6572_v45, %v1460_v39  ;;  %4145 = vmatprep.mubr.msk.bf16.mxu1 %vm1346_vm4, %v1939_v48 }
 0x38e   :  { %4407 = vpow2.f32 %v1663_v35  ;;  %4146 = vmatmul.mubr.msk.bf16.vlgmr.msra.gmra.mxu1 %vm1346_vm4, %v1940_v29  ;;  %v1785_v35 = vsel %vm1346_vm4, %v5780_v38, 0.0  ;;  %v1755_v38 = vsel %vm1346_vm4, %v5751_v43, 0.0  ;;  %v1773_v43 = vsel %vm1346_vm4, %v5818_v16, 0.0 }
 0x38f   :  { %4409 = vpow2.f32 %v1675_v1  ;;  %v1677_v26 = vmul.f32 1.442695, %v1576_v27  ;;  %4156 = vmatpush3.bf16.msra.mxu0 %v6571_v47  ;;  %4170 = vmatpush3.bf16.msra.mxu1 %v6563_v8  ;;  %v6576_v8 = vld [vmem:[#allocation12_spill] sm:$0xff]  ;;  %v1779_v27 = vsel %vm1346_vm4, %v5773_v15, 0.0  ;;  %v1767_v16 = vsel %vm1346_vm4, %v5813_v63, 0.0  ;;  %v6578_v63 = vld [vmem:[#allocation26_spill] sm:$0xff] }
 0x390   :  { %4411 = vpow2.f32 %v1681_v32  ;;  %1744 = vadd.xlane.f32.xlu1 %v1743_v41  ;;  %4157 = vmatprep.subr.bf16.mxu0 %v6573_v50 }
 0x391   :  { %4413 = vpow2.f32 %v1677_v26  ;;  %4171 = vmatprep.subr.bf16.mxu1 %v5596_v20 }
 0x392   :  { %4415 = vpow2.f32 %v1679_v18  ;;  %v5922_v12 = vpop.eup %4401 }
 0x393   :  { %2489 = vrot.lane.b32.xlu0 %v6574_v17, %s4597_s16  ;;  %4158 = vmatpush3.bf16.msra.mxu0 %v6573_v50 }
 0x394   :  { %4172 = vmatpush3.bf16.msra.mxu1 %v5596_v20  ;;  %1750 = vadd.xlane.f32.xlu1 %v1749_v7 }
 0x395   :  { %4159 = vmatprep.subr.bf16.mxu0 %v6575_v61  ;;  %4173 = vmatprep.subr.bf16.mxu1 %v6576_v8 }
 0x396   :  { %v5925_v56 = vpop.eup %4403 }
 0x397   :  { %4160 = vmatpush3.bf16.msra.mxu0 %v6575_v61 }
 0x398   :  { %4174 = vmatpush3.bf16.msra.mxu1 %v6576_v8  ;;  %1762 = vadd.xlane.f32.xlu1 %v1761_v2  ;;  %v1797_v8 = vsel %vm1346_vm4, %v5853_v59, 0.0  ;;  %v1809_v59 = vsel %vm1346_vm4, %v5874_v3, 0.0 }
 0x399   :  { %4185 = vmatprep.subr.bf16.mxu0 %v6577_v60 }
 0x39a   :  { %v5928_v20 = vpop.eup %4405 }
 0x39b   :  { %v5930_v34 = vpop.eup %4407  ;;  %v1937_v1 = vpack.c.bf16 %v5928_v20, %v5922_v12 }
 0x39c   :  { %v5936_v0 = vpop.eup %4409  ;;  %1786 = vadd.xlane.f32.xlu1 %v1785_v35  ;;  %v1938_v40 = vpack.c.bf16 %v5925_v56, %v5930_v34 }
 0x39d   :  { %v5940_v48 = vpop.eup %4411  ;;  %4133 = vmatprep.mubr.msk.bf16.mxu0 %vm1346_vm4, %v1937_v1  ;;  %v1740_v1 = vsel %vm1346_vm4, %v6578_v63, 0.0 }
 0x39e   :  { %v5943_v29 = vpop.eup %4413  ;;  %4134 = vmatmul.mubr.msk.bf16.gmra.mxu0 %vm1346_vm4, %v1938_v40 }
 0x39f   :  { %v5946_v32 = vpop.eup %4415  ;;  %v1475_v47 = vpop.xlane.xlu0 %1474  ;;  %v1941_v39 = vpack.c.bf16 %v5943_v29, %v5936_v0 }
 0x3a0   :  { %1756 = vadd.xlane.f32.xlu1 %v1755_v38  ;;  %v1942_v45 = vpack.c.bf16 %v5940_v48, %v5946_v32  ;;  %v1581_v17 = vsub.f32 %v5605_v51, %v1475_v47  ;;  %v1731_v51 = vsel %vm1346_vm4, %v5626_v58, 0.0  ;;  %v1833_v58 = vsel %vm1346_vm4, %v5894_v25, 0.0  ;;  %v6580_v25 = vld [vmem:[#allocation28_spill] sm:$0xff] }
 0x3a1   :  { %4149 = vmatprep.mubr.msk.bf16.mxu1 %vm1346_vm4, %v1941_v39 }
 0x3a2   :  { %4150 = vmatmul.mubr.msk.bf16.gmra.mxu1 %vm1346_vm4, %v1942_v45  ;;  %v1687_v35 = vmul.f32 1.442695, %v1581_v17  ;;  %v1845_v17 = vsel %vm1346_vm4, %v5946_v32, 0.0 }
 0x3a3   :  { %v1469_v18 = vpop.xlane.xlu0 %1468 }
 0x3a4   :  { %1780 = vadd.xlane.f32.xlu1 %v1779_v27  ;;  %v1579_v26 = vsub.f32 %v5609_v57, %v1469_v18  ;;  %v1803_v27 = vsel %vm1346_vm4, %v5866_v10, 0.0  ;;  %v1752_v18 = vsel %vm1346_vm4, %v6580_v25, 0.0  ;;  %v1764_v10 = vsel %vm1346_vm4, %v5749_v5, 0.0  ;;  %v6583_v5 = vld [vmem:[#allocation29_spill] sm:$0xff]  ;;  %v6588_v25 = vld [vmem:[#allocation36_spill] sm:$0xff] }
 0x3a6   :  { %v1683_v7 = vmul.f32 1.442695, %v1579_v26  ;;  %v6581_v26 = vld [vmem:[#allocation25_spill] sm:$0xff] }
 0x3a7   :  { %v1478_v41 = vpop.xlane.xlu0 %1477 }
 0x3a8   :  { %1774 = vadd.xlane.f32.xlu1 %v1773_v43  ;;  %v1582_v50 = vsub.f32 %v5616_v21, %v1478_v41  ;;  %4417 = vpow2.f32 %v1683_v7  ;;  %v1791_v21 = vsel %vm1346_vm4, %v5838_v37, 0.0  ;;  %v1827_v43 = vsel %vm1346_vm4, %v5879_v22, 0.0  ;;  %v6582_v41 = vld [vmem:[#allocation22_spill] sm:$0xff] }
 0x3aa   :  { %v1689_v61 = vmul.f32 1.442695, %v1582_v50  ;;  %v1821_v50 = vsel %vm1346_vm4, %v5930_v34, 0.0 }
 0x3ab   :  { %v1472_v2 = vpop.xlane.xlu0 %1471 }
 0x3ac   :  { %1798 = vadd.xlane.f32.xlu1 %v1797_v8  ;;  %v1580_v15 = vsub.f32 %v5622_v53, %v1472_v2  ;;  %4419 = vpow2.f32 %v1689_v61  ;;  %v1737_v53 = vsel %vm1346_vm4, %v5634_v13, 0.0  ;;  %v6579_v13 = vld [vmem:[#allocation27_spill] sm:$0xff]  ;;  %v1758_v61 = vsel %vm1346_vm4, %v5755_v24, 0.0 }
 0x3ad   :  { %v1746_v47 = vsel %vm1346_vm4, %v6579_v13, 0.0  ;;  %v1815_v2 = vsel %vm1346_vm4, %v5922_v12, 0.0  ;;  %v1839_v24 = vsel %vm1346_vm4, %v5936_v0, 0.0  ;;  %v1776_v12 = vsel %vm1346_vm4, %v5807_v11, 0.0 }
 0x3ae   :  { %v1685_v57 = vmul.f32 1.442695, %v1580_v15  ;;  %v1800_v0 = vsel %vm1346_vm4, %v5856_v49, 0.0 }
 0x3b0   :  { %4421 = vpow2.f32 %v1685_v57  ;;  %1768 = vadd.xlane.f32.xlu1 %v1767_v16  ;;  %v6585_v16 = vld [vmem:[#allocation32_spill] sm:$0xff] }
 0x3b1   :  { %4423 = vpow2.f32 %v1687_v35  ;;  %v1782_v35 = vsel %vm1346_vm4, %v5776_v28, 0.0  ;;  %v6586_v28 = vld [vmem:[#allocation33_spill] sm:$0xff] }
 0x3b2   :  { %1732 = vadd.xlane.f32.xlu0 %v1731_v51 }
 0x3b4   :  { %1792 = vadd.xlane.f32.xlu1 %v1791_v21 }
 0x3b5   :  { %v5978_v40 = vpop.eup %4417 }
 0x3b6   :  { %1738 = vadd.xlane.f32.xlu0 %v1737_v53 }
 0x3b8   :  { %1810 = vadd.xlane.f32.xlu1 %v1809_v59 }
 0x3b9   :  { %v5982_v38 = vpop.eup %4419 }
 0x3ba   :  { %1741 = vadd.xlane.f32.xlu0 %v1740_v1 }
 0x3bc   :  { %1834 = vadd.xlane.f32.xlu1 %v1833_v58 }
 0x3bd   :  { %v5984_v37 = vpop.eup %4421 }
 0x3be   :  { %v4424_v39 = vpop.eup %4423  ;;  %1747 = vadd.xlane.f32.xlu0 %v1746_v47  ;;  %v1943_v3 = vpack.c.bf16 %v5984_v37, %v5978_v40 }
 0x3bf   :  { %v1944_v45 = vpack.c.bf16 %v5982_v38, %v4424_v39  ;;  %v1857_v58 = vsel %vm1346_vm4, %v4424_v39, 0.0 }
 0x3c0   :  { %1804 = vadd.xlane.f32.xlu1 %v1803_v27  ;;  %4161 = vmatprep.mubr.msk.bf16.mxu0 %vm1346_vm4, %v1943_v3  ;;  %v6587_v3 = vld [vmem:[#allocation35_spill] sm:$0xff] }
 0x3c1   :  { %4162 = vmatmul.mubr.msk.bf16.vlgmr.msra.gmra.mxu0 %vm1346_vm4, %v1944_v45 }
 0x3c2   :  { %1753 = vadd.xlane.f32.xlu0 %v1752_v18  ;;  %4186 = vmatpush3.bf16.msra.mxu0 %v6577_v60  ;;  %v1788_v60 = vsel %vm1346_vm4, %v5769_v62, 0.0  ;;  %v6584_v62 = vld [vmem:[#allocation30_spill] sm:$0xff] }
 0x3c3   :  { %4187 = vmatprep.subr.bf16.mxu0 %v6581_v26 }
 0x3c4   :  { %1828 = vadd.xlane.f32.xlu1 %v1827_v43  ;;  %v1770_v43 = vsel %vm1346_vm4, %v5810_v19, 0.0 }
 0x3c6   :  { %1765 = vadd.xlane.f32.xlu0 %v1764_v10  ;;  %4188 = vmatpush3.bf16.msra.mxu0 %v6581_v26 }
 0x3c7   :  { %4189 = vmatprep.subr.bf16.mxu0 %v6582_v41 }
 0x3c8   :  { %1822 = vadd.xlane.f32.xlu1 %v1821_v50 }
 0x3ca   :  { %1789 = vadd.xlane.f32.xlu0 %v1788_v60  ;;  %4190 = vmatpush3.bf16.msra.mxu0 %v6582_v41 }
 0x3cb   :  { %v1499_v22 = vpop.xlane.xlu1 %1498 }
 0x3cc   :  { %v1589_v7 = vsub.f32 %v6583_v5, %v1499_v22  ;;  %1846 = vadd.xlane.f32.xlu1 %v1845_v17  ;;  %v1794_v22 = vsel %vm1346_vm4, %v5832_v30, 0.0  ;;  %v1812_v30 = vsel %vm1346_vm4, %v5868_v23, 0.0 }
 0x3ce   :  { %v1703_v8 = vmul.f32 1.442695, %v1589_v7  ;;  %1759 = vadd.xlane.f32.xlu0 %v1758_v61  ;;  %v1851_v7 = vsel %vm1346_vm4, %v5978_v40, 0.0 }
 0x3cf   :  { %v1493_v34 = vpop.xlane.xlu1 %1492 }
 0x3d0   :  { %4425 = vpow2.f32 %v1703_v8  ;;  %v1587_v15 = vsub.f32 %v6584_v62, %v1493_v34  ;;  %1816 = vadd.xlane.f32.xlu1 %v1815_v2  ;;  %v6059_v62 = vld [vmem:[%s6425_s3 + $0x4] sm:$0xf] }
 0x3d1   :  { %v1496_v32 = vpop.xlane.xlu0 %1495 }
 0x3d2   :  { %v1699_v57 = vmul.f32 1.442695, %v1587_v15  ;;  %1783 = vadd.xlane.f32.xlu0 %v1782_v35  ;;  %v1588_v51 = vsub.f32 %v6585_v16, %v1496_v32  ;;  %v1836_v15 = vsel %vm1346_vm4, %v5884_v44, 0.0  ;;  %v6589_v16 = vld [vmem:[#allocation34_spill] sm:$0xff] }
 0x3d3   :  { %v6021_v21 = vpop.xlane.xlu1 %1501 }
 0x3d4   :  { %v1701_v53 = vmul.f32 1.442695, %v1588_v51  ;;  %1840 = vadd.xlane.f32.xlu1 %v1839_v24  ;;  %4427 = vpow2.f32 %v1699_v57 }
 0x3d5   :  { %v1487_v59 = vpop.xlane.xlu0 %1486 }
 0x3d6   :  { %4429 = vpow2.f32 %v1701_v53  ;;  %1777 = vadd.xlane.f32.xlu0 %v1776_v12  ;;  %v1585_v63 = vsub.f32 %v6586_v28, %v1487_v59  ;;  %v1806_v53 = vsel %vm1346_vm4, %v5871_v46, 0.0 }
 0x3d7   :  { %v6028_v1 = vpop.xlane.xlu1 %1510 }
 0x3d8   :  { %v1695_v13 = vmul.f32 1.442695, %v1585_v63  ;;  %1858 = vadd.xlane.f32.xlu1 %v1857_v58  ;;  %v1593_v51 = vsub.f32 %v6589_v16, %v6028_v1  ;;  %v1830_v1 = vsel %vm1346_vm4, %v5888_v42, 0.0  ;;  %v1824_v42 = vsel %vm1346_vm4, %v5925_v56, 0.0 }
 0x3d9   :  { %v1481_v47 = vpop.xlane.xlu0 %1480 }
 0x3da   :  { %4431 = vpow2.f32 %v1695_v13  ;;  %1801 = vadd.xlane.f32.xlu0 %v1800_v0  ;;  %v1583_v45 = vsub.f32 %v6587_v3, %v1481_v47  ;;  %v1711_v58 = vmul.f32 1.442695, %v1593_v51  ;;  %v2929_v51 = vsel %vm2847_vm11, %v6059_v62, 0 }
 0x3db   :  { %v1505_v11 = vpop.xlane.xlu1 %1504 }
 0x3dc   :  { %v1691_v27 = vmul.f32 1.442695, %v1583_v45  ;;  %v1591_v18 = vsub.f32 %v6588_v25, %v1505_v11 }
 0x3dd   :  { %v6035_v26 = vpop.eup %4425  ;;  %v1490_v39 = vpop.xlane.xlu0 %1489 }
 0x3de   :  { %4433 = vpow2.f32 %v1691_v27  ;;  %v1707_v10 = vmul.f32 1.442695, %v1591_v18  ;;  %1771 = vadd.xlane.f32.xlu0 %v1770_v43  ;;  %v1586_v49 = vsub.f32 %v5701_v31, %v1490_v39  ;;  %v1881_v41 = vsel %vm1346_vm4, %v6035_v26, 0.0 }
 0x3df   :  { %v6042_v50 = vpop.xlane.xlu1 %1513  ;;  %1882 = vadd.xlane.f32.xlu1 %v1881_v41  ;;  %v1848_v39 = vsel %vm1346_vm4, %v5940_v48, 0.0 }
 0x3e0   :  { %v1697_v60 = vmul.f32 1.442695, %v1586_v49  ;;  %4435 = vpow2.f32 %v1707_v10 }
 0x3e1   :  { %v1484_v17 = vpop.xlane.xlu0 %1483  ;;  %v4428_v5 = vpop.eup %4427 }
 0x3e2   :  { %1795 = vadd.xlane.f32.xlu0 %v1794_v22  ;;  %v1584_v19 = vsub.f32 %v5712_v54, %v1484_v17  ;;  %4437 = vpow2.f32 %v1697_v60  ;;  %v1875_v54 = vsel %vm1346_vm4, %v4428_v5, 0.0  ;;  %v1818_v60 = vsel %vm1346_vm4, %v5928_v20, 0.0 }
 0x3e3   :  { %v6049_v31 = vpop.eup %4429  ;;  %v2579_v61 = vpop.permute.xlu1 %2578  ;;  %1852 = vadd.xlane.f32.xlu1 %v1851_v7 }
 0x3e4   :  { %v1693_v8 = vmul.f32 1.442695, %v1584_v19  ;;  %4191 = vmatprep.subr.bf16.mxu0 %v2579_v61  ;;  %v1947_v34 = vpack.c.bf16 %v6049_v31, %v4428_v5 }
 0x3e5   :  { %4192 = vmatpush3.bf16.msra.mxu0 %v2579_v61  ;;  %v1508_v2 = vpop.xlane.xlu0 %1507  ;;  %v6591_v61 = vld [vmem:[#allocation37_spill] sm:$0xff] }
 0x3e6   :  { %4439 = vpow2.f32 %v1693_v8  ;;  %1813 = vadd.xlane.f32.xlu0 %v1812_v30  ;;  %4177 = vmatprep.mubr.msk.bf16.mxu1 %vm1346_vm4, %v1947_v34  ;;  %v1592_v18 = vsub.f32 %v5727_v9, %v1508_v2  ;;  %v1594_v9 = vsub.f32 %v5707_v33, %v6042_v50  ;;  %v1860_v30 = vsel %vm1346_vm4, %v5982_v38, 0.0  ;;  %v2827_v38 = vld [vmem:[%s6425_s3] sm:$0xf] }
 0x3e7   :  { %v4432_v40 = vpop.eup %4431  ;;  %1876 = vadd.xlane.f32.xlu1 %v1875_v54  ;;  %4314 = vmatprep.subr.msk.bf16.mxu0 %vm2847_vm11, %v6059_v62 }
 0x3e8   :  { %v1869_v32 = vsel %vm1346_vm4, %v4432_v40, 0.0  ;;  %v1709_v10 = vmul.f32 1.442695, %v1592_v18  ;;  %v1713_v5 = vmul.f32 1.442695, %v1594_v9  ;;  %v4083_v9 = vpop.f32.mrf.mxu1 }
 0x3e9   :  { %v1523_v23 = vpop.xlane.xlu0 %1522 }
 0x3ea   :  { %1837 = vadd.xlane.f32.xlu0 %v1836_v15  ;;  %v1597_v35 = vsub.f32 %v5731_v52, %v1523_v23  ;;  %v6590_v52 = vld [vmem:[#allocation31_spill] sm:$0xff]  ;;  %v6592_v15 = vld [vmem:[#allocation2_spill] sm:$0xff] }
 0x3eb   :  { %v4434_v57 = vpop.eup %4433  ;;  %1870 = vadd.xlane.f32.xlu1 %v1869_v32  ;;  %v1590_v63 = vsub.f32 %v6590_v52, %v6021_v21 }
 0x3ec   :  { %v1719_v24 = vmul.f32 1.442695, %v1597_v35  ;;  %v1863_v59 = vsel %vm1346_vm4, %v4434_v57, 0.0 }
 0x3ed   :  { %v1517_v12 = vpop.xlane.xlu0 %1516  ;;  %v6073_v28 = vpop.eup %4435  ;;  %v1705_v45 = vmul.f32 1.442695, %v1590_v63  ;;  %v6138_v63 = vld [vmem:[%s6425_s3 + $0x8] sm:$0xf] }
 0x3ee   :  { %4441 = vpow2.f32 %v1719_v24  ;;  %1807 = vadd.xlane.f32.xlu0 %v1806_v53  ;;  %v1595_v44 = vsub.f32 %v5737_v14, %v1517_v12  ;;  %v1887_v47 = vsel %vm1346_vm4, %v6073_v28, 0.0  ;;  %v6124_v53 = vld [vmem:[%s6425_s3 + $0xc] sm:$0xf] }
 0x3ef   :  { %1864 = vadd.xlane.f32.xlu1 %v1863_v59  ;;  %v6079_v46 = vpop.eup %4437  ;;  %v2849_v59 = vsel %vm2847_vm11, %v2827_v38, 0 }
 0x3f0   :  { %v1715_v13 = vmul.f32 1.442695, %v1595_v44  ;;  %v1946_v25 = vpack.c.bf16 %v6079_v46, %v4432_v40  ;;  %v1854_v44 = vsel %vm1346_vm4, %v5984_v37, 0.0 }
 0x3f1   :  { %v1526_v0 = vpop.xlane.xlu0 %1525 }
 0x3f2   :  { %4443 = vpow2.f32 %v1715_v13  ;;  %1831 = vadd.xlane.f32.xlu0 %v1830_v1  ;;  %v1598_v14 = vsub.f32 %v5745_v55, %v1526_v0  ;;  %v1872_v1 = vsel %vm1346_vm4, %v6079_v46, 0.0 }
 0x3f3   :  { %v6084_v3 = vpop.eup %4439  ;;  %1888 = vadd.xlane.f32.xlu1 %v1887_v47  ;;  %4445 = vpow2.f32 %v1711_v58  ;;  %v1878_v58 = vsel %vm1346_vm4, %v6049_v31, 0.0 }
 0x3f4   :  { %v1945_v21 = vpack.c.bf16 %v6084_v3, %v4434_v57  ;;  %v1721_v11 = vmul.f32 1.442695, %v1598_v14  ;;  %4447 = vpow2.f32 %v1705_v45 }
 0x3f5   :  { %v1520_v27 = vpop.xlane.xlu0 %1519 }
 0x3f6   :  { %1825 = vadd.xlane.f32.xlu0 %v1824_v42  ;;  %v1596_v55 = vsub.f32 %v5758_v36, %v1520_v27  ;;  %4165 = vmatprep.mubr.msk.bf16.mxu0 %vm1346_vm4, %v1945_v21  ;;  %4449 = vpow2.f32 %v1721_v11  ;;  %v1866_v21 = vsel %vm1346_vm4, %v6084_v3, 0.0 }
 0x3f7   :  { %4166 = vmatmul.mubr.msk.bf16.gmra.mxu0 %vm1346_vm4, %v1946_v25 }
 0x3f8   :  { %v1717_v43 = vmul.f32 1.442695, %v1596_v55 }
 0x3fa   :  { %4451 = vpow2.f32 %v1717_v43  ;;  %1849 = vadd.xlane.f32.xlu0 %v1848_v39  ;;  %v1535_v56 = vpop.xlane.xlu0 %1534 }
 0x3fb   :  { %v4442_v49 = vpop.eup %4441  ;;  %v1601_v41 = vsub.f32 %v5788_v4, %v1535_v56  ;;  %4453 = vpow2.f32 %v1709_v10  ;;  %v1842_v4 = vsel %vm1346_vm4, %v5943_v29, 0.0 }
 0x3fc   :  { %v1905_v36 = vsel %vm1346_vm4, %v4442_v49, 0.0 }
 0x3fd   :  { %1906 = vadd.xlane.f32.xlu1 %v1905_v36  ;;  %v1727_v33 = vmul.f32 1.442695, %v1601_v41 }
 0x3fe   :  { %1819 = vadd.xlane.f32.xlu0 %v1818_v60  ;;  %v1529_v22 = vpop.xlane.xlu0 %1528  ;;  %v2013_v60 = vpop.f32.mrf.mxu1 }
 0x3ff   :  { %v4444_v48 = vpop.eup %4443  ;;  %v1599_v17 = vsub.f32 %v5801_v6, %v1529_v22 }
 0x400   :  { %v1899_v19 = vsel %vm1346_vm4, %v4444_v48, 0.0  ;;  %v6104_v7 = vpop.eup %4445 }
 0x401   :  { %v1723_v50 = vmul.f32 1.442695, %v1599_v17  ;;  %1900 = vadd.xlane.f32.xlu1 %v1899_v19  ;;  %v1893_v6 = vsel %vm1346_vm4, %v6104_v7, 0.0  ;;  %v4448_v34 = vpop.eup %4447 }
 0x402   :  { %1843 = vadd.xlane.f32.xlu0 %v1842_v4  ;;  %v1538_v20 = vpop.xlane.xlu0 %1537  ;;  %v1884_v16 = vsel %vm1346_vm4, %v4448_v34, 0.0  ;;  %v1948_v62 = vpack.c.bf16 %v4448_v34, %v6035_v26 }
 0x403   :  { %4455 = vpow2.f32 %v1723_v50  ;;  %v1602_v8 = vsub.f32 %v6591_v61, %v1538_v20  ;;  %v4450_v2 = vpop.eup %4449 }
 0x404   :  { %4457 = vpow2.f32 %v1713_v5  ;;  %v1952_v32 = vpack.c.bf16 %v4450_v2, %v4442_v49  ;;  %v1908_v25 = vsel %vm1346_vm4, %v4450_v2, 0.0 }
 0x405   :  { %4459 = vpow2.f32 %v1727_v33  ;;  %1894 = vadd.xlane.f32.xlu1 %v1893_v6  ;;  %v1729_v54 = vmul.f32 1.442695, %v1602_v8 }
 0x406   :  { %1861 = vadd.xlane.f32.xlu0 %v1860_v30  ;;  %v1532_v29 = vpop.xlane.xlu0 %1531 }
 0x407   :  { %v4452_v40 = vpop.eup %4451  ;;  %v1600_v23 = vsub.f32 %v6592_v15, %v1532_v29  ;;  %4461 = vpow2.f32 %v1729_v54 }
 0x408   :  { %v1951_v35 = vpack.c.bf16 %v4452_v40, %v4444_v48  ;;  %v4454_v12 = vpop.eup %4453  ;;  %v1902_v55 = vsel %vm1346_vm4, %v4452_v40, 0.0  ;;  %v4084_v48 = vpop.f32.mrf.mxu1 }
 0x409   :  { %v1725_v57 = vmul.f32 1.442695, %v1600_v23  ;;  %v1949_v52 = vpack.c.bf16 %v4454_v12, %v6073_v28  ;;  %v1890_v46 = vsel %vm1346_vm4, %v4454_v12, 0.0 }
 0x40a   :  { %1885 = vadd.xlane.f32.xlu0 %v1884_v16  ;;  %v2490_v24 = vpop.permute.xlu0 %2489  ;;  %4193 = vmatprep.mubr.msk.bf16.mxu0 %vm1346_vm4, %v1951_v35  ;;  %v2016_v19 = vpop.f32.mrf.mxu1 }
 0x40b   :  { %4463 = vpow2.f32 %v1725_v57  ;;  %4175 = vmatprep.subr.bf16.mxu1 %v2490_v24  ;;  %4194 = vmatmul.mubr.msk.bf16.vlgmr.msra.gmra.mxu0 %vm1346_vm4, %v1952_v32 }
 0x40c   :  { %4176 = vmatpush3.bf16.msra.mxu1 %v2490_v24  ;;  %4212 = vmatpush3.bf16.msra.mxu0 %v2929_v51  ;;  %v4087_v20 = vpop.f32.mrf.mxu1  ;;  %v3009_v24 = vsel %vm2847_vm11, %v6138_v63, 0 }
 0x40d   :  { %4313 = vmatprep.subr.msk.bf16.mxu1 %vm2847_vm11, %v2827_v38  ;;  %4316 = vmatprep.subr.msk.bf16.mxu0 %vm2847_vm11, %v6124_v53 }
 0x40e   :  { %1855 = vadd.xlane.f32.xlu0 %v1854_v44  ;;  %v2029_v30 = vpop.f32.mrf.mxu1 }
 0x40f   :  { %4178 = vmatmul.mubr.msk.bf16.vlgmr.msra.gmra.mxu1 %vm1346_vm4, %v1948_v62  ;;  %v6176_v62 = vld [vmem:[%s6425_s3 + $0x10] sm:$0xf] }
 0x410   :  { %v4456_v26 = vpop.eup %4455  ;;  %4181 = vmatprep.mubr.msk.bf16.mxu1 %vm1346_vm4, %v1949_v52  ;;  %4202 = vmatpush3.bf16.msra.mxu1 %v2849_v59  ;;  %v4088_v15 = vpop.f32.mrf.mxu1 }
 0x411   :  { %v4458_v37 = vpop.eup %4457  ;;  %v1911_v13 = vsel %vm1346_vm4, %v4456_v26, 0.0  ;;  %4315 = vmatprep.subr.msk.bf16.mxu1 %vm2847_vm11, %v6138_v63 }
 0x412   :  { %v4460_v28 = vpop.eup %4459  ;;  %1879 = vadd.xlane.f32.xlu0 %v1878_v58  ;;  %1912 = vadd.xlane.f32.xlu1 %v1911_v13  ;;  %v1950_v14 = vpack.c.bf16 %v4458_v37, %v6104_v7  ;;  %v1896_v3 = vsel %vm1346_vm4, %v4458_v37, 0.0  ;;  %v2032_v12 = vpop.f32.mrf.mxu1 }
 0x413   :  { %v1917_v0 = vsel %vm1346_vm4, %v4460_v28, 0.0 }
 0x414   :  { %v4462_v47 = vpop.eup %4461  ;;  %v1736_v45 = vpop.xlane.xlu1 %1735 }
 0x415   :  { %v1954_v42 = vpack.c.bf16 %v4462_v47, %v4460_v28  ;;  %v1920_v56 = vsel %vm1346_vm4, %v4462_v47, 0.0  ;;  %4465 = vrcp.f32 %v1736_v45 }
 0x416   :  { %1873 = vadd.xlane.f32.xlu0 %v1872_v1  ;;  %1918 = vadd.xlane.f32.xlu1 %v1917_v0 }
 0x417   :  { %4182 = vmatmul.mubr.msk.bf16.gmra.mxu1 %vm1346_vm4, %v1950_v14 }
 0x418   :  { %v4464_v31 = vpop.eup %4463 }
 0x419   :  { %v1953_v11 = vpack.c.bf16 %v4464_v31, %v4456_v26  ;;  %v1745_v27 = vpop.xlane.xlu1 %1744  ;;  %v1914_v39 = vsel %vm1346_vm4, %v4464_v31, 0.0 }
 0x41a   :  { %1867 = vadd.xlane.f32.xlu0 %v1866_v21 }
 0x41b   :  { %4197 = vmatprep.mubr.msk.bf16.mxu0 %vm1346_vm4, %v1953_v11 }
 0x41c   :  { %4198 = vmatmul.mubr.msk.bf16.gmra.mxu0 %vm1346_vm4, %v1954_v42 }
 0x41d   :  { %v1751_v18 = vpop.xlane.xlu1 %1750 }
 0x41e   :  { %1891 = vadd.xlane.f32.xlu0 %v1890_v46 }
 0x421   :  { %v1763_v43 = vpop.xlane.xlu1 %1762 }
 0x422   :  { %1909 = vadd.xlane.f32.xlu0 %v1908_v25  ;;  %v4466_v7 = vpop.eup %4465 }
 0x423   :  { %v2732_v8 = vmul.f32 %v4466_v7, %v2016_v19 }
 0x425   :  { %v6161_v10 = vpop.xlane.xlu1 %1786 }
 0x426   :  { %1903 = vadd.xlane.f32.xlu0 %v1902_v55 }
 0x429   :  { %v1757_v49 = vpop.xlane.xlu1 %1756 }
 0x42a   :  { %1897 = vadd.xlane.f32.xlu0 %v1896_v3  ;;  %v4099_v58 = vpop.f32.mrf.mxu0 }
 0x42c   :  { %v2102_v47 = vpop.f32.mrf.mxu0 }
 0x42d   :  { %v1781_v41 = vpop.xlane.xlu1 %1780 }
 0x42e   :  { %1915 = vadd.xlane.f32.xlu0 %v1914_v39  ;;  %v4115_v31 = vpop.f32.mrf.mxu1  ;;  %v4100_v11 = vpop.f32.mrf.mxu0 }
 0x430   :  { %v2191_v42 = vpop.f32.mrf.mxu1  ;;  %v2105_v3 = vpop.f32.mrf.mxu0 }
 0x431   :  { %v6164_v17 = vpop.xlane.xlu1 %1774 }
 0x432   :  { %1921 = vadd.xlane.f32.xlu0 %v1920_v56 }
 0x435   :  { %v6166_v50 = vpop.xlane.xlu1 %1798 }
 0x437   :  { %v4103_v7 = vpop.f32.mrf.mxu0 }
 0x439   :  { %v1769_v2 = vpop.xlane.xlu1 %1768 }
 0x43b   :  { %v1733_v36 = vpop.xlane.xlu0 %1732 }
 0x43c   :  { %4467 = vrcp.f32 %v1733_v36 }
 0x43d   :  { %v6169_v16 = vpop.xlane.xlu1 %1792 }
 0x43f   :  { %v1739_v22 = vpop.xlane.xlu0 %1738 }
 0x440   :  { %4469 = vrcp.f32 %v1739_v22 }
 0x441   :  { %v6181_v13 = vpop.xlane.xlu1 %1810 }
 0x443   :  { %v1742_v5 = vpop.xlane.xlu0 %1741 }
 0x444   :  { %4471 = vrcp.f32 %v1742_v5 }
 0x445   :  { %4473 = vrcp.f32 %v1745_v27  ;;  %v6186_v21 = vpop.xlane.xlu1 %1834 }
 0x447   :  { %v1748_v33 = vpop.xlane.xlu0 %1747 }
 0x448   :  { %4475 = vrcp.f32 %v1748_v33 }
 0x449   :  { %v4468_v4 = vpop.eup %4467  ;;  %4477 = vrcp.f32 %v1751_v18 }
 0x44a   :  { %v2731_v61 = vmul.f32 %v4468_v4, %v2013_v60 }
 0x44b   :  { %v1754_v6 = vpop.xlane.xlu0 %1753 }
 0x44c   :  { %4479 = vrcp.f32 %v1754_v6  ;;  %v2795_v34 = vpack.c.bf16 %v2732_v8, %v2731_v61 }
 0x44d   :  { %v4470_v54 = vpop.eup %4469 }
 0x44e   :  { %4203 = vmatprep.mubr.msk.bf16.mxu1 %vm549_vm1, %v2795_v34  ;;  %v2733_v23 = vmul.f32 %v4470_v54, %v4083_v9 }
 0x44f   :  { %v1766_v29 = vpop.xlane.xlu0 %1765 }
 0x450   :  { %4481 = vrcp.f32 %v1766_v29 }
 0x451   :  { %v4472_v40 = vpop.eup %4471  ;;  %4483 = vrcp.f32 %v1757_v49  ;;  %v1805_v49 = vpop.xlane.xlu1 %1804 }
 0x452   :  { %v2734_v35 = vmul.f32 %v4472_v40, %v4084_v48  ;;  %v4474_v32 = vpop.eup %4473  ;;  %4485 = vrcp.f32 %v1763_v43  ;;  %v4116_v43 = vpop.f32.mrf.mxu1  ;;  %v3169_v40 = vsel %vm2847_vm11, %v6176_v62, 0 }
 0x453   :  { %v1790_v57 = vpop.xlane.xlu0 %1789  ;;  %v2735_v44 = vmul.f32 %v4474_v32, %v2029_v30 }
 0x454   :  { %v2796_v51 = vpack.c.bf16 %v2734_v35, %v2733_v23  ;;  %v2194_v19 = vpop.f32.mrf.mxu1 }
 0x455   :  { %v4476_v38 = vpop.eup %4475  ;;  %v1829_v30 = vpop.xlane.xlu1 %1828 }
 0x456   :  { %4204 = vmatmul.mubr.msk.bf16.vlgmr.msra.gmra.mxu1 %vm549_vm1, %v2796_v51  ;;  %v2736_v59 = vmul.f32 %v4476_v38, %v2032_v12  ;;  %v4478_v52 = vpop.eup %4477  ;;  %v4119_v54 = vpop.f32.mrf.mxu1 }
 0x457   :  { %v1760_v26 = vpop.xlane.xlu0 %1759  ;;  %4222 = vmatpush3.bf16.msra.mxu1 %v3009_v24  ;;  %v2737_v28 = vmul.f32 %v4478_v52, %v4087_v20  ;;  %v3089_v20 = vsel %vm2847_vm11, %v6124_v53, 0 }
 0x458   :  { %4487 = vrcp.f32 %v1760_v26  ;;  %v2797_v37 = vpack.c.bf16 %v2736_v59, %v2735_v44  ;;  %4317 = vmatprep.subr.msk.bf16.mxu1 %vm2847_vm11, %v6176_v62  ;;  %v2207_v35 = vpop.f32.mrf.mxu1 }
 0x459   :  { %v4480_v63 = vpop.eup %4479  ;;  %4489 = vrcp.f32 %v1790_v57  ;;  %v1823_v57 = vpop.xlane.xlu1 %1822 }
 0x45a   :  { %4491 = vrcp.f32 %v1781_v41  ;;  %4207 = vmatprep.mubr.msk.bf16.mxu1 %vm549_vm1, %v2797_v37  ;;  %v2738_v1 = vmul.f32 %v4480_v63, %v4088_v15  ;;  %v4120_v62 = vpop.f32.mrf.mxu1 }
 0x45b   :  { %4493 = vrcp.f32 %v6161_v10  ;;  %v1784_v0 = vpop.xlane.xlu0 %1783 }
 0x45c   :  { %4495 = vrcp.f32 %v1784_v0  ;;  %v2798_v14 = vpack.c.bf16 %v2738_v1, %v2737_v28 }
 0x45d   :  { %v4482_v46 = vpop.eup %4481  ;;  %v6214_v1 = vpop.xlane.xlu1 %1846 }
 0x45e   :  { %4208 = vmatmul.mubr.msk.bf16.gmra.mxu1 %vm549_vm1, %v2798_v14  ;;  %v4484_v27 = vpop.eup %4483  ;;  %v2742_v39 = vmul.f32 %v4482_v46, %v4100_v11 }
 0x45f   :  { %v1778_v45 = vpop.xlane.xlu0 %1777  ;;  %v4486_v18 = vpop.eup %4485  ;;  %v2739_v56 = vmul.f32 %v4484_v27, %v2102_v47 }
 0x460   :  { %4497 = vrcp.f32 %v1778_v45  ;;  %v2741_v41 = vmul.f32 %v4486_v18, %v4099_v58  ;;  %v2210_v47 = vpop.f32.mrf.mxu1 }
 0x461   :  { %4499 = vrcp.f32 %v1769_v2  ;;  %v2118_v2 = vpop.f32.mrf.mxu0 }
 0x462   :  { %4501 = vrcp.f32 %v6164_v17  ;;  %v2800_v33 = vpack.c.bf16 %v2742_v39, %v2741_v41  ;;  %v6196_v17 = vld [vmem:[%s6425_s3 + $0x14] sm:$0xf] }
 0x463   :  { %v1802_v25 = vpop.xlane.xlu0 %1801  ;;  %v4104_v23 = vpop.f32.mrf.mxu0 }
 0x465   :  { %v4488_v55 = vpop.eup %4487  ;;  %v2121_v12 = vpop.f32.mrf.mxu0 }
 0x466   :  { %v4490_v10 = vpop.eup %4489  ;;  %v2740_v9 = vmul.f32 %v4488_v55, %v2105_v3  ;;  %v4147_v55 = vpop.f32.mrf.mxu1 }
 0x467   :  { %v4492_v36 = vpop.eup %4491  ;;  %v1772_v60 = vpop.xlane.xlu0 %1771  ;;  %v2750_v4 = vmul.f32 %v4490_v10, %v4116_v43 }
 0x468   :  { %v4494_v22 = vpop.eup %4493  ;;  %4503 = vrcp.f32 %v1772_v60  ;;  %v2799_v48 = vpack.c.bf16 %v2740_v9, %v2739_v56  ;;  %v2747_v61 = vmul.f32 %v4492_v36, %v2191_v42  ;;  %v1817_v43 = vpop.xlane.xlu1 %1816 }
 0x469   :  { %v4496_v5 = vpop.eup %4495  ;;  %4505 = vrcp.f32 %v1802_v25  ;;  %v2749_v6 = vmul.f32 %v4494_v22, %v4115_v31  ;;  %v4131_v31 = vpop.f32.mrf.mxu0 }
 0x46a   :  { %4507 = vrcp.f32 %v6169_v16  ;;  %4213 = vmatprep.mubr.msk.bf16.mxu0 %vm549_vm1, %v2799_v48  ;;  %v2748_v8 = vmul.f32 %v4496_v5, %v2194_v19  ;;  %v2369_v56 = vpop.f32.mrf.mxu1 }
 0x46b   :  { %4509 = vrcp.f32 %v6166_v50  ;;  %4214 = vmatmul.mubr.msk.bf16.vlgmr.msra.gmra.mxu0 %vm549_vm1, %v2800_v33  ;;  %v1796_v34 = vpop.xlane.xlu0 %1795  ;;  %v2804_v29 = vpack.c.bf16 %v2750_v4, %v2749_v6  ;;  %v6208_v50 = vld [vmem:[%s6425_s3 + $0x18] sm:$0xf]  ;;  %v2280_v18 = vpop.f32.mrf.mxu0 }
 0x46c   :  { %4511 = vrcp.f32 %v1796_v34  ;;  %v2803_v53 = vpack.c.bf16 %v2748_v8, %v2747_v61  ;;  %4232 = vmatpush3.bf16.msra.mxu0 %v3089_v20  ;;  %v1841_v41 = vpop.xlane.xlu1 %1840  ;;  %v4148_v48 = vpop.f32.mrf.mxu1 }
 0x46d   :  { %4318 = vmatprep.subr.msk.bf16.mxu0 %vm2847_vm11, %v6196_v17  ;;  %v4498_v32 = vpop.eup %4497  ;;  %v4132_v10 = vpop.f32.mrf.mxu0 }
 0x46e   :  { %4223 = vmatprep.mubr.msk.bf16.mxu1 %vm549_vm1, %v2803_v53  ;;  %v4500_v16 = vpop.eup %4499  ;;  %v2746_v44 = vmul.f32 %v4498_v32, %v4104_v23 }
 0x46f   :  { %4224 = vmatmul.mubr.msk.bf16.vlgmr.msra.gmra.mxu1 %vm549_vm1, %v2804_v29  ;;  %v1814_v15 = vpop.xlane.xlu0 %1813  ;;  %v4502_v24 = vpop.eup %4501  ;;  %v2743_v52 = vmul.f32 %v4500_v16, %v2118_v2  ;;  %v3249_v29 = vsel %vm2847_vm11, %v6196_v17, 0 }
 0x470   :  { %4242 = vmatpush3.bf16.msra.mxu1 %v3169_v40  ;;  %4513 = vrcp.f32 %v1814_v15  ;;  %v2745_v63 = vmul.f32 %v4502_v24, %v4103_v7  ;;  %v2283_v22 = vpop.f32.mrf.mxu0  ;;  %v1859_v15 = vpop.xlane.xlu1 %1858 }
 0x471   :  { %4319 = vmatprep.subr.msk.bf16.mxu1 %vm2847_vm11, %v6208_v50  ;;  %4515 = vrcp.f32 %v1805_v49 }
 0x472   :  { %4517 = vrcp.f32 %v6181_v13  ;;  %v2802_v45 = vpack.c.bf16 %v2746_v44, %v2745_v63  ;;  %v4135_v53 = vpop.f32.mrf.mxu0 }
 0x473   :  { %v1838_v51 = vpop.xlane.xlu0 %1837 }
 0x474   :  { %v2296_v17 = vpop.f32.mrf.mxu0 }
 0x475   :  { %v4504_v38 = vpop.eup %4503 }
 0x476   :  { %v4506_v59 = vpop.eup %4505  ;;  %v2744_v26 = vmul.f32 %v4504_v38, %v2121_v12  ;;  %v3329_v38 = vsel %vm2847_vm11, %v6208_v50, 0  ;;  %v6235_v12 = vpop.xlane.xlu1 %1882 }
 0x477   :  { %v4508_v37 = vpop.eup %4507  ;;  %v1808_v58 = vpop.xlane.xlu0 %1807  ;;  %v2754_v11 = vmul.f32 %v4506_v59, %v4120_v62 }
 0x478   :  { %v4510_v28 = vpop.eup %4509  ;;  %4519 = vrcp.f32 %v1808_v58  ;;  %v2801_v0 = vpack.c.bf16 %v2744_v26, %v2743_v52  ;;  %v2751_v42 = vmul.f32 %v4508_v37, %v2207_v35  ;;  %v6227_v35 = vld [vmem:[%s6425_s3 + $0x1c] sm:$0xf]  ;;  %v4136_v44 = vpop.f32.mrf.mxu0 }
 0x479   :  { %v4512_v14 = vpop.eup %4511  ;;  %4521 = vrcp.f32 %v1838_v51  ;;  %v2753_v27 = vmul.f32 %v4510_v28, %v4119_v54 }
 0x47a   :  { %4523 = vrcp.f32 %v1829_v30  ;;  %4217 = vmatprep.mubr.msk.bf16.mxu0 %vm549_vm1, %v2801_v0  ;;  %v2752_v46 = vmul.f32 %v4512_v14, %v2210_v47  ;;  %v2372_v30 = vpop.f32.mrf.mxu1  ;;  %v1853_v58 = vpop.xlane.xlu1 %1852 }
 0x47b   :  { %4525 = vrcp.f32 %v6186_v21  ;;  %4218 = vmatmul.mubr.msk.bf16.gmra.mxu0 %vm549_vm1, %v2802_v45  ;;  %v1832_v13 = vpop.xlane.xlu0 %1831  ;;  %v2806_v3 = vpack.c.bf16 %v2754_v11, %v2753_v27  ;;  %v2299_v28 = vpop.f32.mrf.mxu0 }
 0x47c   :  { %4527 = vrcp.f32 %v1832_v13  ;;  %v2805_v25 = vpack.c.bf16 %v2752_v46, %v2751_v42  ;;  %v4151_v51 = vpop.f32.mrf.mxu1 }
 0x47d   :  { %v4514_v49 = vpop.eup %4513 }
 0x47e   :  { %4227 = vmatprep.mubr.msk.bf16.mxu1 %vm549_vm1, %v2805_v25  ;;  %v4516_v9 = vpop.eup %4515  ;;  %v2758_v5 = vmul.f32 %v4514_v49, %v4132_v10  ;;  %v2385_v59 = vpop.f32.mrf.mxu1 }
 0x47f   :  { %4228 = vmatmul.mubr.msk.bf16.gmra.mxu1 %vm549_vm1, %v2806_v3  ;;  %v1826_v39 = vpop.xlane.xlu0 %1825  ;;  %v4518_v21 = vpop.eup %4517  ;;  %v2755_v7 = vmul.f32 %v4516_v9, %v2280_v18 }
 0x480   :  { %4529 = vrcp.f32 %v1826_v39  ;;  %v2757_v20 = vmul.f32 %v4518_v21, %v4131_v31 }
 0x481   :  { %4531 = vrcp.f32 %v1817_v43  ;;  %v4163_v18 = vpop.f32.mrf.mxu0 }
 0x482   :  { %4533 = vrcp.f32 %v1823_v57  ;;  %v2808_v2 = vpack.c.bf16 %v2758_v5, %v2757_v20 }
 0x483   :  { %v1850_v36 = vpop.xlane.xlu0 %1849  ;;  %v2458_v49 = vpop.f32.mrf.mxu0 }
 0x485   :  { %v4520_v60 = vpop.eup %4519 }
 0x486   :  { %v4522_v19 = vpop.eup %4521  ;;  %v2756_v33 = vmul.f32 %v4520_v60, %v2283_v22 }
 0x487   :  { %v4524_v4 = vpop.eup %4523  ;;  %v1820_v61 = vpop.xlane.xlu0 %1819  ;;  %v2766_v54 = vmul.f32 %v4522_v19, %v4148_v48 }
 0x488   :  { %v4526_v8 = vpop.eup %4525  ;;  %4535 = vrcp.f32 %v1820_v61  ;;  %v2807_v6 = vpack.c.bf16 %v2756_v33, %v2755_v7  ;;  %v2763_v40 = vmul.f32 %v4524_v4, %v2369_v56 }
 0x489   :  { %v4528_v34 = vpop.eup %4527  ;;  %4537 = vrcp.f32 %v1850_v36  ;;  %v2765_v32 = vmul.f32 %v4526_v8, %v4147_v55  ;;  %v1877_v36 = vpop.xlane.xlu1 %1876 }
 0x48a   :  { %4539 = vrcp.f32 %v1841_v41  ;;  %4233 = vmatprep.mubr.msk.bf16.mxu0 %vm549_vm1, %v2807_v6  ;;  %v2764_v23 = vmul.f32 %v4528_v34, %v2372_v30  ;;  %v4164_v41 = vpop.f32.mrf.mxu0  ;;  %v3409_v30 = vsel %vm2847_vm11, %v6227_v35, 0 }
 0x48b   :  { %4541 = vrcp.f32 %v6214_v1  ;;  %4234 = vmatmul.mubr.msk.bf16.vlgmr.msra.gmra.mxu0 %vm549_vm1, %v2808_v2  ;;  %v1844_v57 = vpop.xlane.xlu0 %1843  ;;  %v2812_v24 = vpack.c.bf16 %v2766_v54, %v2765_v32  ;;  %v4152_v1 = vpop.f32.mrf.mxu1 }
 0x48c   :  { %4543 = vrcp.f32 %v1844_v57  ;;  %v2811_v16 = vpack.c.bf16 %v2764_v23, %v2763_v40  ;;  %4252 = vmatpush3.bf16.msra.mxu0 %v3249_v29  ;;  %v2461_v19 = vpop.f32.mrf.mxu0 }
 0x48d   :  { %4320 = vmatprep.subr.msk.bf16.mxu0 %vm2847_vm11, %v6227_v35  ;;  %v4530_v52 = vpop.eup %4529  ;;  %v2388_v25 = vpop.f32.mrf.mxu1 }
 0x48e   :  { %4243 = vmatprep.mubr.msk.bf16.mxu1 %vm549_vm1, %v2811_v16  ;;  %v4532_v26 = vpop.eup %4531  ;;  %v2762_v0 = vmul.f32 %v4530_v52, %v4136_v44  ;;  %v1871_v5 = vpop.xlane.xlu1 %1870 }
 0x48f   :  { %4244 = vmatmul.mubr.msk.bf16.vlgmr.msra.gmra.mxu1 %vm549_vm1, %v2812_v24  ;;  %v1862_v62 = vpop.xlane.xlu0 %1861  ;;  %v4534_v63 = vpop.eup %4533  ;;  %v2759_v47 = vmul.f32 %v4532_v26, %v2296_v17 }
 0x490   :  { %4262 = vmatpush3.bf16.msra.mxu1 %v3329_v38  ;;  %4545 = vrcp.f32 %v1862_v62  ;;  %v2761_v11 = vmul.f32 %v4534_v63, %v4135_v53 }
 0x491   :  { %4547 = vrcp.f32 %v1853_v58 }
 0x492   :  { %v2810_v55 = vpack.c.bf16 %v2762_v0, %v2761_v11  ;;  %v1865_v53 = vpop.xlane.xlu1 %1864 }
 0x493   :  { %v6239_v37 = vpop.xlane.xlu0 %1885 }
 0x495   :  { %v4536_v50 = vpop.eup %4535 }
 0x496   :  { %v4538_v14 = vpop.eup %4537  ;;  %v2760_v31 = vmul.f32 %v4536_v50, %v2299_v28  ;;  %v1889_v29 = vpop.xlane.xlu1 %1888 }
 0x497   :  { %v4540_v45 = vpop.eup %4539  ;;  %v1856_v42 = vpop.xlane.xlu0 %1855  ;;  %v2770_v3 = vmul.f32 %v4538_v14, %v4152_v1 }
 0x498   :  { %v4542_v46 = vpop.eup %4541  ;;  %4549 = vrcp.f32 %v1856_v42  ;;  %v2809_v27 = vpack.c.bf16 %v2760_v31, %v2759_v47  ;;  %v2767_v43 = vmul.f32 %v4540_v45, %v2385_v59 }
 0x499   :  { %v4544_v13 = vpop.eup %4543  ;;  %4551 = vrcp.f32 %v1859_v15  ;;  %v2769_v10 = vmul.f32 %v4542_v46, %v4151_v51 }
 0x49a   :  { %4237 = vmatprep.mubr.msk.bf16.mxu0 %vm549_vm1, %v2809_v27  ;;  %v2768_v39 = vmul.f32 %v4544_v13, %v2388_v25  ;;  %4553 = vrcp.f32 %v1865_v53  ;;  %v1907_v23 = vpop.xlane.xlu1 %1906 }
 0x49b   :  { %4238 = vmatmul.mubr.msk.bf16.gmra.mxu0 %vm549_vm1, %v2810_v55  ;;  %v2814_v9 = vpack.c.bf16 %v2770_v3, %v2769_v10  ;;  %v1880_v21 = vpop.xlane.xlu0 %1879 }
 0x49c   :  { %v2813_v56 = vpack.c.bf16 %v2768_v39, %v2767_v43 }
 0x49d   :  { %v4546_v60 = vpop.eup %4545 }
 0x49e   :  { %4247 = vmatprep.mubr.msk.bf16.mxu1 %vm549_vm1, %v2813_v56  ;;  %v4548_v22 = vpop.eup %4547  ;;  %v2774_v7 = vmul.f32 %v4546_v60, %v4164_v41  ;;  %v1901_v52 = vpop.xlane.xlu1 %1900 }
 0x49f   :  { %4248 = vmatmul.mubr.msk.bf16.gmra.mxu1 %vm549_vm1, %v2814_v9  ;;  %v2771_v4 = vmul.f32 %v4548_v22, %v2458_v49  ;;  %v1874_v20 = vpop.xlane.xlu0 %1873 }
 0x4a0   :  { %4555 = vrcp.f32 %v1874_v20 }
 0x4a2   :  { %v1895_v28 = vpop.xlane.xlu1 %1894 }
 0x4a3   :  { %v1868_v2 = vpop.xlane.xlu0 %1867 }
 0x4a4   :  { %4557 = vrcp.f32 %v1868_v2 }
 0x4a5   :  { %v4550_v48 = vpop.eup %4549  ;;  %4559 = vrcp.f32 %v1871_v5 }
 0x4a6   :  { %v4552_v33 = vpop.eup %4551  ;;  %v2772_v61 = vmul.f32 %v4550_v48, %v2461_v19  ;;  %4561 = vrcp.f32 %v1901_v52  ;;  %v1913_v14 = vpop.xlane.xlu1 %1912 }
 0x4a7   :  { %v2773_v8 = vmul.f32 %v4552_v33, %v4163_v18  ;;  %v1892_v54 = vpop.xlane.xlu0 %1891  ;;  %v4554_v57 = vpop.eup %4553 }
 0x4a8   :  { %v2815_v6 = vpack.c.bf16 %v2772_v61, %v2771_v4 }
 0x4a9   :  { %v2816_v34 = vpack.c.bf16 %v2774_v7, %v2773_v8 }
 0x4aa   :  { %4253 = vmatprep.mubr.msk.bf16.mxu0 %vm549_vm1, %v2815_v6  ;;  %v1919_v43 = vpop.xlane.xlu1 %1918 }
 0x4ab   :  { %4254 = vmatmul.mubr.msk.bf16.vlgmr.msra.gmra.mxu0 %vm549_vm1, %v2816_v34  ;;  %v1910_v15 = vpop.xlane.xlu0 %1909 }
 0x4ac   :  { %4272 = vmatpush3.bf16.msra.mxu0 %v3409_v30  ;;  %4563 = vrcp.f32 %v1910_v15 }
 0x4ad   :  { %v4556_v35 = vpop.eup %4555 }
 0x4af   :  { %v1904_v62 = vpop.xlane.xlu0 %1903 }
 0x4b0   :  { %4565 = vrcp.f32 %v1904_v62 }
 0x4b1   :  { %v4558_v17 = vpop.eup %4557  ;;  %4567 = vrcp.f32 %v1907_v23 }
 0x4b2   :  { %v4560_v38 = vpop.eup %4559  ;;  %4569 = vrcp.f32 %v1877_v36 }
 0x4b3   :  { %v1898_v50 = vpop.xlane.xlu0 %1897  ;;  %4571 = vrcp.f32 %v6239_v37  ;;  %v4562_v31 = vpop.eup %4561 }
 0x4b4   :  { %4573 = vrcp.f32 %v1880_v21 }
 0x4b5   :  { %4575 = vrcp.f32 %v6235_v12 }
 0x4b6   :  { %4577 = vrcp.f32 %v1889_v29 }
 0x4b7   :  { %v4167_v40 = vpop.f32.mrf.mxu0  ;;  %v1916_v1 = vpop.xlane.xlu0 %1915  ;;  %4579 = vrcp.f32 %v1898_v50 }
 0x4b8   :  { %v2777_v26 = vmul.f32 %v4560_v38, %v4167_v40  ;;  %4581 = vrcp.f32 %v1892_v54 }
 0x4b9   :  { %v2474_v32 = vpop.f32.mrf.mxu0  ;;  %v4564_v42 = vpop.eup %4563  ;;  %4583 = vrcp.f32 %v1895_v28 }
 0x4ba   :  { %v2775_v44 = vmul.f32 %v4554_v57, %v2474_v32  ;;  %4585 = vrcp.f32 %v1913_v14 }
 0x4bb   :  { %v4168_v16 = vpop.f32.mrf.mxu0  ;;  %v1922_v46 = vpop.xlane.xlu0 %1921 }
 0x4bc   :  { %v2778_v51 = vmul.f32 %v4556_v35, %v4168_v16  ;;  %4587 = vrcp.f32 %v1922_v46 }
 0x4bd   :  { %v2477_v24 = vpop.f32.mrf.mxu0  ;;  %v4566_v27 = vpop.eup %4565  ;;  %4589 = vrcp.f32 %v1916_v1 }
 0x4be   :  { %v2776_v59 = vmul.f32 %v4558_v17, %v2477_v24  ;;  %v2818_v58 = vpack.c.bf16 %v2778_v51, %v2777_v26  ;;  %v4568_v18 = vpop.eup %4567  ;;  %4591 = vrcp.f32 %v1919_v43 }
 0x4bf   :  { %v4570_v3 = vpop.eup %4569 }
 0x4c0   :  { %v2817_v63 = vpack.c.bf16 %v2776_v59, %v2775_v44  ;;  %v4572_v56 = vpop.eup %4571 }
 0x4c1   :  { %v4574_v9 = vpop.eup %4573 }
 0x4c2   :  { %4257 = vmatprep.mubr.msk.bf16.mxu0 %vm549_vm1, %v2817_v63  ;;  %v4576_v60 = vpop.eup %4575 }
 0x4c3   :  { %4258 = vmatmul.mubr.msk.bf16.gmra.mxu0 %vm549_vm1, %v2818_v58  ;;  %v4578_v20 = vpop.eup %4577 }
 0x4c4   :  { %v4580_v8 = vpop.eup %4579 }
 0x4c5   :  { %v4582_v34 = vpop.eup %4581 }
 0x4c6   :  { %v4584_v2 = vpop.eup %4583 }
 0x4c7   :  { %v4586_v23 = vpop.eup %4585 }
 0x4c9   :  { %v4588_v16 = vpop.eup %4587 }
 0x4ca   :  { %v4590_v17 = vpop.eup %4589 }
 0x4cb   :  { %v4195_v0 = vpop.f32.mrf.mxu0  ;;  %v4592_v38 = vpop.eup %4591 }
 0x4cc   :  { %v2789_v39 = vmul.f32 %v4568_v18, %v4195_v0 }
 0x4cd   :  { %v2636_v47 = vpop.f32.mrf.mxu0 }
 0x4ce   :  { %v2787_v12 = vmul.f32 %v4562_v31, %v2636_v47 }
 0x4cf   :  { %v4179_v45 = vpop.f32.mrf.mxu1  ;;  %v4196_v11 = vpop.f32.mrf.mxu0 }
 0x4d0   :  { %v2790_v13 = vmul.f32 %v4564_v42, %v4196_v11  ;;  %v2781_v5 = vmul.f32 %v4576_v60, %v4179_v45 }
 0x4d1   :  { %v2547_v37 = vpop.f32.mrf.mxu1  ;;  %v2639_v25 = vpop.f32.mrf.mxu0 }
 0x4d2   :  { %v2788_v55 = vmul.f32 %v4566_v27, %v2639_v25  ;;  %v2824_v36 = vpack.c.bf16 %v2790_v13, %v2789_v39  ;;  %v2779_v22 = vmul.f32 %v4570_v3, %v2547_v37 }
 0x4d3   :  { %v4180_v10 = vpop.f32.mrf.mxu1 }
 0x4d4   :  { %v2823_v49 = vpack.c.bf16 %v2788_v55, %v2787_v12  ;;  %v2782_v21 = vmul.f32 %v4572_v56, %v4180_v10 }
 0x4d5   :  { %v2550_v41 = vpop.f32.mrf.mxu1 }
 0x4d6   :  { %v2780_v48 = vmul.f32 %v4574_v9, %v2550_v41  ;;  %4273 = vmatprep.mubr.msk.bf16.mxu0 %vm549_vm1, %v2823_v49  ;;  %v2820_v33 = vpack.c.bf16 %v2782_v21, %v2781_v5 }
 0x4d7   :  { %v4183_v19 = vpop.f32.mrf.mxu1  ;;  %4274 = vmatmul.mubr.msk.bf16.vlgmr.msra.gmra.mxu0 %vm549_vm1, %v2824_v36 }
 0x4d8   :  { %v2819_v7 = vpack.c.bf16 %v2780_v48, %v2779_v22  ;;  %v2785_v15 = vmul.f32 %v4584_v2, %v4183_v19 }
 0x4d9   :  { %v2563_v4 = vpop.f32.mrf.mxu1 }
 0x4da   :  { %4263 = vmatprep.mubr.msk.bf16.mxu1 %vm549_vm1, %v2819_v7  ;;  %v2783_v54 = vmul.f32 %v4578_v20, %v2563_v4  ;;  %v6281_v7 = vld [vmem:[%s6426_s4] ss:$0 sm:$0xff] }
 0x4db   :  { %v4184_v61 = vpop.f32.mrf.mxu1  ;;  %4264 = vmatmul.mubr.msk.bf16.vlgmr.msra.gmra.mxu1 %vm549_vm1, %v2820_v33 }
 0x4dc   :  { %v4199_v6 = vpop.f32.mrf.mxu0  ;;  %v2786_v30 = vmul.f32 %v4580_v8, %v4184_v61 }
 0x4dd   :  { %v2566_v53 = vpop.f32.mrf.mxu1  ;;  %v2793_v59 = vmul.f32 %v4592_v38, %v4199_v6 }
 0x4de   :  { %v2784_v29 = vmul.f32 %v4582_v34, %v2566_v53  ;;  %v2652_v40 = vpop.f32.mrf.mxu0  ;;  %v2822_v35 = vpack.c.bf16 %v2786_v30, %v2785_v15 }
 0x4df   :  { %v2791_v62 = vmul.f32 %v4586_v23, %v2652_v40 }
 0x4e0   :  { %v2821_v32 = vpack.c.bf16 %v2784_v29, %v2783_v54  ;;  %v4200_v57 = vpop.f32.mrf.mxu0 }
 0x4e1   :  { %v2794_v51 = vmul.f32 %v4588_v16, %v4200_v57 }
 0x4e2   :  { %v2655_v24 = vpop.f32.mrf.mxu0  ;;  %4267 = vmatprep.mubr.msk.bf16.mxu1 %vm549_vm1, %v2821_v32 }
 0x4e3   :  { %v2792_v44 = vmul.f32 %v4590_v17, %v2655_v24  ;;  %4268 = vmatmul.mubr.msk.bf16.gmra.mxu1 %vm549_vm1, %v2822_v35  ;;  %v2826_v26 = vpack.c.bf16 %v2794_v51, %v2793_v59 }
 0x4e5   :  { %v2825_v52 = vpack.c.bf16 %v2792_v44, %v2791_v62 }
 0x4e7   :  { %4277 = vmatprep.mubr.msk.bf16.mxu0 %vm549_vm1, %v2825_v52 }
 0x4e8   :  { %4278 = vmatmul.mubr.msk.bf16.gmra.mxu0 %vm549_vm1, %v2826_v26 }
 0x516   :  { %v4205_v63 = vpop.f32.mrf.mxu1 }
 0x517   :  { %v3490_v55 = vsel %vm100_vm0, %v4205_v63, 0.0 }
 0x518   :  { %v2885_v58 = vpop.f32.mrf.mxu1 }
 0x519   :  { %v3476_v56 = vsel %vm100_vm0, %v2885_v58, 0.0 }
 0x51a   :  { %v4206_v50 = vpop.f32.mrf.mxu1 }
 0x51b   :  { %v3497_v22 = vsel %vm100_vm0, %v4206_v50, 0.0 }
 0x51c   :  { %v2888_v28 = vpop.f32.mrf.mxu1 }
 0x51d   :  { %v3483_v8 = vsel %vm100_vm0, %v2888_v28, 0.0 }
 0x51e   :  { %v4209_v0 = vpop.f32.mrf.mxu1 }
 0x51f   :  { %v3518_v59 = vsel %vm100_vm0, %v4209_v0, 0.0 }
 0x520   :  { %v6261_v47 = vpop.f32.mrf.mxu1 }
 0x521   :  { %v3504_v58 = vsel %vm100_vm0, %v6261_v47, 0.0 }
 0x522   :  { %v6263_v45 = vpop.f32.mrf.mxu1 }
 0x524   :  { %v6265_v42 = vpop.f32.mrf.mxu1 }
 0x52b   :  { %v4215_v1 = vpop.f32.mrf.mxu0 }
 0x52c   :  { %v3491_v18 = vsel %vm100_vm0, %v4215_v1, 0.0 }
 0x52d   :  { %v2965_v14 = vpop.f32.mrf.mxu0  ;;  %v3492_v39 = vadd.f32 %v3491_v18, %v3490_v55 }
 0x52e   :  { %v3477_v3 = vsel %vm100_vm0, %v2965_v14, 0.0 }
 0x52f   :  { %v4216_v31 = vpop.f32.mrf.mxu0  ;;  %v4225_v27 = vpop.f32.mrf.mxu1  ;;  %v3478_v36 = vadd.f32 %v3477_v3, %v3476_v56 }
 0x530   :  { %v3493_v43 = vsel %vm100_vm0, %v4225_v27, 0.0  ;;  %v3498_v49 = vsel %vm100_vm0, %v4216_v31, 0.0 }
 0x531   :  { %v2968_v11 = vpop.f32.mrf.mxu0  ;;  %v3045_v37 = vpop.f32.mrf.mxu1  ;;  %v3494_v21 = vadd.f32 %v3493_v43, %v3492_v39  ;;  %v3499_v33 = vadd.f32 %v3498_v49, %v3497_v22 }
 0x532   :  { %v3479_v9 = vsel %vm100_vm0, %v3045_v37, 0.0  ;;  %v3484_v48 = vsel %vm100_vm0, %v2968_v11, 0.0 }
 0x533   :  { %v4226_v12 = vpop.f32.mrf.mxu1  ;;  %v3480_v4 = vadd.f32 %v3479_v9, %v3478_v36  ;;  %v3485_v30 = vadd.f32 %v3484_v48, %v3483_v8 }
 0x534   :  { %v3500_v5 = vsel %vm100_vm0, %v4226_v12, 0.0 }
 0x535   :  { %v3048_v41 = vpop.f32.mrf.mxu1  ;;  %v3501_v53 = vadd.f32 %v3500_v5, %v3499_v33 }
 0x536   :  { %v3486_v6 = vsel %vm100_vm0, %v3048_v41, 0.0 }
 0x537   :  { %v3487_v23 = vadd.f32 %v3486_v6, %v3485_v30 }
 0x53b   :  { %v4219_v46 = vpop.f32.mrf.mxu0 }
 0x53c   :  { %v3519_v62 = vsel %vm100_vm0, %v4219_v46, 0.0  ;;  %v3525_v46 = vsel %vm100_vm0, %v6263_v45, 0.0 }
 0x53d   :  { %v2981_v13 = vpop.f32.mrf.mxu0  ;;  %v3520_v63 = vadd.f32 %v3519_v62, %v3518_v59 }
 0x53e   :  { %v3505_v52 = vsel %vm100_vm0, %v2981_v13, 0.0 }
 0x53f   :  { %v4220_v25 = vpop.f32.mrf.mxu0  ;;  %v4229_v2 = vpop.f32.mrf.mxu1  ;;  %v3506_v1 = vadd.f32 %v3505_v52, %v3504_v58 }
 0x540   :  { %v3521_v26 = vsel %vm100_vm0, %v4229_v2, 0.0  ;;  %v3526_v50 = vsel %vm100_vm0, %v4220_v25, 0.0  ;;  %v3511_v25 = vsel %vm100_vm0, %v6265_v42, 0.0 }
 0x541   :  { %v2984_v10 = vpop.f32.mrf.mxu0  ;;  %v3061_v17 = vpop.f32.mrf.mxu1  ;;  %v3522_v14 = vadd.f32 %v3521_v26, %v3520_v63  ;;  %v3527_v37 = vadd.f32 %v3526_v50, %v3525_v46 }
 0x542   :  { %v3507_v28 = vsel %vm100_vm0, %v3061_v17, 0.0  ;;  %v3512_v0 = vsel %vm100_vm0, %v2984_v10, 0.0 }
 0x543   :  { %v4230_v44 = vpop.f32.mrf.mxu1  ;;  %v3508_v18 = vadd.f32 %v3507_v28, %v3506_v1  ;;  %v3513_v43 = vadd.f32 %v3512_v0, %v3511_v25 }
 0x544   :  { %v3528_v27 = vsel %vm100_vm0, %v4230_v44, 0.0 }
 0x545   :  { %v3064_v31 = vpop.f32.mrf.mxu1  ;;  %v3529_v39 = vadd.f32 %v3528_v27, %v3527_v37 }
 0x546   :  { %v3514_v55 = vsel %vm100_vm0, %v3064_v31, 0.0 }
 0x547   :  { %v3515_v9 = vadd.f32 %v3514_v55, %v3513_v43 }
 0x54b   :  { %v4235_v60 = vpop.f32.mrf.mxu0 }
 0x54c   :  { %v3495_v19 = vsel %vm100_vm0, %v4235_v60, 0.0 }
 0x54d   :  { %v3496_v20 = vadd.f32 %v3495_v19, %v3494_v21  ;;  %v3125_v61 = vpop.f32.mrf.mxu0 }
 0x54e   :  { %v3481_v34 = vsel %vm100_vm0, %v3125_v61, 0.0 }
 0x54f   :  { %v3597_v54 = vadd.f32 %v6281_v7, %v3496_v20  ;;  %v3482_v29 = vadd.f32 %v3481_v34, %v3480_v4  ;;  %v4236_v40 = vpop.f32.mrf.mxu0  ;;  %v4245_v19 = vpop.f32.mrf.mxu1 }
 0x550   :  { %v3502_v15 = vsel %vm100_vm0, %v4236_v40, 0.0 }
 0x551   :  { %3613 = vst.msk [vmem:[%s6427_s5 + $0x10] sm:$0xff] %vm100_vm0, %v3597_v54  ;;  %v3595_v32 = vadd.f32 %v6281_v7, %v3482_v29  ;;  %v3503_v57 = vadd.f32 %v3502_v15, %v3501_v53  ;;  %v3128_v16 = vpop.f32.mrf.mxu0  ;;  %v3205_v4 = vpop.f32.mrf.mxu1 }
 0x552   :  { %v3488_v35 = vsel %vm100_vm0, %v3128_v16, 0.0  ;;  %v3546_v16 = vsel %vm100_vm0, %v4245_v19, 0.0 }
 0x553   :  { %3611 = vst.msk [vmem:[%s6427_s5] sm:$0xff] %vm100_vm0, %v3595_v32  ;;  %v3598_v51 = vadd.f32 %v6281_v7, %v3503_v57  ;;  %v3489_v24 = vadd.f32 %v3488_v35, %v3487_v23  ;;  %v4246_v61 = vpop.f32.mrf.mxu1 }
 0x554   :  { %v3553_v63 = vsel %vm100_vm0, %v4246_v61, 0.0 }
 0x555   :  { %3614 = vst.msk [vmem:[%s6427_s5 + $0x18] sm:$0xff] %vm100_vm0, %v3598_v51  ;;  %v3596_v38 = vadd.f32 %v6281_v7, %v3489_v24  ;;  %v3208_v34 = vpop.f32.mrf.mxu1  ;;  %v3532_v24 = vsel %vm100_vm0, %v3205_v4, 0.0 }
 0x556   :  { %v3539_v46 = vsel %vm100_vm0, %v3208_v34, 0.0 }
 0x557   :  { %3612 = vst.msk [vmem:[%s6427_s5 + $0x8] sm:$0xff] %vm100_vm0, %v3596_v38 }
 0x55b   :  { %v4239_v11 = vpop.f32.mrf.mxu0 }
 0x55c   :  { %v3523_v13 = vsel %vm100_vm0, %v4239_v11, 0.0 }
 0x55d   :  { %v3524_v47 = vadd.f32 %v3523_v13, %v3522_v14  ;;  %v3141_v12 = vpop.f32.mrf.mxu0 }
 0x55e   :  { %v3509_v3 = vsel %vm100_vm0, %v3141_v12, 0.0 }
 0x55f   :  { %v3601_v45 = vadd.f32 %v6281_v7, %v3524_v47  ;;  %v3510_v10 = vadd.f32 %v3509_v3, %v3508_v18  ;;  %v4240_v56 = vpop.f32.mrf.mxu0  ;;  %v4249_v30 = vpop.f32.mrf.mxu1 }
 0x560   :  { %v3530_v49 = vsel %vm100_vm0, %v4240_v56, 0.0 }
 0x561   :  { %3617 = vst.msk [vmem:[%s6427_s5 + $0x30] sm:$0xff] %vm100_vm0, %v3601_v45  ;;  %v3599_v42 = vadd.f32 %v6281_v7, %v3510_v10  ;;  %v3531_v36 = vadd.f32 %v3530_v49, %v3529_v39  ;;  %v3144_v21 = vpop.f32.mrf.mxu0  ;;  %v3221_v2 = vpop.f32.mrf.mxu1  ;;  %v3574_v49 = vsel %vm100_vm0, %v4249_v30, 0.0 }
 0x562   :  { %v3516_v41 = vsel %vm100_vm0, %v3144_v21, 0.0 }
 0x563   :  { %3615 = vst.msk [vmem:[%s6427_s5 + $0x20] sm:$0xff] %vm100_vm0, %v3599_v42  ;;  %v3602_v60 = vadd.f32 %v6281_v7, %v3531_v36  ;;  %v3517_v22 = vadd.f32 %v3516_v41, %v3515_v9  ;;  %v4250_v29 = vpop.f32.mrf.mxu1 }
 0x565   :  { %3618 = vst.msk [vmem:[%s6427_s5 + $0x38] sm:$0xff] %vm100_vm0, %v3602_v60  ;;  %v3600_v48 = vadd.f32 %v6281_v7, %v3517_v22  ;;  %v6348_v32 = vpop.f32.mrf.mxu1 }
 0x567   :  { %3616 = vst.msk [vmem:[%s6427_s5 + $0x28] sm:$0xff] %vm100_vm0, %v3600_v48  ;;  %v3560_v48 = vsel %vm100_vm0, %v3221_v2, 0.0 }
 0x56b   :  { %v4255_v5 = vpop.f32.mrf.mxu0 }
 0x56c   :  { %v3547_v23 = vsel %vm100_vm0, %v4255_v5, 0.0 }
 0x56d   :  { %v3285_v33 = vpop.f32.mrf.mxu0  ;;  %v3548_v17 = vadd.f32 %v3547_v23, %v3546_v16  ;;  %v3567_v16 = vsel %vm100_vm0, %v6348_v32, 0.0 }
 0x56e   :  { %v3533_v35 = vsel %vm100_vm0, %v3285_v33, 0.0 }
 0x56f   :  { %v4256_v20 = vpop.f32.mrf.mxu0  ;;  %v3534_v44 = vadd.f32 %v3533_v35, %v3532_v24 }
 0x570   :  { %v3554_v38 = vsel %vm100_vm0, %v4256_v20, 0.0 }
 0x571   :  { %v3288_v8 = vpop.f32.mrf.mxu0  ;;  %v3555_v1 = vadd.f32 %v3554_v38, %v3553_v63 }
 0x572   :  { %v3540_v58 = vsel %vm100_vm0, %v3288_v8, 0.0 }
 0x573   :  { %v3541_v13 = vadd.f32 %v3540_v58, %v3539_v46 }
 0x583   :  { %v4259_v6 = vpop.f32.mrf.mxu0 }
 0x584   :  { %v3575_v43 = vsel %vm100_vm0, %v4259_v6, 0.0  ;;  %v3581_v6 = vsel %vm100_vm0, %v4250_v29, 0.0 }
 0x585   :  { %v3301_v53 = vpop.f32.mrf.mxu0  ;;  %v3576_v22 = vadd.f32 %v3575_v43, %v3574_v49 }
 0x586   :  { %v3561_v42 = vsel %vm100_vm0, %v3301_v53, 0.0 }
 0x587   :  { %v4260_v54 = vpop.f32.mrf.mxu0  ;;  %v3562_v20 = vadd.f32 %v3561_v42, %v3560_v48 }
 0x588   :  { %v3582_v5 = vsel %vm100_vm0, %v4260_v54, 0.0 }
 0x589   :  { %v3304_v40 = vpop.f32.mrf.mxu0  ;;  %v3583_v54 = vadd.f32 %v3582_v5, %v3581_v6 }
 0x58a   :  { %v3568_v34 = vsel %vm100_vm0, %v3304_v40, 0.0 }
 0x58b   :  { %v3569_v35 = vadd.f32 %v3568_v34, %v3567_v16 }
 0x597   :  { %v4275_v15 = vpop.f32.mrf.mxu0 }
 0x598   :  { %v3551_v50 = vsel %vm100_vm0, %v4275_v15, 0.0 }
 0x599   :  { %v3445_v57 = vpop.f32.mrf.mxu0 }
 0x59a   :  { %v3537_v0 = vsel %vm100_vm0, %v3445_v57, 0.0 }
 0x59b   :  { %v4265_v51 = vpop.f32.mrf.mxu1  ;;  %v4276_v52 = vpop.f32.mrf.mxu0 }
 0x59c   :  { %v3549_v62 = vsel %vm100_vm0, %v4265_v51, 0.0  ;;  %v3558_v55 = vsel %vm100_vm0, %v4276_v52, 0.0 }
 0x59d   :  { %v3550_v59 = vadd.f32 %v3549_v62, %v3548_v17  ;;  %v3365_v26 = vpop.f32.mrf.mxu1  ;;  %v3448_v47 = vpop.f32.mrf.mxu0 }
 0x59e   :  { %v3535_v28 = vsel %vm100_vm0, %v3365_v26, 0.0  ;;  %v3544_v9 = vsel %vm100_vm0, %v3448_v47, 0.0 }
 0x59f   :  { %v3552_v14 = vadd.f32 %v3551_v50, %v3550_v59  ;;  %v3536_v31 = vadd.f32 %v3535_v28, %v3534_v44  ;;  %v4266_v11 = vpop.f32.mrf.mxu1 }
 0x5a0   :  { %v3556_v27 = vsel %vm100_vm0, %v4266_v11, 0.0 }
 0x5a1   :  { %v3605_v37 = vadd.f32 %v6281_v7, %v3552_v14  ;;  %v3538_v18 = vadd.f32 %v3537_v0, %v3536_v31  ;;  %v3557_v12 = vadd.f32 %v3556_v27, %v3555_v1  ;;  %v3368_v25 = vpop.f32.mrf.mxu1 }
 0x5a2   :  { %v3542_v3 = vsel %vm100_vm0, %v3368_v25, 0.0 }
 0x5a3   :  { %3621 = vst.msk [vmem:[%s6427_s5 + $0x50] sm:$0xff] %vm100_vm0, %v3605_v37  ;;  %v3603_v39 = vadd.f32 %v6281_v7, %v3538_v18  ;;  %v3559_v45 = vadd.f32 %v3558_v55, %v3557_v12  ;;  %v3543_v10 = vadd.f32 %v3542_v3, %v3541_v13  ;;  %v4269_v56 = vpop.f32.mrf.mxu1 }
 0x5a4   :  { %v3577_v41 = vsel %vm100_vm0, %v4269_v56, 0.0 }
 0x5a5   :  { %3619 = vst.msk [vmem:[%s6427_s5 + $0x40] sm:$0xff] %vm100_vm0, %v3603_v39  ;;  %v3606_v36 = vadd.f32 %v6281_v7, %v3559_v45  ;;  %v3545_v21 = vadd.f32 %v3544_v9, %v3543_v10  ;;  %v3381_v60 = vpop.f32.mrf.mxu1  ;;  %v3578_v61 = vadd.f32 %v3577_v41, %v3576_v22 }
 0x5a6   :  { %v3563_v33 = vsel %vm100_vm0, %v3381_v60, 0.0 }
 0x5a7   :  { %3622 = vst.msk [vmem:[%s6427_s5 + $0x58] sm:$0xff] %vm100_vm0, %v3606_v36  ;;  %v3604_v19 = vadd.f32 %v6281_v7, %v3545_v21  ;;  %v4270_v4 = vpop.f32.mrf.mxu1  ;;  %v3564_v15 = vadd.f32 %v3563_v33, %v3562_v20 }
 0x5a8   :  { %v4279_v8 = vpop.f32.mrf.mxu0  ;;  %v3584_v30 = vsel %vm100_vm0, %v4270_v4, 0.0 }
 0x5a9   :  { %3620 = vst.msk [vmem:[%s6427_s5 + $0x48] sm:$0xff] %vm100_vm0, %v3604_v19  ;;  %v3579_v53 = vsel %vm100_vm0, %v4279_v8, 0.0  ;;  %v3384_v2 = vpop.f32.mrf.mxu1  ;;  %v3585_v17 = vadd.f32 %v3584_v30, %v3583_v54 }
 0x5aa   :  { %v3580_v23 = vadd.f32 %v3579_v53, %v3578_v61  ;;  %v3461_v57 = vpop.f32.mrf.mxu0  ;;  %v3570_v29 = vsel %vm100_vm0, %v3384_v2, 0.0 }
 0x5ab   :  { %v3565_v40 = vsel %vm100_vm0, %v3461_v57, 0.0  ;;  %v3571_v44 = vadd.f32 %v3570_v29, %v3569_v35 }
 0x5ac   :  { %v3609_v51 = vadd.f32 %v6281_v7, %v3580_v23  ;;  %v3566_v24 = vadd.f32 %v3565_v40, %v3564_v15  ;;  %v4280_v38 = vpop.f32.mrf.mxu0 }
 0x5ad   :  { %v3586_v62 = vsel %vm100_vm0, %v4280_v38, 0.0 }
 0x5ae   :  { %3625 = vst.msk [vmem:[%s6427_s5 + $0x70] sm:$0xff] %vm100_vm0, %v3609_v51  ;;  %v3607_v32 = vadd.f32 %v6281_v7, %v3566_v24  ;;  %v3587_v59 = vadd.f32 %v3586_v62, %v3585_v17  ;;  %v3464_v52 = vpop.f32.mrf.mxu0 }
 0x5af   :  { %v3572_v26 = vsel %vm100_vm0, %v3464_v52, 0.0 }
 0x5b0   :  { %3623 = vst.msk [vmem:[%s6427_s5 + $0x60] sm:$0xff] %vm100_vm0, %v3607_v32  ;;  %v3610_v63 = vadd.f32 %v6281_v7, %v3587_v59  ;;  %v3573_v58 = vadd.f32 %v3572_v26, %v3571_v44 }
 0x5b2   :  { %3626 = vst.msk [vmem:[%s6427_s5 + $0x78] sm:$0xff] %vm100_vm0, %v3610_v63  ;;  %v3608_v50 = vadd.f32 %v6281_v7, %v3573_v58 }
 0x5b4   :  { %3624 = vst.msk [vmem:[%s6427_s5 + $0x68] sm:$0xff] %vm100_vm0, %v3608_v50 }

</bundles_post_ra>
